<compile_context>
chip_gen: v6e
topology: v6e:2x2x1
jax: 0.10.0
libtpu: 0.0.40
codegen_flags: <defaults>
</compile_context>

<pallas_src>
import functools

import jax
import jax.numpy as jnp
from jax import lax
from jax.experimental import pallas as pl
from jax.experimental.pallas import tpu as pltpu

INF = 1.0 * 10000000.0  # matches the PyTorch module's finite "-INF" penalty


# ---------------------------------------------------------------------------
# Pallas kernel
# ---------------------------------------------------------------------------
def _make_beam_topk_kernel(V, D, TV, K2):
    # Python scalars only: captured jnp constants are rejected by pallas_call.
    NEG = float("-inf")
    BIG = int(2 ** 30)

    def kernel(flag_ref,                       # SMEM (1,) i32 scalar prefetch
               probs_ref, alive_ref,           # (1, D, TV), (1, D, 1)
               flat_vals_ref, flat_idx_ref,    # (1, 1, K2) f32 / i32
               first_vals_ref, first_idx_ref): # (1, 1, K2) f32 / i32
        v_i = pl.program_id(1)
        v_base = v_i * TV

        lane_iota = lax.broadcasted_iota(jnp.int32, (1, TV), 1)
        kq_iota = lax.broadcasted_iota(jnp.int32, (1, K2), 1)
        row_iota = lax.broadcasted_iota(jnp.int32, (D, 1), 0)

        # ---- init resident running top-K2 accumulators on first vocab tile.
        # Placeholders are (-inf, distinct indices 0..K2-1) so even the
        # degenerate "fewer than K2 finite probs" case yields distinct ids.
        @pl.when(v_i == 0)
        def _init():
            flat_vals_ref[0] = jnp.full((1, K2), NEG, jnp.float32)
            flat_idx_ref[0] = kq_iota
            first_vals_ref[0] = jnp.full((1, K2), NEG, jnp.float32)
            first_idx_ref[0] = kq_iota

        probs = probs_ref[0].astype(jnp.float32)        # (D, TV)
        alive_b = alive_ref[0]                          # (D, 1)
        work = jnp.log(probs) + alive_b                 # (D, TV) curr log probs

        # ---- per-draft top-K2 candidates for this vocab tile (all drafts at
        # once; they share vreg sublanes, so this is the cheapest exact form).
        cand_vals = jnp.full((D, K2), NEG, jnp.float32)
        cand_lane = jnp.zeros((D, K2), jnp.int32)
        for k in range(K2):
            m_k = jnp.max(work, axis=1, keepdims=True)                     # (D,1)
            a_k = jnp.min(jnp.where(work == m_k, lane_iota, BIG),
                          axis=1, keepdims=True)                           # (D,1)
            col = kq_iota == k
            cand_vals = jnp.where(col, m_k, cand_vals)
            cand_lane = jnp.where(col, a_k, cand_lane)
            work = jnp.where(lane_iota == a_k, NEG, work)

        def merge_one(val, idx, vref, iref):
            # streaming top-K2: replace the current running minimum if larger.
            rv = vref[0]                                                   # (1,K2)
            ri = iref[0]
            cmin = jnp.min(rv, axis=1, keepdims=True)                      # (1,1)
            cpos = jnp.min(jnp.where(rv == cmin, kq_iota, BIG),
                           axis=1, keepdims=True)                          # (1,1)
            take = (kq_iota == cpos) & (val > cmin)                        # (1,K2)
            vref[0] = jnp.where(take, val, rv)
            iref[0] = jnp.where(take, idx, ri)

        # ---- merge this tile's top-K2 (out of the D*K2 candidate pool) into
        # the running flat top-K2 (tiny single-vreg ops only).
        pool_v = cand_vals
        pool_i = row_iota * V + (cand_lane + v_base)                       # flat idx
        for _ in range(K2):
            pm = jnp.max(jnp.max(pool_v, axis=1, keepdims=True),
                         axis=0, keepdims=True)                            # (1,1)
            pi = jnp.min(jnp.min(jnp.where(pool_v == pm, pool_i, BIG),
                                 axis=1, keepdims=True),
                         axis=0, keepdims=True)                            # (1,1)
            merge_one(pm, pi, flat_vals_ref, flat_idx_ref)
            pool_v = jnp.where((pool_v == pm) & (pool_i == pi), NEG, pool_v)

        # ---- first-generation path: top-K2 of draft-0 log-probs only.
        # Draft-0's candidates are already computed; subtracting the constant
        # alive_log_probs[p, 0] preserves ordering, so this is ~free and is
        # skipped entirely (pl.when) once no prompt is on its first step.
        @pl.when(flag_ref[0] != 0)
        def _first():
            alive0 = alive_b[0:1, :]                                       # (1,1)
            fv = cand_vals[0:1, :] - alive0                                # (1,K2)
            fi = cand_lane[0:1, :] + v_base                                # (1,K2)
            for k in range(K2):
                merge_one(fv[:, k:k + 1], fi[:, k:k + 1],
                          first_vals_ref, first_idx_ref)

    return kernel


def beam_topk_pallas(probs3, alive_log_probs, first_flag, *, tile_v=2048):
    """probs3: (P, D, V), alive_log_probs: (P, D), first_flag: scalar bool/int.

    Returns (flat_vals, flat_idx, first_vals, first_idx), each (P, 2D),
    sorted in descending value order (torch.topk contract).
    """
    P, D, V = probs3.shape
    K2 = 2 * D
    LANE = 128
    v_lane = ((V + LANE - 1) // LANE) * LANE
    TV = min(max(LANE, (tile_v // LANE) * LANE), v_lane)
    V_pad = ((v_lane + TV - 1) // TV) * TV
    n_vt = V_pad // TV
    assert D * V_pad < 2 ** 30, "draft*vocab flat index overflows int32 sentinel"

    if V_pad != V:
        # padded probs are 0 -> log = -inf -> never selected
        probs3 = jnp.pad(probs3, ((0, 0), (0, 0), (0, V_pad - V)))
    alive3 = alive_log_probs.astype(jnp.float32).reshape(P, D, 1)
    flag = jnp.asarray(first_flag, jnp.int32).reshape(1)

    kernel = _make_beam_topk_kernel(V=V, D=D, TV=TV, K2=K2)
    out_shape = (
        jax.ShapeDtypeStruct((P, 1, K2), jnp.float32),
        jax.ShapeDtypeStruct((P, 1, K2), jnp.int32),
        jax.ShapeDtypeStruct((P, 1, K2), jnp.float32),
        jax.ShapeDtypeStruct((P, 1, K2), jnp.int32),
    )
    grid_spec = pltpu.PrefetchScalarGridSpec(
        num_scalar_prefetch=1,
        grid=(P, n_vt),
        in_specs=[
            pl.BlockSpec((1, D, TV), lambda p, v, flag: (p, 0, v)),
            pl.BlockSpec((1, D, 1), lambda p, v, flag: (p, 0, 0)),
        ],
        out_specs=[
            pl.BlockSpec((1, 1, K2), lambda p, v, flag: (p, 0, 0))
            for _ in range(4)
        ],
    )
    fv, fi, v0, i0 = pl.pallas_call(
        kernel,
        grid_spec=grid_spec,
        out_shape=out_shape,
        compiler_params=pltpu.CompilerParams(
            dimension_semantics=("parallel", "arbitrary"),
            vmem_limit_bytes=32 * 1024 * 1024),
    )(flag, probs3, alive3)

    def _sorted(vals, idx):
        vals = vals[:, 0, :]
        idx = idx[:, 0, :]
        order = jnp.argsort(-vals, axis=-1)
        return (jnp.take_along_axis(vals, order, axis=-1),
                jnp.take_along_axis(idx, order, axis=-1))

    flat_vals, flat_idx = _sorted(fv, fi)
    first_vals, first_idx = _sorted(v0, i0)
    return flat_vals, flat_idx, first_vals, first_idx


# ---------------------------------------------------------------------------
# Beam state (mirrors the nn.Module's __init__ buffers)
# ---------------------------------------------------------------------------
def init_beam_state(initial_tokens):
    P, D, _ = initial_tokens.shape
    return dict(
        alive_seq=initial_tokens,
        fin_seq=initial_tokens,
        alive_log_probs=jnp.zeros((P, D), jnp.float32),
        fin_log_probs=jnp.full((P, D), -jnp.inf, jnp.float32),
    )


# ---------------------------------------------------------------------------
# Forward (standard beam-search path) — glue around the Pallas kernel
# ---------------------------------------------------------------------------
@functools.partial(jax.jit,
                   static_argnames=("cur_pos", "eos_id", "vocab_size", "tile_v"))
def beam_forward(state, probs, still_prompt, is_first, cur_pos, eos_id,
                 vocab_size, tile_v=2048):
    alive_seq = state["alive_seq"]
    alive_log_probs = state["alive_log_probs"]
    fin_seq = state["fin_seq"]
    fin_log_probs = state["fin_log_probs"]

    P, D, L = alive_seq.shape
    V = vocab_size
    probs3 = probs.reshape(P, D, V)

    # ---- hot path in Pallas: log + alive add + top-2k reductions ----
    first_flag = jnp.any(is_first)
    flat_vals, flat_idx, first_vals, first_idx = beam_topk_pallas(
        probs3, alive_log_probs, first_flag, tile_v=tile_v)

    topk_beam_id = flat_idx // V
    topk_idx = flat_idx % V
    topk_log_probs = flat_vals

    # first-generation override (beam ids intentionally NOT overridden,
    # matching the PyTorch code)
    first_lp = alive_log_probs[:, 0:1] + first_vals
    topk_idx = jnp.where(is_first[:, None], first_idx, topk_idx)
    topk_log_probs = jnp.where(is_first[:, None], first_lp, topk_log_probs)

    # gather sequences and write the new token at cur_pos
    topk_seq = jnp.take_along_axis(alive_seq, topk_beam_id[:, :, None], axis=1)
    topk_seq = topk_seq.at[:, :, cur_pos].set(topk_idx)
    topk_finished = topk_idx == eos_id

    # grow_alive
    ga_lp = topk_log_probs + topk_finished.astype(jnp.float32) * (-INF)
    new_alive_log_probs, new_alive_idx = lax.top_k(ga_lp, D)
    new_alive_seq = jnp.take_along_axis(topk_seq, new_alive_idx[:, :, None], axis=1)
    attention_change_ids = jnp.take_along_axis(topk_beam_id, new_alive_idx, axis=1)

    # grow_fin
    gf_lp = topk_log_probs + (~topk_finished).astype(jnp.float32) * (-INF)
    fin_seq_cat = jnp.concatenate([fin_seq, topk_seq], axis=1)
    fin_lp_cat = jnp.concatenate([fin_log_probs, gf_lp], axis=1)
    new_fin_log_probs, new_fin_idx = lax.top_k(fin_lp_cat, D)
    new_fin_seq = jnp.take_along_axis(fin_seq_cat, new_fin_idx[:, :, None], axis=1)

    # still_prompt handling
    attention_change_ids = jnp.where(
        still_prompt[:, None],
        jnp.arange(D, dtype=attention_change_ids.dtype)[None, :],
        attention_change_ids)
    new_state = dict(
        alive_seq=jnp.where(still_prompt[:, None, None], alive_seq, new_alive_seq),
        alive_log_probs=jnp.where(still_prompt[:, None], alive_log_probs,
                                  new_alive_log_probs),
        fin_seq=jnp.where(still_prompt[:, None, None], fin_seq, new_fin_seq),
        fin_log_probs=jnp.where(still_prompt[:, None], fin_log_probs,
                                new_fin_log_probs),
    )
    return attention_change_ids, new_state


# ---------------------------------------------------------------------------
if __name__ == "__main__":
    P, D, L, V = 2, 4, 16, 500     # n_prompts, n_drafts, seq_len, vocab
    TILE_V = 128                   # small tile -> exercises multi-tile merge + pad
    cur_pos = 5
    eos_id = 2

    key = jax.random.PRNGKey(0)
    k1, k2 = jax.random.split(key)
    initial_tokens = jax.random.randint(k1, (P, D, L), 0, V, dtype=jnp.int32)
    probs_raw = jax.random.uniform(k2, (P * D, V), dtype=jnp.float32) + 1e-3
    probs = probs_raw / probs_raw.sum(axis=-1, keepdims=True)

    still_prompt = jnp.array([False, True])
    is_first = jnp.array([True, False])

    state = init_beam_state(initial_tokens)

    # run the Pallas-backed forward once
    attn_ids, new_state = beam_forward(state, probs, still_prompt, is_first,
                                       cur_pos, eos_id, V, tile_v=TILE_V)
    jax.block_until_ready(attn_ids)
    jax.block_until_ready(new_state["alive_seq"])

    # sanity-check the kernel's top-2k against a pure-JAX reference
    probs3 = probs.reshape(P, D, V)
    alive0 = state["alive_log_probs"]
    flat_vals, flat_idx, first_vals, first_idx = beam_topk_pallas(
        probs3, alive0, jnp.any(is_first), tile_v=TILE_V)
    jax.block_until_ready(flat_vals)

    curr = jnp.log(probs3) + alive0[:, :, None]
    ref_vals, _ = lax.top_k(curr.reshape(P, D * V), 2 * D)
    assert jnp.allclose(flat_vals, ref_vals, atol=1e-5, rtol=1e-5)
    gathered = jnp.take_along_axis(curr.reshape(P, D * V), flat_idx, axis=1)
    assert jnp.allclose(gathered, flat_vals, atol=1e-5, rtol=1e-5)

    lp0 = jnp.log(probs3)[:, 0, :]
    ref0_vals, _ = lax.top_k(lp0, 2 * D)
    assert jnp.allclose(first_vals, ref0_vals, atol=1e-5, rtol=1e-5)
    gathered0 = jnp.take_along_axis(lp0, first_idx, axis=1)
    assert jnp.allclose(gathered0, first_vals, atol=1e-5, rtol=1e-5)

    assert attn_ids.shape == (P, D)
    assert new_state["alive_seq"].shape == (P, D, L)

    print("KERNEL_OK")
</pallas_src>

<mosaic_0001>
module attributes {stable_mosaic.version = 11 : i64} {
  func.func @kernel(%arg0: i32, %arg1: i32, %arg2: memref<1xi32, #tpu.memory_space<smem>>, %arg3: memref<1x4x128xf32, #tpu.memory_space<vmem>>, %arg4: memref<1x4x1xf32, #tpu.memory_space<vmem>>, %arg5: memref<1x1x8xf32, #tpu.memory_space<vmem>>, %arg6: memref<1x1x8xi32, #tpu.memory_space<vmem>>, %arg7: memref<1x1x8xf32, #tpu.memory_space<vmem>>, %arg8: memref<1x1x8xi32, #tpu.memory_space<vmem>>) attributes {dimension_semantics = [#tpu.dimension_semantics<parallel>, #tpu.dimension_semantics<arbitrary>], iteration_bounds = array<i64: 2, 4>, scalar_prefetch = 1 : i64, scratch_operands = 0 : i64, tpu.core_type = #tpu.core_type<tc>, window_params = [{transform_indices = @transform_0, window_bounds = array<i64: 1, 4, 128>}, {transform_indices = @transform_1, window_bounds = array<i64: 1, 4, 1>}, {transform_indices = @transform_2, window_bounds = array<i64: 1, 1, 8>}, {transform_indices = @transform_3, window_bounds = array<i64: 1, 1, 8>}, {transform_indices = @transform_4, window_bounds = array<i64: 1, 1, 8>}, {transform_indices = @transform_5, window_bounds = array<i64: 1, 1, 8>}]} {
    %c128_i32 = arith.constant 128 : i32
    %0 = arith.muli %arg1, %c128_i32 : i32
    %1 = tpu.iota {dimensions = array<i32: 1>} : vector<1x128xi32>
    %2 = tpu.iota {dimensions = array<i32: 1>} : vector<1x8xi32>
    %3 = tpu.iota {dimensions = array<i32: 0>} : vector<4x1xi32>
    %c0_i32 = arith.constant 0 : i32
    %4 = arith.cmpi eq, %arg1, %c0_i32 : i32
    %5 = arith.extui %4 : i1 to i32
    %c0_i32_0 = arith.constant 0 : i32
    %6 = arith.cmpi ne, %5, %c0_i32_0 : i32
    scf.if %6 {
      %cst_208 = arith.constant 0xFF800000 : f32
      %614 = vector.broadcast %cst_208 : f32 to vector<1x8xf32>
      %c0_209 = arith.constant 0 : index
      %c0_210 = arith.constant 0 : index
      %c0_211 = arith.constant 0 : index
      %615 = vector.load %arg5[%c0_209, %c0_210, %c0_211] : memref<1x1x8xf32, #tpu.memory_space<vmem>>, vector<1x1x8xf32>
      %616 = vector.shape_cast %615 : vector<1x1x8xf32> to vector<1x8xf32>
      %617 = vector.shape_cast %614 : vector<1x8xf32> to vector<1x1x8xf32>
      tpu.vector_store %arg5[%c0_209, %c0_210, %c0_211], %617 {strides = array<i32>} : memref<1x1x8xf32, #tpu.memory_space<vmem>>, vector<1x1x8xf32>,
      %c0_212 = arith.constant 0 : index
      %c0_213 = arith.constant 0 : index
      %c0_214 = arith.constant 0 : index
      %618 = vector.load %arg6[%c0_212, %c0_213, %c0_214] : memref<1x1x8xi32, #tpu.memory_space<vmem>>, vector<1x1x8xi32>
      %619 = vector.shape_cast %618 : vector<1x1x8xi32> to vector<1x8xi32>
      %620 = vector.shape_cast %2 : vector<1x8xi32> to vector<1x1x8xi32>
      tpu.vector_store %arg6[%c0_212, %c0_213, %c0_214], %620 {strides = array<i32>} : memref<1x1x8xi32, #tpu.memory_space<vmem>>, vector<1x1x8xi32>,
      %cst_215 = arith.constant 0xFF800000 : f32
      %621 = vector.broadcast %cst_215 : f32 to vector<1x8xf32>
      %c0_216 = arith.constant 0 : index
      %c0_217 = arith.constant 0 : index
      %c0_218 = arith.constant 0 : index
      %622 = vector.load %arg7[%c0_216, %c0_217, %c0_218] : memref<1x1x8xf32, #tpu.memory_space<vmem>>, vector<1x1x8xf32>
      %623 = vector.shape_cast %622 : vector<1x1x8xf32> to vector<1x8xf32>
      %624 = vector.shape_cast %621 : vector<1x8xf32> to vector<1x1x8xf32>
      tpu.vector_store %arg7[%c0_216, %c0_217, %c0_218], %624 {strides = array<i32>} : memref<1x1x8xf32, #tpu.memory_space<vmem>>, vector<1x1x8xf32>,
      %c0_219 = arith.constant 0 : index
      %c0_220 = arith.constant 0 : index
      %c0_221 = arith.constant 0 : index
      %625 = vector.load %arg8[%c0_219, %c0_220, %c0_221] : memref<1x1x8xi32, #tpu.memory_space<vmem>>, vector<1x1x8xi32>
      %626 = vector.shape_cast %625 : vector<1x1x8xi32> to vector<1x8xi32>
      %627 = vector.shape_cast %2 : vector<1x8xi32> to vector<1x1x8xi32>
      tpu.vector_store %arg8[%c0_219, %c0_220, %c0_221], %627 {strides = array<i32>} : memref<1x1x8xi32, #tpu.memory_space<vmem>>, vector<1x1x8xi32>,
    } else {
    }
    %c0 = arith.constant 0 : index
    %c0_1 = arith.constant 0 : index
    %c0_2 = arith.constant 0 : index
    %7 = vector.load %arg3[%c0, %c0_1, %c0_2] : memref<1x4x128xf32, #tpu.memory_space<vmem>>, vector<1x4x128xf32>
    %8 = vector.shape_cast %7 : vector<1x4x128xf32> to vector<4x128xf32>
    %c0_3 = arith.constant 0 : index
    %c0_4 = arith.constant 0 : index
    %c0_5 = arith.constant 0 : index
    %9 = vector.load %arg4[%c0_3, %c0_4, %c0_5] : memref<1x4x1xf32, #tpu.memory_space<vmem>>, vector<1x4x1xf32>
    %10 = vector.shape_cast %9 : vector<1x4x1xf32> to vector<4x1xf32>
    %11 = math.log %8 : vector<4x128xf32>
    %12 = vector.broadcast %10 : vector<4x1xf32> to vector<4x128xf32>
    %13 = arith.addf %11, %12 : vector<4x128xf32>
    %cst = arith.constant 0xFF800000 : f32
    %14 = vector.broadcast %cst : f32 to vector<4x8xf32>
    %c0_i32_6 = arith.constant 0 : i32
    %15 = vector.broadcast %c0_i32_6 : i32 to vector<4x8xi32>
    %cst_7 = arith.constant dense<0xFF800000> : vector<4xf32>
    %16 = vector.multi_reduction <maximumf>, %13, %cst_7 [1] : vector<4x128xf32> to vector<4xf32>
    %17 = vector.shape_cast %16 : vector<4xf32> to vector<4x1xf32>
    %18 = vector.broadcast %17 : vector<4x1xf32> to vector<4x128xf32>
    %19 = arith.cmpf oeq, %13, %18 : vector<4x128xf32>
    %c1073741824_i32 = arith.constant 1073741824 : i32
    %20 = vector.shape_cast %1 : vector<1x128xi32> to vector<1x128xi32>
    %21 = vector.broadcast %20 : vector<1x128xi32> to vector<4x128xi32>
    %22 = vector.broadcast %c1073741824_i32 : i32 to vector<4x128xi32>
    %23 = arith.select %19, %21, %22 : vector<4x128xi1>, vector<4x128xi32>
    %cst_8 = arith.constant dense<2147483647> : vector<4xi32>
    %24 = vector.multi_reduction <minsi>, %23, %cst_8 [1] : vector<4x128xi32> to vector<4xi32>
    %25 = vector.shape_cast %24 : vector<4xi32> to vector<4x1xi32>
    %c0_i32_9 = arith.constant 0 : i32
    %26 = vector.broadcast %c0_i32_9 : i32 to vector<1x8xi32>
    %27 = arith.cmpi eq, %2, %26 : vector<1x8xi32>
    %28 = vector.shape_cast %27 : vector<1x8xi1> to vector<1x8xi1>
    %29 = vector.broadcast %28 : vector<1x8xi1> to vector<4x8xi1>
    %30 = vector.shape_cast %17 : vector<4x1xf32> to vector<4x1xf32>
    %31 = vector.broadcast %30 : vector<4x1xf32> to vector<4x8xf32>
    %32 = arith.select %29, %31, %14 : vector<4x8xi1>, vector<4x8xf32>
    %33 = vector.shape_cast %27 : vector<1x8xi1> to vector<1x8xi1>
    %34 = vector.broadcast %33 : vector<1x8xi1> to vector<4x8xi1>
    %35 = vector.shape_cast %25 : vector<4x1xi32> to vector<4x1xi32>
    %36 = vector.broadcast %35 : vector<4x1xi32> to vector<4x8xi32>
    %37 = arith.select %34, %36, %15 : vector<4x8xi1>, vector<4x8xi32>
    %38 = vector.broadcast %1 : vector<1x128xi32> to vector<4x128xi32>
    %39 = vector.broadcast %25 : vector<4x1xi32> to vector<4x128xi32>
    %40 = arith.cmpi eq, %38, %39 : vector<4x128xi32>
    %cst_10 = arith.constant 0xFF800000 : f32
    %41 = vector.broadcast %cst_10 : f32 to vector<4x128xf32>
    %42 = arith.select %40, %41, %13 : vector<4x128xi1>, vector<4x128xf32>
    %cst_11 = arith.constant dense<0xFF800000> : vector<4xf32>
    %43 = vector.multi_reduction <maximumf>, %42, %cst_11 [1] : vector<4x128xf32> to vector<4xf32>
    %44 = vector.shape_cast %43 : vector<4xf32> to vector<4x1xf32>
    %45 = vector.broadcast %44 : vector<4x1xf32> to vector<4x128xf32>
    %46 = arith.cmpf oeq, %42, %45 : vector<4x128xf32>
    %c1073741824_i32_12 = arith.constant 1073741824 : i32
    %47 = vector.shape_cast %1 : vector<1x128xi32> to vector<1x128xi32>
    %48 = vector.broadcast %47 : vector<1x128xi32> to vector<4x128xi32>
    %49 = vector.broadcast %c1073741824_i32_12 : i32 to vector<4x128xi32>
    %50 = arith.select %46, %48, %49 : vector<4x128xi1>, vector<4x128xi32>
    %cst_13 = arith.constant dense<2147483647> : vector<4xi32>
    %51 = vector.multi_reduction <minsi>, %50, %cst_13 [1] : vector<4x128xi32> to vector<4xi32>
    %52 = vector.shape_cast %51 : vector<4xi32> to vector<4x1xi32>
    %c1_i32 = arith.constant 1 : i32
    %53 = vector.broadcast %c1_i32 : i32 to vector<1x8xi32>
    %54 = arith.cmpi eq, %2, %53 : vector<1x8xi32>
    %55 = vector.shape_cast %54 : vector<1x8xi1> to vector<1x8xi1>
    %56 = vector.broadcast %55 : vector<1x8xi1> to vector<4x8xi1>
    %57 = vector.shape_cast %44 : vector<4x1xf32> to vector<4x1xf32>
    %58 = vector.broadcast %57 : vector<4x1xf32> to vector<4x8xf32>
    %59 = arith.select %56, %58, %32 : vector<4x8xi1>, vector<4x8xf32>
    %60 = vector.shape_cast %54 : vector<1x8xi1> to vector<1x8xi1>
    %61 = vector.broadcast %60 : vector<1x8xi1> to vector<4x8xi1>
    %62 = vector.shape_cast %52 : vector<4x1xi32> to vector<4x1xi32>
    %63 = vector.broadcast %62 : vector<4x1xi32> to vector<4x8xi32>
    %64 = arith.select %61, %63, %37 : vector<4x8xi1>, vector<4x8xi32>
    %65 = vector.broadcast %1 : vector<1x128xi32> to vector<4x128xi32>
    %66 = vector.broadcast %52 : vector<4x1xi32> to vector<4x128xi32>
    %67 = arith.cmpi eq, %65, %66 : vector<4x128xi32>
    %cst_14 = arith.constant 0xFF800000 : f32
    %68 = vector.broadcast %cst_14 : f32 to vector<4x128xf32>
    %69 = arith.select %67, %68, %42 : vector<4x128xi1>, vector<4x128xf32>
    %cst_15 = arith.constant dense<0xFF800000> : vector<4xf32>
    %70 = vector.multi_reduction <maximumf>, %69, %cst_15 [1] : vector<4x128xf32> to vector<4xf32>
    %71 = vector.shape_cast %70 : vector<4xf32> to vector<4x1xf32>
    %72 = vector.broadcast %71 : vector<4x1xf32> to vector<4x128xf32>
    %73 = arith.cmpf oeq, %69, %72 : vector<4x128xf32>
    %c1073741824_i32_16 = arith.constant 1073741824 : i32
    %74 = vector.shape_cast %1 : vector<1x128xi32> to vector<1x128xi32>
    %75 = vector.broadcast %74 : vector<1x128xi32> to vector<4x128xi32>
    %76 = vector.broadcast %c1073741824_i32_16 : i32 to vector<4x128xi32>
    %77 = arith.select %73, %75, %76 : vector<4x128xi1>, vector<4x128xi32>
    %cst_17 = arith.constant dense<2147483647> : vector<4xi32>
    %78 = vector.multi_reduction <minsi>, %77, %cst_17 [1] : vector<4x128xi32> to vector<4xi32>
    %79 = vector.shape_cast %78 : vector<4xi32> to vector<4x1xi32>
    %c2_i32 = arith.constant 2 : i32
    %80 = vector.broadcast %c2_i32 : i32 to vector<1x8xi32>
    %81 = arith.cmpi eq, %2, %80 : vector<1x8xi32>
    %82 = vector.shape_cast %81 : vector<1x8xi1> to vector<1x8xi1>
    %83 = vector.broadcast %82 : vector<1x8xi1> to vector<4x8xi1>
    %84 = vector.shape_cast %71 : vector<4x1xf32> to vector<4x1xf32>
    %85 = vector.broadcast %84 : vector<4x1xf32> to vector<4x8xf32>
    %86 = arith.select %83, %85, %59 : vector<4x8xi1>, vector<4x8xf32>
    %87 = vector.shape_cast %81 : vector<1x8xi1> to vector<1x8xi1>
    %88 = vector.broadcast %87 : vector<1x8xi1> to vector<4x8xi1>
    %89 = vector.shape_cast %79 : vector<4x1xi32> to vector<4x1xi32>
    %90 = vector.broadcast %89 : vector<4x1xi32> to vector<4x8xi32>
    %91 = arith.select %88, %90, %64 : vector<4x8xi1>, vector<4x8xi32>
    %92 = vector.broadcast %1 : vector<1x128xi32> to vector<4x128xi32>
    %93 = vector.broadcast %79 : vector<4x1xi32> to vector<4x128xi32>
    %94 = arith.cmpi eq, %92, %93 : vector<4x128xi32>
    %cst_18 = arith.constant 0xFF800000 : f32
    %95 = vector.broadcast %cst_18 : f32 to vector<4x128xf32>
    %96 = arith.select %94, %95, %69 : vector<4x128xi1>, vector<4x128xf32>
    %cst_19 = arith.constant dense<0xFF800000> : vector<4xf32>
    %97 = vector.multi_reduction <maximumf>, %96, %cst_19 [1] : vector<4x128xf32> to vector<4xf32>
    %98 = vector.shape_cast %97 : vector<4xf32> to vector<4x1xf32>
    %99 = vector.broadcast %98 : vector<4x1xf32> to vector<4x128xf32>
    %100 = arith.cmpf oeq, %96, %99 : vector<4x128xf32>
    %c1073741824_i32_20 = arith.constant 1073741824 : i32
    %101 = vector.shape_cast %1 : vector<1x128xi32> to vector<1x128xi32>
    %102 = vector.broadcast %101 : vector<1x128xi32> to vector<4x128xi32>
    %103 = vector.broadcast %c1073741824_i32_20 : i32 to vector<4x128xi32>
    %104 = arith.select %100, %102, %103 : vector<4x128xi1>, vector<4x128xi32>
    %cst_21 = arith.constant dense<2147483647> : vector<4xi32>
    %105 = vector.multi_reduction <minsi>, %104, %cst_21 [1] : vector<4x128xi32> to vector<4xi32>
    %106 = vector.shape_cast %105 : vector<4xi32> to vector<4x1xi32>
    %c3_i32 = arith.constant 3 : i32
    %107 = vector.broadcast %c3_i32 : i32 to vector<1x8xi32>
    %108 = arith.cmpi eq, %2, %107 : vector<1x8xi32>
    %109 = vector.shape_cast %108 : vector<1x8xi1> to vector<1x8xi1>
    %110 = vector.broadcast %109 : vector<1x8xi1> to vector<4x8xi1>
    %111 = vector.shape_cast %98 : vector<4x1xf32> to vector<4x1xf32>
    %112 = vector.broadcast %111 : vector<4x1xf32> to vector<4x8xf32>
    %113 = arith.select %110, %112, %86 : vector<4x8xi1>, vector<4x8xf32>
    %114 = vector.shape_cast %108 : vector<1x8xi1> to vector<1x8xi1>
    %115 = vector.broadcast %114 : vector<1x8xi1> to vector<4x8xi1>
    %116 = vector.shape_cast %106 : vector<4x1xi32> to vector<4x1xi32>
    %117 = vector.broadcast %116 : vector<4x1xi32> to vector<4x8xi32>
    %118 = arith.select %115, %117, %91 : vector<4x8xi1>, vector<4x8xi32>
    %119 = vector.broadcast %1 : vector<1x128xi32> to vector<4x128xi32>
    %120 = vector.broadcast %106 : vector<4x1xi32> to vector<4x128xi32>
    %121 = arith.cmpi eq, %119, %120 : vector<4x128xi32>
    %cst_22 = arith.constant 0xFF800000 : f32
    %122 = vector.broadcast %cst_22 : f32 to vector<4x128xf32>
    %123 = arith.select %121, %122, %96 : vector<4x128xi1>, vector<4x128xf32>
    %cst_23 = arith.constant dense<0xFF800000> : vector<4xf32>
    %124 = vector.multi_reduction <maximumf>, %123, %cst_23 [1] : vector<4x128xf32> to vector<4xf32>
    %125 = vector.shape_cast %124 : vector<4xf32> to vector<4x1xf32>
    %126 = vector.broadcast %125 : vector<4x1xf32> to vector<4x128xf32>
    %127 = arith.cmpf oeq, %123, %126 : vector<4x128xf32>
    %c1073741824_i32_24 = arith.constant 1073741824 : i32
    %128 = vector.shape_cast %1 : vector<1x128xi32> to vector<1x128xi32>
    %129 = vector.broadcast %128 : vector<1x128xi32> to vector<4x128xi32>
    %130 = vector.broadcast %c1073741824_i32_24 : i32 to vector<4x128xi32>
    %131 = arith.select %127, %129, %130 : vector<4x128xi1>, vector<4x128xi32>
    %cst_25 = arith.constant dense<2147483647> : vector<4xi32>
    %132 = vector.multi_reduction <minsi>, %131, %cst_25 [1] : vector<4x128xi32> to vector<4xi32>
    %133 = vector.shape_cast %132 : vector<4xi32> to vector<4x1xi32>
    %c4_i32 = arith.constant 4 : i32
    %134 = vector.broadcast %c4_i32 : i32 to vector<1x8xi32>
    %135 = arith.cmpi eq, %2, %134 : vector<1x8xi32>
    %136 = vector.shape_cast %135 : vector<1x8xi1> to vector<1x8xi1>
    %137 = vector.broadcast %136 : vector<1x8xi1> to vector<4x8xi1>
    %138 = vector.shape_cast %125 : vector<4x1xf32> to vector<4x1xf32>
    %139 = vector.broadcast %138 : vector<4x1xf32> to vector<4x8xf32>
    %140 = arith.select %137, %139, %113 : vector<4x8xi1>, vector<4x8xf32>
    %141 = vector.shape_cast %135 : vector<1x8xi1> to vector<1x8xi1>
    %142 = vector.broadcast %141 : vector<1x8xi1> to vector<4x8xi1>
    %143 = vector.shape_cast %133 : vector<4x1xi32> to vector<4x1xi32>
    %144 = vector.broadcast %143 : vector<4x1xi32> to vector<4x8xi32>
    %145 = arith.select %142, %144, %118 : vector<4x8xi1>, vector<4x8xi32>
    %146 = vector.broadcast %1 : vector<1x128xi32> to vector<4x128xi32>
    %147 = vector.broadcast %133 : vector<4x1xi32> to vector<4x128xi32>
    %148 = arith.cmpi eq, %146, %147 : vector<4x128xi32>
    %cst_26 = arith.constant 0xFF800000 : f32
    %149 = vector.broadcast %cst_26 : f32 to vector<4x128xf32>
    %150 = arith.select %148, %149, %123 : vector<4x128xi1>, vector<4x128xf32>
    %cst_27 = arith.constant dense<0xFF800000> : vector<4xf32>
    %151 = vector.multi_reduction <maximumf>, %150, %cst_27 [1] : vector<4x128xf32> to vector<4xf32>
    %152 = vector.shape_cast %151 : vector<4xf32> to vector<4x1xf32>
    %153 = vector.broadcast %152 : vector<4x1xf32> to vector<4x128xf32>
    %154 = arith.cmpf oeq, %150, %153 : vector<4x128xf32>
    %c1073741824_i32_28 = arith.constant 1073741824 : i32
    %155 = vector.shape_cast %1 : vector<1x128xi32> to vector<1x128xi32>
    %156 = vector.broadcast %155 : vector<1x128xi32> to vector<4x128xi32>
    %157 = vector.broadcast %c1073741824_i32_28 : i32 to vector<4x128xi32>
    %158 = arith.select %154, %156, %157 : vector<4x128xi1>, vector<4x128xi32>
    %cst_29 = arith.constant dense<2147483647> : vector<4xi32>
    %159 = vector.multi_reduction <minsi>, %158, %cst_29 [1] : vector<4x128xi32> to vector<4xi32>
    %160 = vector.shape_cast %159 : vector<4xi32> to vector<4x1xi32>
    %c5_i32 = arith.constant 5 : i32
    %161 = vector.broadcast %c5_i32 : i32 to vector<1x8xi32>
    %162 = arith.cmpi eq, %2, %161 : vector<1x8xi32>
    %163 = vector.shape_cast %162 : vector<1x8xi1> to vector<1x8xi1>
    %164 = vector.broadcast %163 : vector<1x8xi1> to vector<4x8xi1>
    %165 = vector.shape_cast %152 : vector<4x1xf32> to vector<4x1xf32>
    %166 = vector.broadcast %165 : vector<4x1xf32> to vector<4x8xf32>
    %167 = arith.select %164, %166, %140 : vector<4x8xi1>, vector<4x8xf32>
    %168 = vector.shape_cast %162 : vector<1x8xi1> to vector<1x8xi1>
    %169 = vector.broadcast %168 : vector<1x8xi1> to vector<4x8xi1>
    %170 = vector.shape_cast %160 : vector<4x1xi32> to vector<4x1xi32>
    %171 = vector.broadcast %170 : vector<4x1xi32> to vector<4x8xi32>
    %172 = arith.select %169, %171, %145 : vector<4x8xi1>, vector<4x8xi32>
    %173 = vector.broadcast %1 : vector<1x128xi32> to vector<4x128xi32>
    %174 = vector.broadcast %160 : vector<4x1xi32> to vector<4x128xi32>
    %175 = arith.cmpi eq, %173, %174 : vector<4x128xi32>
    %cst_30 = arith.constant 0xFF800000 : f32
    %176 = vector.broadcast %cst_30 : f32 to vector<4x128xf32>
    %177 = arith.select %175, %176, %150 : vector<4x128xi1>, vector<4x128xf32>
    %cst_31 = arith.constant dense<0xFF800000> : vector<4xf32>
    %178 = vector.multi_reduction <maximumf>, %177, %cst_31 [1] : vector<4x128xf32> to vector<4xf32>
    %179 = vector.shape_cast %178 : vector<4xf32> to vector<4x1xf32>
    %180 = vector.broadcast %179 : vector<4x1xf32> to vector<4x128xf32>
    %181 = arith.cmpf oeq, %177, %180 : vector<4x128xf32>
    %c1073741824_i32_32 = arith.constant 1073741824 : i32
    %182 = vector.shape_cast %1 : vector<1x128xi32> to vector<1x128xi32>
    %183 = vector.broadcast %182 : vector<1x128xi32> to vector<4x128xi32>
    %184 = vector.broadcast %c1073741824_i32_32 : i32 to vector<4x128xi32>
    %185 = arith.select %181, %183, %184 : vector<4x128xi1>, vector<4x128xi32>
    %cst_33 = arith.constant dense<2147483647> : vector<4xi32>
    %186 = vector.multi_reduction <minsi>, %185, %cst_33 [1] : vector<4x128xi32> to vector<4xi32>
    %187 = vector.shape_cast %186 : vector<4xi32> to vector<4x1xi32>
    %c6_i32 = arith.constant 6 : i32
    %188 = vector.broadcast %c6_i32 : i32 to vector<1x8xi32>
    %189 = arith.cmpi eq, %2, %188 : vector<1x8xi32>
    %190 = vector.shape_cast %189 : vector<1x8xi1> to vector<1x8xi1>
    %191 = vector.broadcast %190 : vector<1x8xi1> to vector<4x8xi1>
    %192 = vector.shape_cast %179 : vector<4x1xf32> to vector<4x1xf32>
    %193 = vector.broadcast %192 : vector<4x1xf32> to vector<4x8xf32>
    %194 = arith.select %191, %193, %167 : vector<4x8xi1>, vector<4x8xf32>
    %195 = vector.shape_cast %189 : vector<1x8xi1> to vector<1x8xi1>
    %196 = vector.broadcast %195 : vector<1x8xi1> to vector<4x8xi1>
    %197 = vector.shape_cast %187 : vector<4x1xi32> to vector<4x1xi32>
    %198 = vector.broadcast %197 : vector<4x1xi32> to vector<4x8xi32>
    %199 = arith.select %196, %198, %172 : vector<4x8xi1>, vector<4x8xi32>
    %200 = vector.broadcast %1 : vector<1x128xi32> to vector<4x128xi32>
    %201 = vector.broadcast %187 : vector<4x1xi32> to vector<4x128xi32>
    %202 = arith.cmpi eq, %200, %201 : vector<4x128xi32>
    %cst_34 = arith.constant 0xFF800000 : f32
    %203 = vector.broadcast %cst_34 : f32 to vector<4x128xf32>
    %204 = arith.select %202, %203, %177 : vector<4x128xi1>, vector<4x128xf32>
    %cst_35 = arith.constant dense<0xFF800000> : vector<4xf32>
    %205 = vector.multi_reduction <maximumf>, %204, %cst_35 [1] : vector<4x128xf32> to vector<4xf32>
    %206 = vector.shape_cast %205 : vector<4xf32> to vector<4x1xf32>
    %207 = vector.broadcast %206 : vector<4x1xf32> to vector<4x128xf32>
    %208 = arith.cmpf oeq, %204, %207 : vector<4x128xf32>
    %c1073741824_i32_36 = arith.constant 1073741824 : i32
    %209 = vector.shape_cast %1 : vector<1x128xi32> to vector<1x128xi32>
    %210 = vector.broadcast %209 : vector<1x128xi32> to vector<4x128xi32>
    %211 = vector.broadcast %c1073741824_i32_36 : i32 to vector<4x128xi32>
    %212 = arith.select %208, %210, %211 : vector<4x128xi1>, vector<4x128xi32>
    %cst_37 = arith.constant dense<2147483647> : vector<4xi32>
    %213 = vector.multi_reduction <minsi>, %212, %cst_37 [1] : vector<4x128xi32> to vector<4xi32>
    %214 = vector.shape_cast %213 : vector<4xi32> to vector<4x1xi32>
    %c7_i32 = arith.constant 7 : i32
    %215 = vector.broadcast %c7_i32 : i32 to vector<1x8xi32>
    %216 = arith.cmpi eq, %2, %215 : vector<1x8xi32>
    %217 = vector.shape_cast %216 : vector<1x8xi1> to vector<1x8xi1>
    %218 = vector.broadcast %217 : vector<1x8xi1> to vector<4x8xi1>
    %219 = vector.shape_cast %206 : vector<4x1xf32> to vector<4x1xf32>
    %220 = vector.broadcast %219 : vector<4x1xf32> to vector<4x8xf32>
    %221 = arith.select %218, %220, %194 : vector<4x8xi1>, vector<4x8xf32>
    %222 = vector.shape_cast %216 : vector<1x8xi1> to vector<1x8xi1>
    %223 = vector.broadcast %222 : vector<1x8xi1> to vector<4x8xi1>
    %224 = vector.shape_cast %214 : vector<4x1xi32> to vector<4x1xi32>
    %225 = vector.broadcast %224 : vector<4x1xi32> to vector<4x8xi32>
    %226 = arith.select %223, %225, %199 : vector<4x8xi1>, vector<4x8xi32>
    %c500_i32 = arith.constant 500 : i32
    %227 = vector.broadcast %c500_i32 : i32 to vector<4x1xi32>
    %228 = arith.muli %3, %227 : vector<4x1xi32>
    %229 = vector.broadcast %0 : i32 to vector<4x8xi32>
    %230 = arith.addi %226, %229 : vector<4x8xi32>
    %231 = vector.broadcast %228 : vector<4x1xi32> to vector<4x8xi32>
    %232 = arith.addi %231, %230 : vector<4x8xi32>
    %cst_38 = arith.constant dense<0xFF800000> : vector<4xf32>
    %233 = vector.multi_reduction <maximumf>, %221, %cst_38 [1] : vector<4x8xf32> to vector<4xf32>
    %234 = vector.shape_cast %233 : vector<4xf32> to vector<4x1xf32>
    %cst_39 = arith.constant dense<0xFF800000> : vector<1xf32>
    %235 = vector.multi_reduction <maximumf>, %234, %cst_39 [0] : vector<4x1xf32> to vector<1xf32>
    %236 = vector.shape_cast %235 : vector<1xf32> to vector<1x1xf32>
    %237 = vector.broadcast %236 : vector<1x1xf32> to vector<4x8xf32>
    %238 = arith.cmpf oeq, %221, %237 : vector<4x8xf32>
    %c1073741824_i32_40 = arith.constant 1073741824 : i32
    %239 = vector.broadcast %c1073741824_i32_40 : i32 to vector<4x8xi32>
    %240 = arith.select %238, %232, %239 : vector<4x8xi1>, vector<4x8xi32>
    %cst_41 = arith.constant dense<2147483647> : vector<4xi32>
    %241 = vector.multi_reduction <minsi>, %240, %cst_41 [1] : vector<4x8xi32> to vector<4xi32>
    %242 = vector.shape_cast %241 : vector<4xi32> to vector<4x1xi32>
    %cst_42 = arith.constant dense<2147483647> : vector<1xi32>
    %243 = vector.multi_reduction <minsi>, %242, %cst_42 [0] : vector<4x1xi32> to vector<1xi32>
    %244 = vector.shape_cast %243 : vector<1xi32> to vector<1x1xi32>
    %c0_43 = arith.constant 0 : index
    %c0_44 = arith.constant 0 : index
    %c0_45 = arith.constant 0 : index
    %245 = vector.load %arg5[%c0_43, %c0_44, %c0_45] : memref<1x1x8xf32, #tpu.memory_space<vmem>>, vector<1x1x8xf32>
    %246 = vector.shape_cast %245 : vector<1x1x8xf32> to vector<1x8xf32>
    %c0_46 = arith.constant 0 : index
    %c0_47 = arith.constant 0 : index
    %c0_48 = arith.constant 0 : index
    %247 = vector.load %arg6[%c0_46, %c0_47, %c0_48] : memref<1x1x8xi32, #tpu.memory_space<vmem>>, vector<1x1x8xi32>
    %248 = vector.shape_cast %247 : vector<1x1x8xi32> to vector<1x8xi32>
    %cst_49 = arith.constant dense<0x7F800000> : vector<1xf32>
    %249 = vector.multi_reduction <minimumf>, %246, %cst_49 [1] : vector<1x8xf32> to vector<1xf32>
    %250 = vector.shape_cast %249 : vector<1xf32> to vector<1x1xf32>
    %251 = vector.broadcast %250 : vector<1x1xf32> to vector<1x8xf32>
    %252 = arith.cmpf oeq, %246, %251 : vector<1x8xf32>
    %c1073741824_i32_50 = arith.constant 1073741824 : i32
    %253 = vector.broadcast %c1073741824_i32_50 : i32 to vector<1x8xi32>
    %254 = arith.select %252, %2, %253 : vector<1x8xi1>, vector<1x8xi32>
    %cst_51 = arith.constant dense<2147483647> : vector<1xi32>
    %255 = vector.multi_reduction <minsi>, %254, %cst_51 [1] : vector<1x8xi32> to vector<1xi32>
    %256 = vector.shape_cast %255 : vector<1xi32> to vector<1x1xi32>
    %257 = vector.broadcast %256 : vector<1x1xi32> to vector<1x8xi32>
    %258 = arith.cmpi eq, %2, %257 : vector<1x8xi32>
    %259 = arith.cmpf ogt, %236, %250 : vector<1x1xf32>
    %260 = vector.broadcast %259 : vector<1x1xi1> to vector<1x8xi1>
    %261 = arith.andi %258, %260 : vector<1x8xi1>
    %262 = vector.shape_cast %236 : vector<1x1xf32> to vector<1x1xf32>
    %263 = vector.broadcast %262 : vector<1x1xf32> to vector<1x8xf32>
    %264 = arith.select %261, %263, %246 : vector<1x8xi1>, vector<1x8xf32>
    %c0_52 = arith.constant 0 : index
    %c0_53 = arith.constant 0 : index
    %c0_54 = arith.constant 0 : index
    %265 = vector.load %arg5[%c0_52, %c0_53, %c0_54] : memref<1x1x8xf32, #tpu.memory_space<vmem>>, vector<1x1x8xf32>
    %266 = vector.shape_cast %265 : vector<1x1x8xf32> to vector<1x8xf32>
    %267 = vector.shape_cast %264 : vector<1x8xf32> to vector<1x1x8xf32>
    tpu.vector_store %arg5[%c0_52, %c0_53, %c0_54], %267 {strides = array<i32>} : memref<1x1x8xf32, #tpu.memory_space<vmem>>, vector<1x1x8xf32>,
    %268 = vector.shape_cast %244 : vector<1x1xi32> to vector<1x1xi32>
    %269 = vector.broadcast %268 : vector<1x1xi32> to vector<1x8xi32>
    %270 = arith.select %261, %269, %248 : vector<1x8xi1>, vector<1x8xi32>
    %c0_55 = arith.constant 0 : index
    %c0_56 = arith.constant 0 : index
    %c0_57 = arith.constant 0 : index
    %271 = vector.load %arg6[%c0_55, %c0_56, %c0_57] : memref<1x1x8xi32, #tpu.memory_space<vmem>>, vector<1x1x8xi32>
    %272 = vector.shape_cast %271 : vector<1x1x8xi32> to vector<1x8xi32>
    %273 = vector.shape_cast %270 : vector<1x8xi32> to vector<1x1x8xi32>
    tpu.vector_store %arg6[%c0_55, %c0_56, %c0_57], %273 {strides = array<i32>} : memref<1x1x8xi32, #tpu.memory_space<vmem>>, vector<1x1x8xi32>,
    %274 = vector.broadcast %236 : vector<1x1xf32> to vector<4x8xf32>
    %275 = arith.cmpf oeq, %221, %274 : vector<4x8xf32>
    %276 = vector.broadcast %244 : vector<1x1xi32> to vector<4x8xi32>
    %277 = arith.cmpi eq, %232, %276 : vector<4x8xi32>
    %278 = arith.andi %275, %277 : vector<4x8xi1>
    %cst_58 = arith.constant 0xFF800000 : f32
    %279 = vector.broadcast %cst_58 : f32 to vector<4x8xf32>
    %280 = arith.select %278, %279, %221 : vector<4x8xi1>, vector<4x8xf32>
    %cst_59 = arith.constant dense<0xFF800000> : vector<4xf32>
    %281 = vector.multi_reduction <maximumf>, %280, %cst_59 [1] : vector<4x8xf32> to vector<4xf32>
    %282 = vector.shape_cast %281 : vector<4xf32> to vector<4x1xf32>
    %cst_60 = arith.constant dense<0xFF800000> : vector<1xf32>
    %283 = vector.multi_reduction <maximumf>, %282, %cst_60 [0] : vector<4x1xf32> to vector<1xf32>
    %284 = vector.shape_cast %283 : vector<1xf32> to vector<1x1xf32>
    %285 = vector.broadcast %284 : vector<1x1xf32> to vector<4x8xf32>
    %286 = arith.cmpf oeq, %280, %285 : vector<4x8xf32>
    %c1073741824_i32_61 = arith.constant 1073741824 : i32
    %287 = vector.broadcast %c1073741824_i32_61 : i32 to vector<4x8xi32>
    %288 = arith.select %286, %232, %287 : vector<4x8xi1>, vector<4x8xi32>
    %cst_62 = arith.constant dense<2147483647> : vector<4xi32>
    %289 = vector.multi_reduction <minsi>, %288, %cst_62 [1] : vector<4x8xi32> to vector<4xi32>
    %290 = vector.shape_cast %289 : vector<4xi32> to vector<4x1xi32>
    %cst_63 = arith.constant dense<2147483647> : vector<1xi32>
    %291 = vector.multi_reduction <minsi>, %290, %cst_63 [0] : vector<4x1xi32> to vector<1xi32>
    %292 = vector.shape_cast %291 : vector<1xi32> to vector<1x1xi32>
    %c0_64 = arith.constant 0 : index
    %c0_65 = arith.constant 0 : index
    %c0_66 = arith.constant 0 : index
    %293 = vector.load %arg5[%c0_64, %c0_65, %c0_66] : memref<1x1x8xf32, #tpu.memory_space<vmem>>, vector<1x1x8xf32>
    %294 = vector.shape_cast %293 : vector<1x1x8xf32> to vector<1x8xf32>
    %c0_67 = arith.constant 0 : index
    %c0_68 = arith.constant 0 : index
    %c0_69 = arith.constant 0 : index
    %295 = vector.load %arg6[%c0_67, %c0_68, %c0_69] : memref<1x1x8xi32, #tpu.memory_space<vmem>>, vector<1x1x8xi32>
    %296 = vector.shape_cast %295 : vector<1x1x8xi32> to vector<1x8xi32>
    %cst_70 = arith.constant dense<0x7F800000> : vector<1xf32>
    %297 = vector.multi_reduction <minimumf>, %294, %cst_70 [1] : vector<1x8xf32> to vector<1xf32>
    %298 = vector.shape_cast %297 : vector<1xf32> to vector<1x1xf32>
    %299 = vector.broadcast %298 : vector<1x1xf32> to vector<1x8xf32>
    %300 = arith.cmpf oeq, %294, %299 : vector<1x8xf32>
    %c1073741824_i32_71 = arith.constant 1073741824 : i32
    %301 = vector.broadcast %c1073741824_i32_71 : i32 to vector<1x8xi32>
    %302 = arith.select %300, %2, %301 : vector<1x8xi1>, vector<1x8xi32>
    %cst_72 = arith.constant dense<2147483647> : vector<1xi32>
    %303 = vector.multi_reduction <minsi>, %302, %cst_72 [1] : vector<1x8xi32> to vector<1xi32>
    %304 = vector.shape_cast %303 : vector<1xi32> to vector<1x1xi32>
    %305 = vector.broadcast %304 : vector<1x1xi32> to vector<1x8xi32>
    %306 = arith.cmpi eq, %2, %305 : vector<1x8xi32>
    %307 = arith.cmpf ogt, %284, %298 : vector<1x1xf32>
    %308 = vector.broadcast %307 : vector<1x1xi1> to vector<1x8xi1>
    %309 = arith.andi %306, %308 : vector<1x8xi1>
    %310 = vector.shape_cast %284 : vector<1x1xf32> to vector<1x1xf32>
    %311 = vector.broadcast %310 : vector<1x1xf32> to vector<1x8xf32>
    %312 = arith.select %309, %311, %294 : vector<1x8xi1>, vector<1x8xf32>
    %c0_73 = arith.constant 0 : index
    %c0_74 = arith.constant 0 : index
    %c0_75 = arith.constant 0 : index
    %313 = vector.load %arg5[%c0_73, %c0_74, %c0_75] : memref<1x1x8xf32, #tpu.memory_space<vmem>>, vector<1x1x8xf32>
    %314 = vector.shape_cast %313 : vector<1x1x8xf32> to vector<1x8xf32>
    %315 = vector.shape_cast %312 : vector<1x8xf32> to vector<1x1x8xf32>
    tpu.vector_store %arg5[%c0_73, %c0_74, %c0_75], %315 {strides = array<i32>} : memref<1x1x8xf32, #tpu.memory_space<vmem>>, vector<1x1x8xf32>,
    %316 = vector.shape_cast %292 : vector<1x1xi32> to vector<1x1xi32>
    %317 = vector.broadcast %316 : vector<1x1xi32> to vector<1x8xi32>
    %318 = arith.select %309, %317, %296 : vector<1x8xi1>, vector<1x8xi32>
    %c0_76 = arith.constant 0 : index
    %c0_77 = arith.constant 0 : index
    %c0_78 = arith.constant 0 : index
    %319 = vector.load %arg6[%c0_76, %c0_77, %c0_78] : memref<1x1x8xi32, #tpu.memory_space<vmem>>, vector<1x1x8xi32>
    %320 = vector.shape_cast %319 : vector<1x1x8xi32> to vector<1x8xi32>
    %321 = vector.shape_cast %318 : vector<1x8xi32> to vector<1x1x8xi32>
    tpu.vector_store %arg6[%c0_76, %c0_77, %c0_78], %321 {strides = array<i32>} : memref<1x1x8xi32, #tpu.memory_space<vmem>>, vector<1x1x8xi32>,
    %322 = vector.broadcast %284 : vector<1x1xf32> to vector<4x8xf32>
    %323 = arith.cmpf oeq, %280, %322 : vector<4x8xf32>
    %324 = vector.broadcast %292 : vector<1x1xi32> to vector<4x8xi32>
    %325 = arith.cmpi eq, %232, %324 : vector<4x8xi32>
    %326 = arith.andi %323, %325 : vector<4x8xi1>
    %cst_79 = arith.constant 0xFF800000 : f32
    %327 = vector.broadcast %cst_79 : f32 to vector<4x8xf32>
    %328 = arith.select %326, %327, %280 : vector<4x8xi1>, vector<4x8xf32>
    %cst_80 = arith.constant dense<0xFF800000> : vector<4xf32>
    %329 = vector.multi_reduction <maximumf>, %328, %cst_80 [1] : vector<4x8xf32> to vector<4xf32>
    %330 = vector.shape_cast %329 : vector<4xf32> to vector<4x1xf32>
    %cst_81 = arith.constant dense<0xFF800000> : vector<1xf32>
    %331 = vector.multi_reduction <maximumf>, %330, %cst_81 [0] : vector<4x1xf32> to vector<1xf32>
    %332 = vector.shape_cast %331 : vector<1xf32> to vector<1x1xf32>
    %333 = vector.broadcast %332 : vector<1x1xf32> to vector<4x8xf32>
    %334 = arith.cmpf oeq, %328, %333 : vector<4x8xf32>
    %c1073741824_i32_82 = arith.constant 1073741824 : i32
    %335 = vector.broadcast %c1073741824_i32_82 : i32 to vector<4x8xi32>
    %336 = arith.select %334, %232, %335 : vector<4x8xi1>, vector<4x8xi32>
    %cst_83 = arith.constant dense<2147483647> : vector<4xi32>
    %337 = vector.multi_reduction <minsi>, %336, %cst_83 [1] : vector<4x8xi32> to vector<4xi32>
    %338 = vector.shape_cast %337 : vector<4xi32> to vector<4x1xi32>
    %cst_84 = arith.constant dense<2147483647> : vector<1xi32>
    %339 = vector.multi_reduction <minsi>, %338, %cst_84 [0] : vector<4x1xi32> to vector<1xi32>
    %340 = vector.shape_cast %339 : vector<1xi32> to vector<1x1xi32>
    %c0_85 = arith.constant 0 : index
    %c0_86 = arith.constant 0 : index
    %c0_87 = arith.constant 0 : index
    %341 = vector.load %arg5[%c0_85, %c0_86, %c0_87] : memref<1x1x8xf32, #tpu.memory_space<vmem>>, vector<1x1x8xf32>
    %342 = vector.shape_cast %341 : vector<1x1x8xf32> to vector<1x8xf32>
    %c0_88 = arith.constant 0 : index
    %c0_89 = arith.constant 0 : index
    %c0_90 = arith.constant 0 : index
    %343 = vector.load %arg6[%c0_88, %c0_89, %c0_90] : memref<1x1x8xi32, #tpu.memory_space<vmem>>, vector<1x1x8xi32>
    %344 = vector.shape_cast %343 : vector<1x1x8xi32> to vector<1x8xi32>
    %cst_91 = arith.constant dense<0x7F800000> : vector<1xf32>
    %345 = vector.multi_reduction <minimumf>, %342, %cst_91 [1] : vector<1x8xf32> to vector<1xf32>
    %346 = vector.shape_cast %345 : vector<1xf32> to vector<1x1xf32>
    %347 = vector.broadcast %346 : vector<1x1xf32> to vector<1x8xf32>
    %348 = arith.cmpf oeq, %342, %347 : vector<1x8xf32>
    %c1073741824_i32_92 = arith.constant 1073741824 : i32
    %349 = vector.broadcast %c1073741824_i32_92 : i32 to vector<1x8xi32>
    %350 = arith.select %348, %2, %349 : vector<1x8xi1>, vector<1x8xi32>
    %cst_93 = arith.constant dense<2147483647> : vector<1xi32>
    %351 = vector.multi_reduction <minsi>, %350, %cst_93 [1] : vector<1x8xi32> to vector<1xi32>
    %352 = vector.shape_cast %351 : vector<1xi32> to vector<1x1xi32>
    %353 = vector.broadcast %352 : vector<1x1xi32> to vector<1x8xi32>
    %354 = arith.cmpi eq, %2, %353 : vector<1x8xi32>
    %355 = arith.cmpf ogt, %332, %346 : vector<1x1xf32>
    %356 = vector.broadcast %355 : vector<1x1xi1> to vector<1x8xi1>
    %357 = arith.andi %354, %356 : vector<1x8xi1>
    %358 = vector.shape_cast %332 : vector<1x1xf32> to vector<1x1xf32>
    %359 = vector.broadcast %358 : vector<1x1xf32> to vector<1x8xf32>
    %360 = arith.select %357, %359, %342 : vector<1x8xi1>, vector<1x8xf32>
    %c0_94 = arith.constant 0 : index
    %c0_95 = arith.constant 0 : index
    %c0_96 = arith.constant 0 : index
    %361 = vector.load %arg5[%c0_94, %c0_95, %c0_96] : memref<1x1x8xf32, #tpu.memory_space<vmem>>, vector<1x1x8xf32>
    %362 = vector.shape_cast %361 : vector<1x1x8xf32> to vector<1x8xf32>
    %363 = vector.shape_cast %360 : vector<1x8xf32> to vector<1x1x8xf32>
    tpu.vector_store %arg5[%c0_94, %c0_95, %c0_96], %363 {strides = array<i32>} : memref<1x1x8xf32, #tpu.memory_space<vmem>>, vector<1x1x8xf32>,
    %364 = vector.shape_cast %340 : vector<1x1xi32> to vector<1x1xi32>
    %365 = vector.broadcast %364 : vector<1x1xi32> to vector<1x8xi32>
    %366 = arith.select %357, %365, %344 : vector<1x8xi1>, vector<1x8xi32>
    %c0_97 = arith.constant 0 : index
    %c0_98 = arith.constant 0 : index
    %c0_99 = arith.constant 0 : index
    %367 = vector.load %arg6[%c0_97, %c0_98, %c0_99] : memref<1x1x8xi32, #tpu.memory_space<vmem>>, vector<1x1x8xi32>
    %368 = vector.shape_cast %367 : vector<1x1x8xi32> to vector<1x8xi32>
    %369 = vector.shape_cast %366 : vector<1x8xi32> to vector<1x1x8xi32>
    tpu.vector_store %arg6[%c0_97, %c0_98, %c0_99], %369 {strides = array<i32>} : memref<1x1x8xi32, #tpu.memory_space<vmem>>, vector<1x1x8xi32>,
    %370 = vector.broadcast %332 : vector<1x1xf32> to vector<4x8xf32>
    %371 = arith.cmpf oeq, %328, %370 : vector<4x8xf32>
    %372 = vector.broadcast %340 : vector<1x1xi32> to vector<4x8xi32>
    %373 = arith.cmpi eq, %232, %372 : vector<4x8xi32>
    %374 = arith.andi %371, %373 : vector<4x8xi1>
    %cst_100 = arith.constant 0xFF800000 : f32
    %375 = vector.broadcast %cst_100 : f32 to vector<4x8xf32>
    %376 = arith.select %374, %375, %328 : vector<4x8xi1>, vector<4x8xf32>
    %cst_101 = arith.constant dense<0xFF800000> : vector<4xf32>
    %377 = vector.multi_reduction <maximumf>, %376, %cst_101 [1] : vector<4x8xf32> to vector<4xf32>
    %378 = vector.shape_cast %377 : vector<4xf32> to vector<4x1xf32>
    %cst_102 = arith.constant dense<0xFF800000> : vector<1xf32>
    %379 = vector.multi_reduction <maximumf>, %378, %cst_102 [0] : vector<4x1xf32> to vector<1xf32>
    %380 = vector.shape_cast %379 : vector<1xf32> to vector<1x1xf32>
    %381 = vector.broadcast %380 : vector<1x1xf32> to vector<4x8xf32>
    %382 = arith.cmpf oeq, %376, %381 : vector<4x8xf32>
    %c1073741824_i32_103 = arith.constant 1073741824 : i32
    %383 = vector.broadcast %c1073741824_i32_103 : i32 to vector<4x8xi32>
    %384 = arith.select %382, %232, %383 : vector<4x8xi1>, vector<4x8xi32>
    %cst_104 = arith.constant dense<2147483647> : vector<4xi32>
    %385 = vector.multi_reduction <minsi>, %384, %cst_104 [1] : vector<4x8xi32> to vector<4xi32>
    %386 = vector.shape_cast %385 : vector<4xi32> to vector<4x1xi32>
    %cst_105 = arith.constant dense<2147483647> : vector<1xi32>
    %387 = vector.multi_reduction <minsi>, %386, %cst_105 [0] : vector<4x1xi32> to vector<1xi32>
    %388 = vector.shape_cast %387 : vector<1xi32> to vector<1x1xi32>
    %c0_106 = arith.constant 0 : index
    %c0_107 = arith.constant 0 : index
    %c0_108 = arith.constant 0 : index
    %389 = vector.load %arg5[%c0_106, %c0_107, %c0_108] : memref<1x1x8xf32, #tpu.memory_space<vmem>>, vector<1x1x8xf32>
    %390 = vector.shape_cast %389 : vector<1x1x8xf32> to vector<1x8xf32>
    %c0_109 = arith.constant 0 : index
    %c0_110 = arith.constant 0 : index
    %c0_111 = arith.constant 0 : index
    %391 = vector.load %arg6[%c0_109, %c0_110, %c0_111] : memref<1x1x8xi32, #tpu.memory_space<vmem>>, vector<1x1x8xi32>
    %392 = vector.shape_cast %391 : vector<1x1x8xi32> to vector<1x8xi32>
    %cst_112 = arith.constant dense<0x7F800000> : vector<1xf32>
    %393 = vector.multi_reduction <minimumf>, %390, %cst_112 [1] : vector<1x8xf32> to vector<1xf32>
    %394 = vector.shape_cast %393 : vector<1xf32> to vector<1x1xf32>
    %395 = vector.broadcast %394 : vector<1x1xf32> to vector<1x8xf32>
    %396 = arith.cmpf oeq, %390, %395 : vector<1x8xf32>
    %c1073741824_i32_113 = arith.constant 1073741824 : i32
    %397 = vector.broadcast %c1073741824_i32_113 : i32 to vector<1x8xi32>
    %398 = arith.select %396, %2, %397 : vector<1x8xi1>, vector<1x8xi32>
    %cst_114 = arith.constant dense<2147483647> : vector<1xi32>
    %399 = vector.multi_reduction <minsi>, %398, %cst_114 [1] : vector<1x8xi32> to vector<1xi32>
    %400 = vector.shape_cast %399 : vector<1xi32> to vector<1x1xi32>
    %401 = vector.broadcast %400 : vector<1x1xi32> to vector<1x8xi32>
    %402 = arith.cmpi eq, %2, %401 : vector<1x8xi32>
    %403 = arith.cmpf ogt, %380, %394 : vector<1x1xf32>
    %404 = vector.broadcast %403 : vector<1x1xi1> to vector<1x8xi1>
    %405 = arith.andi %402, %404 : vector<1x8xi1>
    %406 = vector.shape_cast %380 : vector<1x1xf32> to vector<1x1xf32>
    %407 = vector.broadcast %406 : vector<1x1xf32> to vector<1x8xf32>
    %408 = arith.select %405, %407, %390 : vector<1x8xi1>, vector<1x8xf32>
    %c0_115 = arith.constant 0 : index
    %c0_116 = arith.constant 0 : index
    %c0_117 = arith.constant 0 : index
    %409 = vector.load %arg5[%c0_115, %c0_116, %c0_117] : memref<1x1x8xf32, #tpu.memory_space<vmem>>, vector<1x1x8xf32>
    %410 = vector.shape_cast %409 : vector<1x1x8xf32> to vector<1x8xf32>
    %411 = vector.shape_cast %408 : vector<1x8xf32> to vector<1x1x8xf32>
    tpu.vector_store %arg5[%c0_115, %c0_116, %c0_117], %411 {strides = array<i32>} : memref<1x1x8xf32, #tpu.memory_space<vmem>>, vector<1x1x8xf32>,
    %412 = vector.shape_cast %388 : vector<1x1xi32> to vector<1x1xi32>
    %413 = vector.broadcast %412 : vector<1x1xi32> to vector<1x8xi32>
    %414 = arith.select %405, %413, %392 : vector<1x8xi1>, vector<1x8xi32>
    %c0_118 = arith.constant 0 : index
    %c0_119 = arith.constant 0 : index
    %c0_120 = arith.constant 0 : index
    %415 = vector.load %arg6[%c0_118, %c0_119, %c0_120] : memref<1x1x8xi32, #tpu.memory_space<vmem>>, vector<1x1x8xi32>
    %416 = vector.shape_cast %415 : vector<1x1x8xi32> to vector<1x8xi32>
    %417 = vector.shape_cast %414 : vector<1x8xi32> to vector<1x1x8xi32>
    tpu.vector_store %arg6[%c0_118, %c0_119, %c0_120], %417 {strides = array<i32>} : memref<1x1x8xi32, #tpu.memory_space<vmem>>, vector<1x1x8xi32>,
    %418 = vector.broadcast %380 : vector<1x1xf32> to vector<4x8xf32>
    %419 = arith.cmpf oeq, %376, %418 : vector<4x8xf32>
    %420 = vector.broadcast %388 : vector<1x1xi32> to vector<4x8xi32>
    %421 = arith.cmpi eq, %232, %420 : vector<4x8xi32>
    %422 = arith.andi %419, %421 : vector<4x8xi1>
    %cst_121 = arith.constant 0xFF800000 : f32
    %423 = vector.broadcast %cst_121 : f32 to vector<4x8xf32>
    %424 = arith.select %422, %423, %376 : vector<4x8xi1>, vector<4x8xf32>
    %cst_122 = arith.constant dense<0xFF800000> : vector<4xf32>
    %425 = vector.multi_reduction <maximumf>, %424, %cst_122 [1] : vector<4x8xf32> to vector<4xf32>
    %426 = vector.shape_cast %425 : vector<4xf32> to vector<4x1xf32>
    %cst_123 = arith.constant dense<0xFF800000> : vector<1xf32>
    %427 = vector.multi_reduction <maximumf>, %426, %cst_123 [0] : vector<4x1xf32> to vector<1xf32>
    %428 = vector.shape_cast %427 : vector<1xf32> to vector<1x1xf32>
    %429 = vector.broadcast %428 : vector<1x1xf32> to vector<4x8xf32>
    %430 = arith.cmpf oeq, %424, %429 : vector<4x8xf32>
    %c1073741824_i32_124 = arith.constant 1073741824 : i32
    %431 = vector.broadcast %c1073741824_i32_124 : i32 to vector<4x8xi32>
    %432 = arith.select %430, %232, %431 : vector<4x8xi1>, vector<4x8xi32>
    %cst_125 = arith.constant dense<2147483647> : vector<4xi32>
    %433 = vector.multi_reduction <minsi>, %432, %cst_125 [1] : vector<4x8xi32> to vector<4xi32>
    %434 = vector.shape_cast %433 : vector<4xi32> to vector<4x1xi32>
    %cst_126 = arith.constant dense<2147483647> : vector<1xi32>
    %435 = vector.multi_reduction <minsi>, %434, %cst_126 [0] : vector<4x1xi32> to vector<1xi32>
    %436 = vector.shape_cast %435 : vector<1xi32> to vector<1x1xi32>
    %c0_127 = arith.constant 0 : index
    %c0_128 = arith.constant 0 : index
    %c0_129 = arith.constant 0 : index
    %437 = vector.load %arg5[%c0_127, %c0_128, %c0_129] : memref<1x1x8xf32, #tpu.memory_space<vmem>>, vector<1x1x8xf32>
    %438 = vector.shape_cast %437 : vector<1x1x8xf32> to vector<1x8xf32>
    %c0_130 = arith.constant 0 : index
    %c0_131 = arith.constant 0 : index
    %c0_132 = arith.constant 0 : index
    %439 = vector.load %arg6[%c0_130, %c0_131, %c0_132] : memref<1x1x8xi32, #tpu.memory_space<vmem>>, vector<1x1x8xi32>
    %440 = vector.shape_cast %439 : vector<1x1x8xi32> to vector<1x8xi32>
    %cst_133 = arith.constant dense<0x7F800000> : vector<1xf32>
    %441 = vector.multi_reduction <minimumf>, %438, %cst_133 [1] : vector<1x8xf32> to vector<1xf32>
    %442 = vector.shape_cast %441 : vector<1xf32> to vector<1x1xf32>
    %443 = vector.broadcast %442 : vector<1x1xf32> to vector<1x8xf32>
    %444 = arith.cmpf oeq, %438, %443 : vector<1x8xf32>
    %c1073741824_i32_134 = arith.constant 1073741824 : i32
    %445 = vector.broadcast %c1073741824_i32_134 : i32 to vector<1x8xi32>
    %446 = arith.select %444, %2, %445 : vector<1x8xi1>, vector<1x8xi32>
    %cst_135 = arith.constant dense<2147483647> : vector<1xi32>
    %447 = vector.multi_reduction <minsi>, %446, %cst_135 [1] : vector<1x8xi32> to vector<1xi32>
    %448 = vector.shape_cast %447 : vector<1xi32> to vector<1x1xi32>
    %449 = vector.broadcast %448 : vector<1x1xi32> to vector<1x8xi32>
    %450 = arith.cmpi eq, %2, %449 : vector<1x8xi32>
    %451 = arith.cmpf ogt, %428, %442 : vector<1x1xf32>
    %452 = vector.broadcast %451 : vector<1x1xi1> to vector<1x8xi1>
    %453 = arith.andi %450, %452 : vector<1x8xi1>
    %454 = vector.shape_cast %428 : vector<1x1xf32> to vector<1x1xf32>
    %455 = vector.broadcast %454 : vector<1x1xf32> to vector<1x8xf32>
    %456 = arith.select %453, %455, %438 : vector<1x8xi1>, vector<1x8xf32>
    %c0_136 = arith.constant 0 : index
    %c0_137 = arith.constant 0 : index
    %c0_138 = arith.constant 0 : index
    %457 = vector.load %arg5[%c0_136, %c0_137, %c0_138] : memref<1x1x8xf32, #tpu.memory_space<vmem>>, vector<1x1x8xf32>
    %458 = vector.shape_cast %457 : vector<1x1x8xf32> to vector<1x8xf32>
    %459 = vector.shape_cast %456 : vector<1x8xf32> to vector<1x1x8xf32>
    tpu.vector_store %arg5[%c0_136, %c0_137, %c0_138], %459 {strides = array<i32>} : memref<1x1x8xf32, #tpu.memory_space<vmem>>, vector<1x1x8xf32>,
    %460 = vector.shape_cast %436 : vector<1x1xi32> to vector<1x1xi32>
    %461 = vector.broadcast %460 : vector<1x1xi32> to vector<1x8xi32>
    %462 = arith.select %453, %461, %440 : vector<1x8xi1>, vector<1x8xi32>
    %c0_139 = arith.constant 0 : index
    %c0_140 = arith.constant 0 : index
    %c0_141 = arith.constant 0 : index
    %463 = vector.load %arg6[%c0_139, %c0_140, %c0_141] : memref<1x1x8xi32, #tpu.memory_space<vmem>>, vector<1x1x8xi32>
    %464 = vector.shape_cast %463 : vector<1x1x8xi32> to vector<1x8xi32>
    %465 = vector.shape_cast %462 : vector<1x8xi32> to vector<1x1x8xi32>
    tpu.vector_store %arg6[%c0_139, %c0_140, %c0_141], %465 {strides = array<i32>} : memref<1x1x8xi32, #tpu.memory_space<vmem>>, vector<1x1x8xi32>,
    %466 = vector.broadcast %428 : vector<1x1xf32> to vector<4x8xf32>
    %467 = arith.cmpf oeq, %424, %466 : vector<4x8xf32>
    %468 = vector.broadcast %436 : vector<1x1xi32> to vector<4x8xi32>
    %469 = arith.cmpi eq, %232, %468 : vector<4x8xi32>
    %470 = arith.andi %467, %469 : vector<4x8xi1>
    %cst_142 = arith.constant 0xFF800000 : f32
    %471 = vector.broadcast %cst_142 : f32 to vector<4x8xf32>
    %472 = arith.select %470, %471, %424 : vector<4x8xi1>, vector<4x8xf32>
    %cst_143 = arith.constant dense<0xFF800000> : vector<4xf32>
    %473 = vector.multi_reduction <maximumf>, %472, %cst_143 [1] : vector<4x8xf32> to vector<4xf32>
    %474 = vector.shape_cast %473 : vector<4xf32> to vector<4x1xf32>
    %cst_144 = arith.constant dense<0xFF800000> : vector<1xf32>
    %475 = vector.multi_reduction <maximumf>, %474, %cst_144 [0] : vector<4x1xf32> to vector<1xf32>
    %476 = vector.shape_cast %475 : vector<1xf32> to vector<1x1xf32>
    %477 = vector.broadcast %476 : vector<1x1xf32> to vector<4x8xf32>
    %478 = arith.cmpf oeq, %472, %477 : vector<4x8xf32>
    %c1073741824_i32_145 = arith.constant 1073741824 : i32
    %479 = vector.broadcast %c1073741824_i32_145 : i32 to vector<4x8xi32>
    %480 = arith.select %478, %232, %479 : vector<4x8xi1>, vector<4x8xi32>
    %cst_146 = arith.constant dense<2147483647> : vector<4xi32>
    %481 = vector.multi_reduction <minsi>, %480, %cst_146 [1] : vector<4x8xi32> to vector<4xi32>
    %482 = vector.shape_cast %481 : vector<4xi32> to vector<4x1xi32>
    %cst_147 = arith.constant dense<2147483647> : vector<1xi32>
    %483 = vector.multi_reduction <minsi>, %482, %cst_147 [0] : vector<4x1xi32> to vector<1xi32>
    %484 = vector.shape_cast %483 : vector<1xi32> to vector<1x1xi32>
    %c0_148 = arith.constant 0 : index
    %c0_149 = arith.constant 0 : index
    %c0_150 = arith.constant 0 : index
    %485 = vector.load %arg5[%c0_148, %c0_149, %c0_150] : memref<1x1x8xf32, #tpu.memory_space<vmem>>, vector<1x1x8xf32>
    %486 = vector.shape_cast %485 : vector<1x1x8xf32> to vector<1x8xf32>
    %c0_151 = arith.constant 0 : index
    %c0_152 = arith.constant 0 : index
    %c0_153 = arith.constant 0 : index
    %487 = vector.load %arg6[%c0_151, %c0_152, %c0_153] : memref<1x1x8xi32, #tpu.memory_space<vmem>>, vector<1x1x8xi32>
    %488 = vector.shape_cast %487 : vector<1x1x8xi32> to vector<1x8xi32>
    %cst_154 = arith.constant dense<0x7F800000> : vector<1xf32>
    %489 = vector.multi_reduction <minimumf>, %486, %cst_154 [1] : vector<1x8xf32> to vector<1xf32>
    %490 = vector.shape_cast %489 : vector<1xf32> to vector<1x1xf32>
    %491 = vector.broadcast %490 : vector<1x1xf32> to vector<1x8xf32>
    %492 = arith.cmpf oeq, %486, %491 : vector<1x8xf32>
    %c1073741824_i32_155 = arith.constant 1073741824 : i32
    %493 = vector.broadcast %c1073741824_i32_155 : i32 to vector<1x8xi32>
    %494 = arith.select %492, %2, %493 : vector<1x8xi1>, vector<1x8xi32>
    %cst_156 = arith.constant dense<2147483647> : vector<1xi32>
    %495 = vector.multi_reduction <minsi>, %494, %cst_156 [1] : vector<1x8xi32> to vector<1xi32>
    %496 = vector.shape_cast %495 : vector<1xi32> to vector<1x1xi32>
    %497 = vector.broadcast %496 : vector<1x1xi32> to vector<1x8xi32>
    %498 = arith.cmpi eq, %2, %497 : vector<1x8xi32>
    %499 = arith.cmpf ogt, %476, %490 : vector<1x1xf32>
    %500 = vector.broadcast %499 : vector<1x1xi1> to vector<1x8xi1>
    %501 = arith.andi %498, %500 : vector<1x8xi1>
    %502 = vector.shape_cast %476 : vector<1x1xf32> to vector<1x1xf32>
    %503 = vector.broadcast %502 : vector<1x1xf32> to vector<1x8xf32>
    %504 = arith.select %501, %503, %486 : vector<1x8xi1>, vector<1x8xf32>
    %c0_157 = arith.constant 0 : index
    %c0_158 = arith.constant 0 : index
    %c0_159 = arith.constant 0 : index
    %505 = vector.load %arg5[%c0_157, %c0_158, %c0_159] : memref<1x1x8xf32, #tpu.memory_space<vmem>>, vector<1x1x8xf32>
    %506 = vector.shape_cast %505 : vector<1x1x8xf32> to vector<1x8xf32>
    %507 = vector.shape_cast %504 : vector<1x8xf32> to vector<1x1x8xf32>
    tpu.vector_store %arg5[%c0_157, %c0_158, %c0_159], %507 {strides = array<i32>} : memref<1x1x8xf32, #tpu.memory_space<vmem>>, vector<1x1x8xf32>,
    %508 = vector.shape_cast %484 : vector<1x1xi32> to vector<1x1xi32>
    %509 = vector.broadcast %508 : vector<1x1xi32> to vector<1x8xi32>
    %510 = arith.select %501, %509, %488 : vector<1x8xi1>, vector<1x8xi32>
    %c0_160 = arith.constant 0 : index
    %c0_161 = arith.constant 0 : index
    %c0_162 = arith.constant 0 : index
    %511 = vector.load %arg6[%c0_160, %c0_161, %c0_162] : memref<1x1x8xi32, #tpu.memory_space<vmem>>, vector<1x1x8xi32>
    %512 = vector.shape_cast %511 : vector<1x1x8xi32> to vector<1x8xi32>
    %513 = vector.shape_cast %510 : vector<1x8xi32> to vector<1x1x8xi32>
    tpu.vector_store %arg6[%c0_160, %c0_161, %c0_162], %513 {strides = array<i32>} : memref<1x1x8xi32, #tpu.memory_space<vmem>>, vector<1x1x8xi32>,
    %514 = vector.broadcast %476 : vector<1x1xf32> to vector<4x8xf32>
    %515 = arith.cmpf oeq, %472, %514 : vector<4x8xf32>
    %516 = vector.broadcast %484 : vector<1x1xi32> to vector<4x8xi32>
    %517 = arith.cmpi eq, %232, %516 : vector<4x8xi32>
    %518 = arith.andi %515, %517 : vector<4x8xi1>
    %cst_163 = arith.constant 0xFF800000 : f32
    %519 = vector.broadcast %cst_163 : f32 to vector<4x8xf32>
    %520 = arith.select %518, %519, %472 : vector<4x8xi1>, vector<4x8xf32>
    %cst_164 = arith.constant dense<0xFF800000> : vector<4xf32>
    %521 = vector.multi_reduction <maximumf>, %520, %cst_164 [1] : vector<4x8xf32> to vector<4xf32>
    %522 = vector.shape_cast %521 : vector<4xf32> to vector<4x1xf32>
    %cst_165 = arith.constant dense<0xFF800000> : vector<1xf32>
    %523 = vector.multi_reduction <maximumf>, %522, %cst_165 [0] : vector<4x1xf32> to vector<1xf32>
    %524 = vector.shape_cast %523 : vector<1xf32> to vector<1x1xf32>
    %525 = vector.broadcast %524 : vector<1x1xf32> to vector<4x8xf32>
    %526 = arith.cmpf oeq, %520, %525 : vector<4x8xf32>
    %c1073741824_i32_166 = arith.constant 1073741824 : i32
    %527 = vector.broadcast %c1073741824_i32_166 : i32 to vector<4x8xi32>
    %528 = arith.select %526, %232, %527 : vector<4x8xi1>, vector<4x8xi32>
    %cst_167 = arith.constant dense<2147483647> : vector<4xi32>
    %529 = vector.multi_reduction <minsi>, %528, %cst_167 [1] : vector<4x8xi32> to vector<4xi32>
    %530 = vector.shape_cast %529 : vector<4xi32> to vector<4x1xi32>
    %cst_168 = arith.constant dense<2147483647> : vector<1xi32>
    %531 = vector.multi_reduction <minsi>, %530, %cst_168 [0] : vector<4x1xi32> to vector<1xi32>
    %532 = vector.shape_cast %531 : vector<1xi32> to vector<1x1xi32>
    %c0_169 = arith.constant 0 : index
    %c0_170 = arith.constant 0 : index
    %c0_171 = arith.constant 0 : index
    %533 = vector.load %arg5[%c0_169, %c0_170, %c0_171] : memref<1x1x8xf32, #tpu.memory_space<vmem>>, vector<1x1x8xf32>
    %534 = vector.shape_cast %533 : vector<1x1x8xf32> to vector<1x8xf32>
    %c0_172 = arith.constant 0 : index
    %c0_173 = arith.constant 0 : index
    %c0_174 = arith.constant 0 : index
    %535 = vector.load %arg6[%c0_172, %c0_173, %c0_174] : memref<1x1x8xi32, #tpu.memory_space<vmem>>, vector<1x1x8xi32>
    %536 = vector.shape_cast %535 : vector<1x1x8xi32> to vector<1x8xi32>
    %cst_175 = arith.constant dense<0x7F800000> : vector<1xf32>
    %537 = vector.multi_reduction <minimumf>, %534, %cst_175 [1] : vector<1x8xf32> to vector<1xf32>
    %538 = vector.shape_cast %537 : vector<1xf32> to vector<1x1xf32>
    %539 = vector.broadcast %538 : vector<1x1xf32> to vector<1x8xf32>
    %540 = arith.cmpf oeq, %534, %539 : vector<1x8xf32>
    %c1073741824_i32_176 = arith.constant 1073741824 : i32
    %541 = vector.broadcast %c1073741824_i32_176 : i32 to vector<1x8xi32>
    %542 = arith.select %540, %2, %541 : vector<1x8xi1>, vector<1x8xi32>
    %cst_177 = arith.constant dense<2147483647> : vector<1xi32>
    %543 = vector.multi_reduction <minsi>, %542, %cst_177 [1] : vector<1x8xi32> to vector<1xi32>
    %544 = vector.shape_cast %543 : vector<1xi32> to vector<1x1xi32>
    %545 = vector.broadcast %544 : vector<1x1xi32> to vector<1x8xi32>
    %546 = arith.cmpi eq, %2, %545 : vector<1x8xi32>
    %547 = arith.cmpf ogt, %524, %538 : vector<1x1xf32>
    %548 = vector.broadcast %547 : vector<1x1xi1> to vector<1x8xi1>
    %549 = arith.andi %546, %548 : vector<1x8xi1>
    %550 = vector.shape_cast %524 : vector<1x1xf32> to vector<1x1xf32>
    %551 = vector.broadcast %550 : vector<1x1xf32> to vector<1x8xf32>
    %552 = arith.select %549, %551, %534 : vector<1x8xi1>, vector<1x8xf32>
    %c0_178 = arith.constant 0 : index
    %c0_179 = arith.constant 0 : index
    %c0_180 = arith.constant 0 : index
    %553 = vector.load %arg5[%c0_178, %c0_179, %c0_180] : memref<1x1x8xf32, #tpu.memory_space<vmem>>, vector<1x1x8xf32>
    %554 = vector.shape_cast %553 : vector<1x1x8xf32> to vector<1x8xf32>
    %555 = vector.shape_cast %552 : vector<1x8xf32> to vector<1x1x8xf32>
    tpu.vector_store %arg5[%c0_178, %c0_179, %c0_180], %555 {strides = array<i32>} : memref<1x1x8xf32, #tpu.memory_space<vmem>>, vector<1x1x8xf32>,
    %556 = vector.shape_cast %532 : vector<1x1xi32> to vector<1x1xi32>
    %557 = vector.broadcast %556 : vector<1x1xi32> to vector<1x8xi32>
    %558 = arith.select %549, %557, %536 : vector<1x8xi1>, vector<1x8xi32>
    %c0_181 = arith.constant 0 : index
    %c0_182 = arith.constant 0 : index
    %c0_183 = arith.constant 0 : index
    %559 = vector.load %arg6[%c0_181, %c0_182, %c0_183] : memref<1x1x8xi32, #tpu.memory_space<vmem>>, vector<1x1x8xi32>
    %560 = vector.shape_cast %559 : vector<1x1x8xi32> to vector<1x8xi32>
    %561 = vector.shape_cast %558 : vector<1x8xi32> to vector<1x1x8xi32>
    tpu.vector_store %arg6[%c0_181, %c0_182, %c0_183], %561 {strides = array<i32>} : memref<1x1x8xi32, #tpu.memory_space<vmem>>, vector<1x1x8xi32>,
    %562 = vector.broadcast %524 : vector<1x1xf32> to vector<4x8xf32>
    %563 = arith.cmpf oeq, %520, %562 : vector<4x8xf32>
    %564 = vector.broadcast %532 : vector<1x1xi32> to vector<4x8xi32>
    %565 = arith.cmpi eq, %232, %564 : vector<4x8xi32>
    %566 = arith.andi %563, %565 : vector<4x8xi1>
    %cst_184 = arith.constant 0xFF800000 : f32
    %567 = vector.broadcast %cst_184 : f32 to vector<4x8xf32>
    %568 = arith.select %566, %567, %520 : vector<4x8xi1>, vector<4x8xf32>
    %cst_185 = arith.constant dense<0xFF800000> : vector<4xf32>
    %569 = vector.multi_reduction <maximumf>, %568, %cst_185 [1] : vector<4x8xf32> to vector<4xf32>
    %570 = vector.shape_cast %569 : vector<4xf32> to vector<4x1xf32>
    %cst_186 = arith.constant dense<0xFF800000> : vector<1xf32>
    %571 = vector.multi_reduction <maximumf>, %570, %cst_186 [0] : vector<4x1xf32> to vector<1xf32>
    %572 = vector.shape_cast %571 : vector<1xf32> to vector<1x1xf32>
    %573 = vector.broadcast %572 : vector<1x1xf32> to vector<4x8xf32>
    %574 = arith.cmpf oeq, %568, %573 : vector<4x8xf32>
    %c1073741824_i32_187 = arith.constant 1073741824 : i32
    %575 = vector.broadcast %c1073741824_i32_187 : i32 to vector<4x8xi32>
    %576 = arith.select %574, %232, %575 : vector<4x8xi1>, vector<4x8xi32>
    %cst_188 = arith.constant dense<2147483647> : vector<4xi32>
    %577 = vector.multi_reduction <minsi>, %576, %cst_188 [1] : vector<4x8xi32> to vector<4xi32>
    %578 = vector.shape_cast %577 : vector<4xi32> to vector<4x1xi32>
    %cst_189 = arith.constant dense<2147483647> : vector<1xi32>
    %579 = vector.multi_reduction <minsi>, %578, %cst_189 [0] : vector<4x1xi32> to vector<1xi32>
    %580 = vector.shape_cast %579 : vector<1xi32> to vector<1x1xi32>
    %c0_190 = arith.constant 0 : index
    %c0_191 = arith.constant 0 : index
    %c0_192 = arith.constant 0 : index
    %581 = vector.load %arg5[%c0_190, %c0_191, %c0_192] : memref<1x1x8xf32, #tpu.memory_space<vmem>>, vector<1x1x8xf32>
    %582 = vector.shape_cast %581 : vector<1x1x8xf32> to vector<1x8xf32>
    %c0_193 = arith.constant 0 : index
    %c0_194 = arith.constant 0 : index
    %c0_195 = arith.constant 0 : index
    %583 = vector.load %arg6[%c0_193, %c0_194, %c0_195] : memref<1x1x8xi32, #tpu.memory_space<vmem>>, vector<1x1x8xi32>
    %584 = vector.shape_cast %583 : vector<1x1x8xi32> to vector<1x8xi32>
    %cst_196 = arith.constant dense<0x7F800000> : vector<1xf32>
    %585 = vector.multi_reduction <minimumf>, %582, %cst_196 [1] : vector<1x8xf32> to vector<1xf32>
    %586 = vector.shape_cast %585 : vector<1xf32> to vector<1x1xf32>
    %587 = vector.broadcast %586 : vector<1x1xf32> to vector<1x8xf32>
    %588 = arith.cmpf oeq, %582, %587 : vector<1x8xf32>
    %c1073741824_i32_197 = arith.constant 1073741824 : i32
    %589 = vector.broadcast %c1073741824_i32_197 : i32 to vector<1x8xi32>
    %590 = arith.select %588, %2, %589 : vector<1x8xi1>, vector<1x8xi32>
    %cst_198 = arith.constant dense<2147483647> : vector<1xi32>
    %591 = vector.multi_reduction <minsi>, %590, %cst_198 [1] : vector<1x8xi32> to vector<1xi32>
    %592 = vector.shape_cast %591 : vector<1xi32> to vector<1x1xi32>
    %593 = vector.broadcast %592 : vector<1x1xi32> to vector<1x8xi32>
    %594 = arith.cmpi eq, %2, %593 : vector<1x8xi32>
    %595 = arith.cmpf ogt, %572, %586 : vector<1x1xf32>
    %596 = vector.broadcast %595 : vector<1x1xi1> to vector<1x8xi1>
    %597 = arith.andi %594, %596 : vector<1x8xi1>
    %598 = vector.shape_cast %572 : vector<1x1xf32> to vector<1x1xf32>
    %599 = vector.broadcast %598 : vector<1x1xf32> to vector<1x8xf32>
    %600 = arith.select %597, %599, %582 : vector<1x8xi1>, vector<1x8xf32>
    %c0_199 = arith.constant 0 : index
    %c0_200 = arith.constant 0 : index
    %c0_201 = arith.constant 0 : index
    %601 = vector.load %arg5[%c0_199, %c0_200, %c0_201] : memref<1x1x8xf32, #tpu.memory_space<vmem>>, vector<1x1x8xf32>
    %602 = vector.shape_cast %601 : vector<1x1x8xf32> to vector<1x8xf32>
    %603 = vector.shape_cast %600 : vector<1x8xf32> to vector<1x1x8xf32>
    tpu.vector_store %arg5[%c0_199, %c0_200, %c0_201], %603 {strides = array<i32>} : memref<1x1x8xf32, #tpu.memory_space<vmem>>, vector<1x1x8xf32>,
    %604 = vector.shape_cast %580 : vector<1x1xi32> to vector<1x1xi32>
    %605 = vector.broadcast %604 : vector<1x1xi32> to vector<1x8xi32>
    %606 = arith.select %597, %605, %584 : vector<1x8xi1>, vector<1x8xi32>
    %c0_202 = arith.constant 0 : index
    %c0_203 = arith.constant 0 : index
    %c0_204 = arith.constant 0 : index
    %607 = vector.load %arg6[%c0_202, %c0_203, %c0_204] : memref<1x1x8xi32, #tpu.memory_space<vmem>>, vector<1x1x8xi32>
    %608 = vector.shape_cast %607 : vector<1x1x8xi32> to vector<1x8xi32>
    %609 = vector.shape_cast %606 : vector<1x8xi32> to vector<1x1x8xi32>
    tpu.vector_store %arg6[%c0_202, %c0_203, %c0_204], %609 {strides = array<i32>} : memref<1x1x8xi32, #tpu.memory_space<vmem>>, vector<1x1x8xi32>,
    %c0_205 = arith.constant 0 : index
    %610 = memref.load %arg2[%c0_205] : memref<1xi32, #tpu.memory_space<smem>>
    %c0_i32_206 = arith.constant 0 : i32
    %611 = arith.cmpi ne, %610, %c0_i32_206 : i32
    %612 = arith.extui %611 : i1 to i32
    %c0_i32_207 = arith.constant 0 : i32
    %613 = arith.cmpi ne, %612, %c0_i32_207 : i32
    scf.if %613 {
      %614 = vector.extract_strided_slice %10 {offsets = [0, 0], sizes = [1, 1], strides = [1, 1]} : vector<4x1xf32> to vector<1x1xf32>
      %615 = vector.extract_strided_slice %221 {offsets = [0, 0], sizes = [1, 8], strides = [1, 1]} : vector<4x8xf32> to vector<1x8xf32>
      %616 = vector.broadcast %614 : vector<1x1xf32> to vector<1x8xf32>
      %617 = arith.subf %615, %616 : vector<1x8xf32>
      %618 = vector.extract_strided_slice %226 {offsets = [0, 0], sizes = [1, 8], strides = [1, 1]} : vector<4x8xi32> to vector<1x8xi32>
      %619 = vector.broadcast %0 : i32 to vector<1x8xi32>
      %620 = arith.addi %618, %619 : vector<1x8xi32>
      %621 = vector.extract_strided_slice %617 {offsets = [0, 0], sizes = [1, 1], strides = [1, 1]} : vector<1x8xf32> to vector<1x1xf32>
      %622 = vector.extract_strided_slice %620 {offsets = [0, 0], sizes = [1, 1], strides = [1, 1]} : vector<1x8xi32> to vector<1x1xi32>
      %c0_208 = arith.constant 0 : index
      %c0_209 = arith.constant 0 : index
      %c0_210 = arith.constant 0 : index
      %623 = vector.load %arg7[%c0_208, %c0_209, %c0_210] : memref<1x1x8xf32, #tpu.memory_space<vmem>>, vector<1x1x8xf32>
      %624 = vector.shape_cast %623 : vector<1x1x8xf32> to vector<1x8xf32>
      %c0_211 = arith.constant 0 : index
      %c0_212 = arith.constant 0 : index
      %c0_213 = arith.constant 0 : index
      %625 = vector.load %arg8[%c0_211, %c0_212, %c0_213] : memref<1x1x8xi32, #tpu.memory_space<vmem>>, vector<1x1x8xi32>
      %626 = vector.shape_cast %625 : vector<1x1x8xi32> to vector<1x8xi32>
      %cst_214 = arith.constant dense<0x7F800000> : vector<1xf32>
      %627 = vector.multi_reduction <minimumf>, %624, %cst_214 [1] : vector<1x8xf32> to vector<1xf32>
      %628 = vector.shape_cast %627 : vector<1xf32> to vector<1x1xf32>
      %629 = vector.broadcast %628 : vector<1x1xf32> to vector<1x8xf32>
      %630 = arith.cmpf oeq, %624, %629 : vector<1x8xf32>
      %c1073741824_i32_215 = arith.constant 1073741824 : i32
      %631 = vector.broadcast %c1073741824_i32_215 : i32 to vector<1x8xi32>
      %632 = arith.select %630, %2, %631 : vector<1x8xi1>, vector<1x8xi32>
      %cst_216 = arith.constant dense<2147483647> : vector<1xi32>
      %633 = vector.multi_reduction <minsi>, %632, %cst_216 [1] : vector<1x8xi32> to vector<1xi32>
      %634 = vector.shape_cast %633 : vector<1xi32> to vector<1x1xi32>
      %635 = vector.broadcast %634 : vector<1x1xi32> to vector<1x8xi32>
      %636 = arith.cmpi eq, %2, %635 : vector<1x8xi32>
      %637 = arith.cmpf ogt, %621, %628 : vector<1x1xf32>
      %638 = vector.broadcast %637 : vector<1x1xi1> to vector<1x8xi1>
      %639 = arith.andi %636, %638 : vector<1x8xi1>
      %640 = vector.shape_cast %621 : vector<1x1xf32> to vector<1x1xf32>
      %641 = vector.broadcast %640 : vector<1x1xf32> to vector<1x8xf32>
      %642 = arith.select %639, %641, %624 : vector<1x8xi1>, vector<1x8xf32>
      %c0_217 = arith.constant 0 : index
      %c0_218 = arith.constant 0 : index
      %c0_219 = arith.constant 0 : index
      %643 = vector.load %arg7[%c0_217, %c0_218, %c0_219] : memref<1x1x8xf32, #tpu.memory_space<vmem>>, vector<1x1x8xf32>
      %644 = vector.shape_cast %643 : vector<1x1x8xf32> to vector<1x8xf32>
      %645 = vector.shape_cast %642 : vector<1x8xf32> to vector<1x1x8xf32>
      tpu.vector_store %arg7[%c0_217, %c0_218, %c0_219], %645 {strides = array<i32>} : memref<1x1x8xf32, #tpu.memory_space<vmem>>, vector<1x1x8xf32>,
      %646 = vector.shape_cast %622 : vector<1x1xi32> to vector<1x1xi32>
      %647 = vector.broadcast %646 : vector<1x1xi32> to vector<1x8xi32>
      %648 = arith.select %639, %647, %626 : vector<1x8xi1>, vector<1x8xi32>
      %c0_220 = arith.constant 0 : index
      %c0_221 = arith.constant 0 : index
      %c0_222 = arith.constant 0 : index
      %649 = vector.load %arg8[%c0_220, %c0_221, %c0_222] : memref<1x1x8xi32, #tpu.memory_space<vmem>>, vector<1x1x8xi32>
      %650 = vector.shape_cast %649 : vector<1x1x8xi32> to vector<1x8xi32>
      %651 = vector.shape_cast %648 : vector<1x8xi32> to vector<1x1x8xi32>
      tpu.vector_store %arg8[%c0_220, %c0_221, %c0_222], %651 {strides = array<i32>} : memref<1x1x8xi32, #tpu.memory_space<vmem>>, vector<1x1x8xi32>,
      %652 = vector.extract_strided_slice %617 {offsets = [0, 1], sizes = [1, 1], strides = [1, 1]} : vector<1x8xf32> to vector<1x1xf32>
      %653 = vector.extract_strided_slice %620 {offsets = [0, 1], sizes = [1, 1], strides = [1, 1]} : vector<1x8xi32> to vector<1x1xi32>
      %c0_223 = arith.constant 0 : index
      %c0_224 = arith.constant 0 : index
      %c0_225 = arith.constant 0 : index
      %654 = vector.load %arg7[%c0_223, %c0_224, %c0_225] : memref<1x1x8xf32, #tpu.memory_space<vmem>>, vector<1x1x8xf32>
      %655 = vector.shape_cast %654 : vector<1x1x8xf32> to vector<1x8xf32>
      %c0_226 = arith.constant 0 : index
      %c0_227 = arith.constant 0 : index
      %c0_228 = arith.constant 0 : index
      %656 = vector.load %arg8[%c0_226, %c0_227, %c0_228] : memref<1x1x8xi32, #tpu.memory_space<vmem>>, vector<1x1x8xi32>
      %657 = vector.shape_cast %656 : vector<1x1x8xi32> to vector<1x8xi32>
      %cst_229 = arith.constant dense<0x7F800000> : vector<1xf32>
      %658 = vector.multi_reduction <minimumf>, %655, %cst_229 [1] : vector<1x8xf32> to vector<1xf32>
      %659 = vector.shape_cast %658 : vector<1xf32> to vector<1x1xf32>
      %660 = vector.broadcast %659 : vector<1x1xf32> to vector<1x8xf32>
      %661 = arith.cmpf oeq, %655, %660 : vector<1x8xf32>
      %c1073741824_i32_230 = arith.constant 1073741824 : i32
      %662 = vector.broadcast %c1073741824_i32_230 : i32 to vector<1x8xi32>
      %663 = arith.select %661, %2, %662 : vector<1x8xi1>, vector<1x8xi32>
      %cst_231 = arith.constant dense<2147483647> : vector<1xi32>
      %664 = vector.multi_reduction <minsi>, %663, %cst_231 [1] : vector<1x8xi32> to vector<1xi32>
      %665 = vector.shape_cast %664 : vector<1xi32> to vector<1x1xi32>
      %666 = vector.broadcast %665 : vector<1x1xi32> to vector<1x8xi32>
      %667 = arith.cmpi eq, %2, %666 : vector<1x8xi32>
      %668 = arith.cmpf ogt, %652, %659 : vector<1x1xf32>
      %669 = vector.broadcast %668 : vector<1x1xi1> to vector<1x8xi1>
      %670 = arith.andi %667, %669 : vector<1x8xi1>
      %671 = vector.shape_cast %652 : vector<1x1xf32> to vector<1x1xf32>
      %672 = vector.broadcast %671 : vector<1x1xf32> to vector<1x8xf32>
      %673 = arith.select %670, %672, %655 : vector<1x8xi1>, vector<1x8xf32>
      %c0_232 = arith.constant 0 : index
      %c0_233 = arith.constant 0 : index
      %c0_234 = arith.constant 0 : index
      %674 = vector.load %arg7[%c0_232, %c0_233, %c0_234] : memref<1x1x8xf32, #tpu.memory_space<vmem>>, vector<1x1x8xf32>
      %675 = vector.shape_cast %674 : vector<1x1x8xf32> to vector<1x8xf32>
      %676 = vector.shape_cast %673 : vector<1x8xf32> to vector<1x1x8xf32>
      tpu.vector_store %arg7[%c0_232, %c0_233, %c0_234], %676 {strides = array<i32>} : memref<1x1x8xf32, #tpu.memory_space<vmem>>, vector<1x1x8xf32>,
      %677 = vector.shape_cast %653 : vector<1x1xi32> to vector<1x1xi32>
      %678 = vector.broadcast %677 : vector<1x1xi32> to vector<1x8xi32>
      %679 = arith.select %670, %678, %657 : vector<1x8xi1>, vector<1x8xi32>
      %c0_235 = arith.constant 0 : index
      %c0_236 = arith.constant 0 : index
      %c0_237 = arith.constant 0 : index
      %680 = vector.load %arg8[%c0_235, %c0_236, %c0_237] : memref<1x1x8xi32, #tpu.memory_space<vmem>>, vector<1x1x8xi32>
      %681 = vector.shape_cast %680 : vector<1x1x8xi32> to vector<1x8xi32>
      %682 = vector.shape_cast %679 : vector<1x8xi32> to vector<1x1x8xi32>
      tpu.vector_store %arg8[%c0_235, %c0_236, %c0_237], %682 {strides = array<i32>} : memref<1x1x8xi32, #tpu.memory_space<vmem>>, vector<1x1x8xi32>,
      %683 = vector.extract_strided_slice %617 {offsets = [0, 2], sizes = [1, 1], strides = [1, 1]} : vector<1x8xf32> to vector<1x1xf32>
      %684 = vector.extract_strided_slice %620 {offsets = [0, 2], sizes = [1, 1], strides = [1, 1]} : vector<1x8xi32> to vector<1x1xi32>
      %c0_238 = arith.constant 0 : index
      %c0_239 = arith.constant 0 : index
      %c0_240 = arith.constant 0 : index
      %685 = vector.load %arg7[%c0_238, %c0_239, %c0_240] : memref<1x1x8xf32, #tpu.memory_space<vmem>>, vector<1x1x8xf32>
      %686 = vector.shape_cast %685 : vector<1x1x8xf32> to vector<1x8xf32>
      %c0_241 = arith.constant 0 : index
      %c0_242 = arith.constant 0 : index
      %c0_243 = arith.constant 0 : index
      %687 = vector.load %arg8[%c0_241, %c0_242, %c0_243] : memref<1x1x8xi32, #tpu.memory_space<vmem>>, vector<1x1x8xi32>
      %688 = vector.shape_cast %687 : vector<1x1x8xi32> to vector<1x8xi32>
      %cst_244 = arith.constant dense<0x7F800000> : vector<1xf32>
      %689 = vector.multi_reduction <minimumf>, %686, %cst_244 [1] : vector<1x8xf32> to vector<1xf32>
      %690 = vector.shape_cast %689 : vector<1xf32> to vector<1x1xf32>
      %691 = vector.broadcast %690 : vector<1x1xf32> to vector<1x8xf32>
      %692 = arith.cmpf oeq, %686, %691 : vector<1x8xf32>
      %c1073741824_i32_245 = arith.constant 1073741824 : i32
      %693 = vector.broadcast %c1073741824_i32_245 : i32 to vector<1x8xi32>
      %694 = arith.select %692, %2, %693 : vector<1x8xi1>, vector<1x8xi32>
      %cst_246 = arith.constant dense<2147483647> : vector<1xi32>
      %695 = vector.multi_reduction <minsi>, %694, %cst_246 [1] : vector<1x8xi32> to vector<1xi32>
      %696 = vector.shape_cast %695 : vector<1xi32> to vector<1x1xi32>
      %697 = vector.broadcast %696 : vector<1x1xi32> to vector<1x8xi32>
      %698 = arith.cmpi eq, %2, %697 : vector<1x8xi32>
      %699 = arith.cmpf ogt, %683, %690 : vector<1x1xf32>
      %700 = vector.broadcast %699 : vector<1x1xi1> to vector<1x8xi1>
      %701 = arith.andi %698, %700 : vector<1x8xi1>
      %702 = vector.shape_cast %683 : vector<1x1xf32> to vector<1x1xf32>
      %703 = vector.broadcast %702 : vector<1x1xf32> to vector<1x8xf32>
      %704 = arith.select %701, %703, %686 : vector<1x8xi1>, vector<1x8xf32>
      %c0_247 = arith.constant 0 : index
      %c0_248 = arith.constant 0 : index
      %c0_249 = arith.constant 0 : index
      %705 = vector.load %arg7[%c0_247, %c0_248, %c0_249] : memref<1x1x8xf32, #tpu.memory_space<vmem>>, vector<1x1x8xf32>
      %706 = vector.shape_cast %705 : vector<1x1x8xf32> to vector<1x8xf32>
      %707 = vector.shape_cast %704 : vector<1x8xf32> to vector<1x1x8xf32>
      tpu.vector_store %arg7[%c0_247, %c0_248, %c0_249], %707 {strides = array<i32>} : memref<1x1x8xf32, #tpu.memory_space<vmem>>, vector<1x1x8xf32>,
      %708 = vector.shape_cast %684 : vector<1x1xi32> to vector<1x1xi32>
      %709 = vector.broadcast %708 : vector<1x1xi32> to vector<1x8xi32>
      %710 = arith.select %701, %709, %688 : vector<1x8xi1>, vector<1x8xi32>
      %c0_250 = arith.constant 0 : index
      %c0_251 = arith.constant 0 : index
      %c0_252 = arith.constant 0 : index
      %711 = vector.load %arg8[%c0_250, %c0_251, %c0_252] : memref<1x1x8xi32, #tpu.memory_space<vmem>>, vector<1x1x8xi32>
      %712 = vector.shape_cast %711 : vector<1x1x8xi32> to vector<1x8xi32>
      %713 = vector.shape_cast %710 : vector<1x8xi32> to vector<1x1x8xi32>
      tpu.vector_store %arg8[%c0_250, %c0_251, %c0_252], %713 {strides = array<i32>} : memref<1x1x8xi32, #tpu.memory_space<vmem>>, vector<1x1x8xi32>,
      %714 = vector.extract_strided_slice %617 {offsets = [0, 3], sizes = [1, 1], strides = [1, 1]} : vector<1x8xf32> to vector<1x1xf32>
      %715 = vector.extract_strided_slice %620 {offsets = [0, 3], sizes = [1, 1], strides = [1, 1]} : vector<1x8xi32> to vector<1x1xi32>
      %c0_253 = arith.constant 0 : index
      %c0_254 = arith.constant 0 : index
      %c0_255 = arith.constant 0 : index
      %716 = vector.load %arg7[%c0_253, %c0_254, %c0_255] : memref<1x1x8xf32, #tpu.memory_space<vmem>>, vector<1x1x8xf32>
      %717 = vector.shape_cast %716 : vector<1x1x8xf32> to vector<1x8xf32>
      %c0_256 = arith.constant 0 : index
      %c0_257 = arith.constant 0 : index
      %c0_258 = arith.constant 0 : index
      %718 = vector.load %arg8[%c0_256, %c0_257, %c0_258] : memref<1x1x8xi32, #tpu.memory_space<vmem>>, vector<1x1x8xi32>
      %719 = vector.shape_cast %718 : vector<1x1x8xi32> to vector<1x8xi32>
      %cst_259 = arith.constant dense<0x7F800000> : vector<1xf32>
      %720 = vector.multi_reduction <minimumf>, %717, %cst_259 [1] : vector<1x8xf32> to vector<1xf32>
      %721 = vector.shape_cast %720 : vector<1xf32> to vector<1x1xf32>
      %722 = vector.broadcast %721 : vector<1x1xf32> to vector<1x8xf32>
      %723 = arith.cmpf oeq, %717, %722 : vector<1x8xf32>
      %c1073741824_i32_260 = arith.constant 1073741824 : i32
      %724 = vector.broadcast %c1073741824_i32_260 : i32 to vector<1x8xi32>
      %725 = arith.select %723, %2, %724 : vector<1x8xi1>, vector<1x8xi32>
      %cst_261 = arith.constant dense<2147483647> : vector<1xi32>
      %726 = vector.multi_reduction <minsi>, %725, %cst_261 [1] : vector<1x8xi32> to vector<1xi32>
      %727 = vector.shape_cast %726 : vector<1xi32> to vector<1x1xi32>
      %728 = vector.broadcast %727 : vector<1x1xi32> to vector<1x8xi32>
      %729 = arith.cmpi eq, %2, %728 : vector<1x8xi32>
      %730 = arith.cmpf ogt, %714, %721 : vector<1x1xf32>
      %731 = vector.broadcast %730 : vector<1x1xi1> to vector<1x8xi1>
      %732 = arith.andi %729, %731 : vector<1x8xi1>
      %733 = vector.shape_cast %714 : vector<1x1xf32> to vector<1x1xf32>
      %734 = vector.broadcast %733 : vector<1x1xf32> to vector<1x8xf32>
      %735 = arith.select %732, %734, %717 : vector<1x8xi1>, vector<1x8xf32>
      %c0_262 = arith.constant 0 : index
      %c0_263 = arith.constant 0 : index
      %c0_264 = arith.constant 0 : index
      %736 = vector.load %arg7[%c0_262, %c0_263, %c0_264] : memref<1x1x8xf32, #tpu.memory_space<vmem>>, vector<1x1x8xf32>
      %737 = vector.shape_cast %736 : vector<1x1x8xf32> to vector<1x8xf32>
      %738 = vector.shape_cast %735 : vector<1x8xf32> to vector<1x1x8xf32>
      tpu.vector_store %arg7[%c0_262, %c0_263, %c0_264], %738 {strides = array<i32>} : memref<1x1x8xf32, #tpu.memory_space<vmem>>, vector<1x1x8xf32>,
      %739 = vector.shape_cast %715 : vector<1x1xi32> to vector<1x1xi32>
      %740 = vector.broadcast %739 : vector<1x1xi32> to vector<1x8xi32>
      %741 = arith.select %732, %740, %719 : vector<1x8xi1>, vector<1x8xi32>
      %c0_265 = arith.constant 0 : index
      %c0_266 = arith.constant 0 : index
      %c0_267 = arith.constant 0 : index
      %742 = vector.load %arg8[%c0_265, %c0_266, %c0_267] : memref<1x1x8xi32, #tpu.memory_space<vmem>>, vector<1x1x8xi32>
      %743 = vector.shape_cast %742 : vector<1x1x8xi32> to vector<1x8xi32>
      %744 = vector.shape_cast %741 : vector<1x8xi32> to vector<1x1x8xi32>
      tpu.vector_store %arg8[%c0_265, %c0_266, %c0_267], %744 {strides = array<i32>} : memref<1x1x8xi32, #tpu.memory_space<vmem>>, vector<1x1x8xi32>,
      %745 = vector.extract_strided_slice %617 {offsets = [0, 4], sizes = [1, 1], strides = [1, 1]} : vector<1x8xf32> to vector<1x1xf32>
      %746 = vector.extract_strided_slice %620 {offsets = [0, 4], sizes = [1, 1], strides = [1, 1]} : vector<1x8xi32> to vector<1x1xi32>
      %c0_268 = arith.constant 0 : index
      %c0_269 = arith.constant 0 : index
      %c0_270 = arith.constant 0 : index
      %747 = vector.load %arg7[%c0_268, %c0_269, %c0_270] : memref<1x1x8xf32, #tpu.memory_space<vmem>>, vector<1x1x8xf32>
      %748 = vector.shape_cast %747 : vector<1x1x8xf32> to vector<1x8xf32>
      %c0_271 = arith.constant 0 : index
      %c0_272 = arith.constant 0 : index
      %c0_273 = arith.constant 0 : index
      %749 = vector.load %arg8[%c0_271, %c0_272, %c0_273] : memref<1x1x8xi32, #tpu.memory_space<vmem>>, vector<1x1x8xi32>
      %750 = vector.shape_cast %749 : vector<1x1x8xi32> to vector<1x8xi32>
      %cst_274 = arith.constant dense<0x7F800000> : vector<1xf32>
      %751 = vector.multi_reduction <minimumf>, %748, %cst_274 [1] : vector<1x8xf32> to vector<1xf32>
      %752 = vector.shape_cast %751 : vector<1xf32> to vector<1x1xf32>
      %753 = vector.broadcast %752 : vector<1x1xf32> to vector<1x8xf32>
      %754 = arith.cmpf oeq, %748, %753 : vector<1x8xf32>
      %c1073741824_i32_275 = arith.constant 1073741824 : i32
      %755 = vector.broadcast %c1073741824_i32_275 : i32 to vector<1x8xi32>
      %756 = arith.select %754, %2, %755 : vector<1x8xi1>, vector<1x8xi32>
      %cst_276 = arith.constant dense<2147483647> : vector<1xi32>
      %757 = vector.multi_reduction <minsi>, %756, %cst_276 [1] : vector<1x8xi32> to vector<1xi32>
      %758 = vector.shape_cast %757 : vector<1xi32> to vector<1x1xi32>
      %759 = vector.broadcast %758 : vector<1x1xi32> to vector<1x8xi32>
      %760 = arith.cmpi eq, %2, %759 : vector<1x8xi32>
      %761 = arith.cmpf ogt, %745, %752 : vector<1x1xf32>
      %762 = vector.broadcast %761 : vector<1x1xi1> to vector<1x8xi1>
      %763 = arith.andi %760, %762 : vector<1x8xi1>
      %764 = vector.shape_cast %745 : vector<1x1xf32> to vector<1x1xf32>
      %765 = vector.broadcast %764 : vector<1x1xf32> to vector<1x8xf32>
      %766 = arith.select %763, %765, %748 : vector<1x8xi1>, vector<1x8xf32>
      %c0_277 = arith.constant 0 : index
      %c0_278 = arith.constant 0 : index
      %c0_279 = arith.constant 0 : index
      %767 = vector.load %arg7[%c0_277, %c0_278, %c0_279] : memref<1x1x8xf32, #tpu.memory_space<vmem>>, vector<1x1x8xf32>
      %768 = vector.shape_cast %767 : vector<1x1x8xf32> to vector<1x8xf32>
      %769 = vector.shape_cast %766 : vector<1x8xf32> to vector<1x1x8xf32>
      tpu.vector_store %arg7[%c0_277, %c0_278, %c0_279], %769 {strides = array<i32>} : memref<1x1x8xf32, #tpu.memory_space<vmem>>, vector<1x1x8xf32>,
      %770 = vector.shape_cast %746 : vector<1x1xi32> to vector<1x1xi32>
      %771 = vector.broadcast %770 : vector<1x1xi32> to vector<1x8xi32>
      %772 = arith.select %763, %771, %750 : vector<1x8xi1>, vector<1x8xi32>
      %c0_280 = arith.constant 0 : index
      %c0_281 = arith.constant 0 : index
      %c0_282 = arith.constant 0 : index
      %773 = vector.load %arg8[%c0_280, %c0_281, %c0_282] : memref<1x1x8xi32, #tpu.memory_space<vmem>>, vector<1x1x8xi32>
      %774 = vector.shape_cast %773 : vector<1x1x8xi32> to vector<1x8xi32>
      %775 = vector.shape_cast %772 : vector<1x8xi32> to vector<1x1x8xi32>
      tpu.vector_store %arg8[%c0_280, %c0_281, %c0_282], %775 {strides = array<i32>} : memref<1x1x8xi32, #tpu.memory_space<vmem>>, vector<1x1x8xi32>,
      %776 = vector.extract_strided_slice %617 {offsets = [0, 5], sizes = [1, 1], strides = [1, 1]} : vector<1x8xf32> to vector<1x1xf32>
      %777 = vector.extract_strided_slice %620 {offsets = [0, 5], sizes = [1, 1], strides = [1, 1]} : vector<1x8xi32> to vector<1x1xi32>
      %c0_283 = arith.constant 0 : index
      %c0_284 = arith.constant 0 : index
      %c0_285 = arith.constant 0 : index
      %778 = vector.load %arg7[%c0_283, %c0_284, %c0_285] : memref<1x1x8xf32, #tpu.memory_space<vmem>>, vector<1x1x8xf32>
      %779 = vector.shape_cast %778 : vector<1x1x8xf32> to vector<1x8xf32>
      %c0_286 = arith.constant 0 : index
      %c0_287 = arith.constant 0 : index
      %c0_288 = arith.constant 0 : index
      %780 = vector.load %arg8[%c0_286, %c0_287, %c0_288] : memref<1x1x8xi32, #tpu.memory_space<vmem>>, vector<1x1x8xi32>
      %781 = vector.shape_cast %780 : vector<1x1x8xi32> to vector<1x8xi32>
      %cst_289 = arith.constant dense<0x7F800000> : vector<1xf32>
      %782 = vector.multi_reduction <minimumf>, %779, %cst_289 [1] : vector<1x8xf32> to vector<1xf32>
      %783 = vector.shape_cast %782 : vector<1xf32> to vector<1x1xf32>
      %784 = vector.broadcast %783 : vector<1x1xf32> to vector<1x8xf32>
      %785 = arith.cmpf oeq, %779, %784 : vector<1x8xf32>
      %c1073741824_i32_290 = arith.constant 1073741824 : i32
      %786 = vector.broadcast %c1073741824_i32_290 : i32 to vector<1x8xi32>
      %787 = arith.select %785, %2, %786 : vector<1x8xi1>, vector<1x8xi32>
      %cst_291 = arith.constant dense<2147483647> : vector<1xi32>
      %788 = vector.multi_reduction <minsi>, %787, %cst_291 [1] : vector<1x8xi32> to vector<1xi32>
      %789 = vector.shape_cast %788 : vector<1xi32> to vector<1x1xi32>
      %790 = vector.broadcast %789 : vector<1x1xi32> to vector<1x8xi32>
      %791 = arith.cmpi eq, %2, %790 : vector<1x8xi32>
      %792 = arith.cmpf ogt, %776, %783 : vector<1x1xf32>
      %793 = vector.broadcast %792 : vector<1x1xi1> to vector<1x8xi1>
      %794 = arith.andi %791, %793 : vector<1x8xi1>
      %795 = vector.shape_cast %776 : vector<1x1xf32> to vector<1x1xf32>
      %796 = vector.broadcast %795 : vector<1x1xf32> to vector<1x8xf32>
      %797 = arith.select %794, %796, %779 : vector<1x8xi1>, vector<1x8xf32>
      %c0_292 = arith.constant 0 : index
      %c0_293 = arith.constant 0 : index
      %c0_294 = arith.constant 0 : index
      %798 = vector.load %arg7[%c0_292, %c0_293, %c0_294] : memref<1x1x8xf32, #tpu.memory_space<vmem>>, vector<1x1x8xf32>
      %799 = vector.shape_cast %798 : vector<1x1x8xf32> to vector<1x8xf32>
      %800 = vector.shape_cast %797 : vector<1x8xf32> to vector<1x1x8xf32>
      tpu.vector_store %arg7[%c0_292, %c0_293, %c0_294], %800 {strides = array<i32>} : memref<1x1x8xf32, #tpu.memory_space<vmem>>, vector<1x1x8xf32>,
      %801 = vector.shape_cast %777 : vector<1x1xi32> to vector<1x1xi32>
      %802 = vector.broadcast %801 : vector<1x1xi32> to vector<1x8xi32>
      %803 = arith.select %794, %802, %781 : vector<1x8xi1>, vector<1x8xi32>
      %c0_295 = arith.constant 0 : index
      %c0_296 = arith.constant 0 : index
      %c0_297 = arith.constant 0 : index
      %804 = vector.load %arg8[%c0_295, %c0_296, %c0_297] : memref<1x1x8xi32, #tpu.memory_space<vmem>>, vector<1x1x8xi32>
      %805 = vector.shape_cast %804 : vector<1x1x8xi32> to vector<1x8xi32>
      %806 = vector.shape_cast %803 : vector<1x8xi32> to vector<1x1x8xi32>
      tpu.vector_store %arg8[%c0_295, %c0_296, %c0_297], %806 {strides = array<i32>} : memref<1x1x8xi32, #tpu.memory_space<vmem>>, vector<1x1x8xi32>,
      %807 = vector.extract_strided_slice %617 {offsets = [0, 6], sizes = [1, 1], strides = [1, 1]} : vector<1x8xf32> to vector<1x1xf32>
      %808 = vector.extract_strided_slice %620 {offsets = [0, 6], sizes = [1, 1], strides = [1, 1]} : vector<1x8xi32> to vector<1x1xi32>
      %c0_298 = arith.constant 0 : index
      %c0_299 = arith.constant 0 : index
      %c0_300 = arith.constant 0 : index
      %809 = vector.load %arg7[%c0_298, %c0_299, %c0_300] : memref<1x1x8xf32, #tpu.memory_space<vmem>>, vector<1x1x8xf32>
      %810 = vector.shape_cast %809 : vector<1x1x8xf32> to vector<1x8xf32>
      %c0_301 = arith.constant 0 : index
      %c0_302 = arith.constant 0 : index
      %c0_303 = arith.constant 0 : index
      %811 = vector.load %arg8[%c0_301, %c0_302, %c0_303] : memref<1x1x8xi32, #tpu.memory_space<vmem>>, vector<1x1x8xi32>
      %812 = vector.shape_cast %811 : vector<1x1x8xi32> to vector<1x8xi32>
      %cst_304 = arith.constant dense<0x7F800000> : vector<1xf32>
      %813 = vector.multi_reduction <minimumf>, %810, %cst_304 [1] : vector<1x8xf32> to vector<1xf32>
      %814 = vector.shape_cast %813 : vector<1xf32> to vector<1x1xf32>
      %815 = vector.broadcast %814 : vector<1x1xf32> to vector<1x8xf32>
      %816 = arith.cmpf oeq, %810, %815 : vector<1x8xf32>
      %c1073741824_i32_305 = arith.constant 1073741824 : i32
      %817 = vector.broadcast %c1073741824_i32_305 : i32 to vector<1x8xi32>
      %818 = arith.select %816, %2, %817 : vector<1x8xi1>, vector<1x8xi32>
      %cst_306 = arith.constant dense<2147483647> : vector<1xi32>
      %819 = vector.multi_reduction <minsi>, %818, %cst_306 [1] : vector<1x8xi32> to vector<1xi32>
      %820 = vector.shape_cast %819 : vector<1xi32> to vector<1x1xi32>
      %821 = vector.broadcast %820 : vector<1x1xi32> to vector<1x8xi32>
      %822 = arith.cmpi eq, %2, %821 : vector<1x8xi32>
      %823 = arith.cmpf ogt, %807, %814 : vector<1x1xf32>
      %824 = vector.broadcast %823 : vector<1x1xi1> to vector<1x8xi1>
      %825 = arith.andi %822, %824 : vector<1x8xi1>
      %826 = vector.shape_cast %807 : vector<1x1xf32> to vector<1x1xf32>
      %827 = vector.broadcast %826 : vector<1x1xf32> to vector<1x8xf32>
      %828 = arith.select %825, %827, %810 : vector<1x8xi1>, vector<1x8xf32>
      %c0_307 = arith.constant 0 : index
      %c0_308 = arith.constant 0 : index
      %c0_309 = arith.constant 0 : index
      %829 = vector.load %arg7[%c0_307, %c0_308, %c0_309] : memref<1x1x8xf32, #tpu.memory_space<vmem>>, vector<1x1x8xf32>
      %830 = vector.shape_cast %829 : vector<1x1x8xf32> to vector<1x8xf32>
      %831 = vector.shape_cast %828 : vector<1x8xf32> to vector<1x1x8xf32>
      tpu.vector_store %arg7[%c0_307, %c0_308, %c0_309], %831 {strides = array<i32>} : memref<1x1x8xf32, #tpu.memory_space<vmem>>, vector<1x1x8xf32>,
      %832 = vector.shape_cast %808 : vector<1x1xi32> to vector<1x1xi32>
      %833 = vector.broadcast %832 : vector<1x1xi32> to vector<1x8xi32>
      %834 = arith.select %825, %833, %812 : vector<1x8xi1>, vector<1x8xi32>
      %c0_310 = arith.constant 0 : index
      %c0_311 = arith.constant 0 : index
      %c0_312 = arith.constant 0 : index
      %835 = vector.load %arg8[%c0_310, %c0_311, %c0_312] : memref<1x1x8xi32, #tpu.memory_space<vmem>>, vector<1x1x8xi32>
      %836 = vector.shape_cast %835 : vector<1x1x8xi32> to vector<1x8xi32>
      %837 = vector.shape_cast %834 : vector<1x8xi32> to vector<1x1x8xi32>
      tpu.vector_store %arg8[%c0_310, %c0_311, %c0_312], %837 {strides = array<i32>} : memref<1x1x8xi32, #tpu.memory_space<vmem>>, vector<1x1x8xi32>,
      %838 = vector.extract_strided_slice %617 {offsets = [0, 7], sizes = [1, 1], strides = [1, 1]} : vector<1x8xf32> to vector<1x1xf32>
      %839 = vector.extract_strided_slice %620 {offsets = [0, 7], sizes = [1, 1], strides = [1, 1]} : vector<1x8xi32> to vector<1x1xi32>
      %c0_313 = arith.constant 0 : index
      %c0_314 = arith.constant 0 : index
      %c0_315 = arith.constant 0 : index
      %840 = vector.load %arg7[%c0_313, %c0_314, %c0_315] : memref<1x1x8xf32, #tpu.memory_space<vmem>>, vector<1x1x8xf32>
      %841 = vector.shape_cast %840 : vector<1x1x8xf32> to vector<1x8xf32>
      %c0_316 = arith.constant 0 : index
      %c0_317 = arith.constant 0 : index
      %c0_318 = arith.constant 0 : index
      %842 = vector.load %arg8[%c0_316, %c0_317, %c0_318] : memref<1x1x8xi32, #tpu.memory_space<vmem>>, vector<1x1x8xi32>
      %843 = vector.shape_cast %842 : vector<1x1x8xi32> to vector<1x8xi32>
      %cst_319 = arith.constant dense<0x7F800000> : vector<1xf32>
      %844 = vector.multi_reduction <minimumf>, %841, %cst_319 [1] : vector<1x8xf32> to vector<1xf32>
      %845 = vector.shape_cast %844 : vector<1xf32> to vector<1x1xf32>
      %846 = vector.broadcast %845 : vector<1x1xf32> to vector<1x8xf32>
      %847 = arith.cmpf oeq, %841, %846 : vector<1x8xf32>
      %c1073741824_i32_320 = arith.constant 1073741824 : i32
      %848 = vector.broadcast %c1073741824_i32_320 : i32 to vector<1x8xi32>
      %849 = arith.select %847, %2, %848 : vector<1x8xi1>, vector<1x8xi32>
      %cst_321 = arith.constant dense<2147483647> : vector<1xi32>
      %850 = vector.multi_reduction <minsi>, %849, %cst_321 [1] : vector<1x8xi32> to vector<1xi32>
      %851 = vector.shape_cast %850 : vector<1xi32> to vector<1x1xi32>
      %852 = vector.broadcast %851 : vector<1x1xi32> to vector<1x8xi32>
      %853 = arith.cmpi eq, %2, %852 : vector<1x8xi32>
      %854 = arith.cmpf ogt, %838, %845 : vector<1x1xf32>
      %855 = vector.broadcast %854 : vector<1x1xi1> to vector<1x8xi1>
      %856 = arith.andi %853, %855 : vector<1x8xi1>
      %857 = vector.shape_cast %838 : vector<1x1xf32> to vector<1x1xf32>
      %858 = vector.broadcast %857 : vector<1x1xf32> to vector<1x8xf32>
      %859 = arith.select %856, %858, %841 : vector<1x8xi1>, vector<1x8xf32>
      %c0_322 = arith.constant 0 : index
      %c0_323 = arith.constant 0 : index
      %c0_324 = arith.constant 0 : index
      %860 = vector.load %arg7[%c0_322, %c0_323, %c0_324] : memref<1x1x8xf32, #tpu.memory_space<vmem>>, vector<1x1x8xf32>
      %861 = vector.shape_cast %860 : vector<1x1x8xf32> to vector<1x8xf32>
      %862 = vector.shape_cast %859 : vector<1x8xf32> to vector<1x1x8xf32>
      tpu.vector_store %arg7[%c0_322, %c0_323, %c0_324], %862 {strides = array<i32>} : memref<1x1x8xf32, #tpu.memory_space<vmem>>, vector<1x1x8xf32>,
      %863 = vector.shape_cast %839 : vector<1x1xi32> to vector<1x1xi32>
      %864 = vector.broadcast %863 : vector<1x1xi32> to vector<1x8xi32>
      %865 = arith.select %856, %864, %843 : vector<1x8xi1>, vector<1x8xi32>
      %c0_325 = arith.constant 0 : index
      %c0_326 = arith.constant 0 : index
      %c0_327 = arith.constant 0 : index
      %866 = vector.load %arg8[%c0_325, %c0_326, %c0_327] : memref<1x1x8xi32, #tpu.memory_space<vmem>>, vector<1x1x8xi32>
      %867 = vector.shape_cast %866 : vector<1x1x8xi32> to vector<1x8xi32>
      %868 = vector.shape_cast %865 : vector<1x8xi32> to vector<1x1x8xi32>
      tpu.vector_store %arg8[%c0_325, %c0_326, %c0_327], %868 {strides = array<i32>} : memref<1x1x8xi32, #tpu.memory_space<vmem>>, vector<1x1x8xi32>,
    } else {
    }
    return
  }
  func.func @transform_0(%arg0: i32, %arg1: i32, %arg2: memref<1xi32, #tpu.memory_space<smem>>) -> (i32, i32, i32) {
    %c0_i32 = arith.constant 0 : i32
    %c0_i32_0 = arith.constant 0 : i32
    return %arg0, %c0_i32, %arg1 : i32, i32, i32
  }
  func.func @transform_1(%arg0: i32, %arg1: i32, %arg2: memref<1xi32, #tpu.memory_space<smem>>) -> (i32, i32, i32) {
    %c0_i32 = arith.constant 0 : i32
    %c0_i32_0 = arith.constant 0 : i32
    %c0_i32_1 = arith.constant 0 : i32
    return %arg0, %c0_i32, %c0_i32_0 : i32, i32, i32
  }
  func.func @transform_2(%arg0: i32, %arg1: i32, %arg2: memref<1xi32, #tpu.memory_space<smem>>) -> (i32, i32, i32) {
    %c0_i32 = arith.constant 0 : i32
    %c0_i32_0 = arith.constant 0 : i32
    %c0_i32_1 = arith.constant 0 : i32
    return %arg0, %c0_i32, %c0_i32_0 : i32, i32, i32
  }
  func.func @transform_3(%arg0: i32, %arg1: i32, %arg2: memref<1xi32, #tpu.memory_space<smem>>) -> (i32, i32, i32) {
    %c0_i32 = arith.constant 0 : i32
    %c0_i32_0 = arith.constant 0 : i32
    %c0_i32_1 = arith.constant 0 : i32
    return %arg0, %c0_i32, %c0_i32_0 : i32, i32, i32
  }
  func.func @transform_4(%arg0: i32, %arg1: i32, %arg2: memref<1xi32, #tpu.memory_space<smem>>) -> (i32, i32, i32) {
    %c0_i32 = arith.constant 0 : i32
    %c0_i32_0 = arith.constant 0 : i32
    %c0_i32_1 = arith.constant 0 : i32
    return %arg0, %c0_i32, %c0_i32_0 : i32, i32, i32
  }
  func.func @transform_5(%arg0: i32, %arg1: i32, %arg2: memref<1xi32, #tpu.memory_space<smem>>) -> (i32, i32, i32) {
    %c0_i32 = arith.constant 0 : i32
    %c0_i32_0 = arith.constant 0 : i32
    %c0_i32_1 = arith.constant 0 : i32
    return %arg0, %c0_i32, %c0_i32_0 : i32, i32, i32
  }
}

</mosaic_0001>

<bundles_post_ra>
// kernel: neg.2
= control target key start
LH: loop header
LB: loop body
LE: loop exit
PB: predicated region body
PF: predicated region fallthrough
CT: control target
= control target key end

     0   :  { %s24_s0 = inlined_call_operand.vmem [shape: f32[2,8], index: 0, kind: input, shape index: {}]   ;;  %s25_s1 = inlined_call_operand.vmem [shape: f32[2,8], index: 1, kind: output, shape index: {}]  }
   0x1   :  { %v2_v0 = vld [vmem:[%s24_s0] sm:$0xff] }
   0x2   :  { %v5_v1 = vxor.u32 2147483648, %v2_v0 }
   0x4   :  { %7 = vst [vmem:[%s25_s1] sm:$0xff] %v5_v1 }

// kernel: beam_forward.1
= control target key start
LH: loop header
LB: loop body
LE: loop exit
PB: predicated region body
PF: predicated region fallthrough
CT: control target
= control target key end

     0   :  { %s1760_s23 = smov 0   ;;  %s1762_s24 = smov 0   ;;  %s2418_s0 = inlined_call_operand.<no memory space> [shape: s32[1], index: 0, kind: input, shape index: {}]   ;;  %s2419_s1 = inlined_call_operand.vmem [shape: f32[2,4,512], index: 1, kind: input, shape index: {}]   ;;  %s2420_s2 = inlined_call_operand.vmem [shape: f32[2,4,1], index: 2, kind: input, shape index: {}]   ;;  %s2421_s3 = inlined_call_operand.vmem [shape: f32[2,1,8], index: 3, kind: output, shape index: {0}]   ;;  %s2422_s4 = inlined_call_operand.vmem [shape: s32[2,1,8], index: 4, kind: output, shape index: {1}]   ;;  %s2423_s5 = inlined_call_operand.vmem [shape: f32[2,1,8], index: 5, kind: output, shape index: {2}]   ;;  %s2424_s6 = inlined_call_operand.vmem [shape: s32[2,1,8], index: 6, kind: output, shape index: {3}]  }
   0x1   :  { %12 = sst [smem:[#allocation3]] %s2418_s0  ;;  %s1764_s25 = smov 0  }
   0x2   :  { %s1766_s26 = smov 0   ;;  %s1768_s27 = smov 0  }
   0x3 LB: > { %s27_s0 = sadd.s32 1, %s1702_s25  ;;  %s30_s28 = sadd.s32 1, %s1706_s26  ;;  %s1710_s27 = sphi %s1768_s27, %s18_s27   ;;  %s1706_s26 = sphi %s1766_s26, %s2457_s26   ;;  %s1702_s25 = sphi %s1764_s25, %s2456_s25   ;;  %s1698_s24 = sphi %s1762_s24, %s2455_s24   ;;  %s1694_s23 = sphi %s1760_s23, %s2454_s23  }
   0x4   : > { %p28_p0 = scmp.ge.s32.totalorder %s27_s0, 4  ;;  %p1588_p1 = scmp.ge.s32.totalorder %s1710_s27, 1 }
   0x5   : > { %p222_p2 = scmp.lt.s32.totalorder %s1710_s27, 9 }
   0x6   : > { %s2459_s0 = smov (%p28_p0, %s27_s0), 0  ;;  %s2461_s28 = smov (!%p28_p0, %s30_s28), %s1706_s26 }
   0x7   : > { %p223_p3 = pnand %p1588_p1, %p222_p2  ;;  %p32_p4 = scmp.ge.s32.totalorder %s2461_s28, 2 }
   0x8   : > { %p264_p5 = scmp.lt.s32.totalorder (!%p223_p3), %s1698_s24, 1  ;;  %p266_p6 = scmp.lt.s32.totalorder (!%p223_p3), %s1694_s23, 3 }
   0x9   : > { %s2463_s28 = smov (%p32_p4, %s2461_s28), 0  ;;  %226 = sbr.rel (%p223_p3) target bundleno = 10619 (0x297b), region = 28 }
   0xa   : > { %p1593_p7 = scmp.ne.s32.totalorder (!%p223_p3), %s1694_s23, 0 }
   0xe   : > { %v289_v0 = vlaneseq  ;;  %s2465_s24 = smov (!%p264_p5, %s1698_s24), 1 }
   0xf   : > { %s267_s30 = scalar_select %p266_p6, %s1694_s23, 3 }
  0x10   : > { %v1794_v1 = vand.u32 127, %v289_v0  ;;  %v1796_v2 = vshrl.u32 %v289_v0, 7  ;;  %s1589_s7 = sshll.u32 %s2465_s24, 2  ;;  %s1802_s10 = scalar_lea.vmem %s2421_s3, %s2465_s24 }
  0x11   : > { %s269_s11 = sadd.s32 %s1589_s7, %s267_s30  ;;  %s275_s14 = scalar_lea.vmem %s2420_s2, %s1589_s7 }
  0x12   : > { %s1590_s15 = sshll.u32 %s269_s11, 2  ;;  %s1810_s18 = scalar_lea.vmem %s2422_s4, %s2465_s24 }
  0x13   : > { %s271_s21 = scalar_lea.vmem %s2419_s1, %s1590_s15  ;;  %s1818_s8 = scalar_lea.vmem %s2423_s5, %s2465_s24 }
  0x14   : > { %s1823_s12 = scalar_lea.vmem %s2424_s6, %s2465_s24  ;;  %296 = sbr.rel (%p1593_p7) target bundleno = 28 (0x1c), region = 32 }
  0x19   : > { %vm297_vm0 = vcmask 57344   ;;  %v1712_v3 = vmov -inf  }
  0x1a   : > { %298 = vst.msk [vmem:[%s1802_s10] sm:$0x1] %vm297_vm0, %v1712_v3  ;;  %299 = vst.msk [vmem:[%s1810_s18] sm:$0x1] %vm297_vm0, %v1794_v1 }
  0x1b   : > { %300 = vst.msk [vmem:[%s1818_s8] sm:$0x1] %vm297_vm0, %v1712_v3  ;;  %301 = vst.msk [vmem:[%s1823_s12] sm:$0x1] %vm297_vm0, %v1794_v1 }
  0x1c PF: > { %v303_v4 = vld [vmem:[%s275_s14] sm:$0xf]  ;;  %v1713_v5 = vmov 0   ;;  %vm312_vm1 = vcmask 1043456   ;;  %vm333_vm7 = vcmp.eq.s32.totalorder %v1794_v1, 0  ;;  %vm360_vm8 = vcmp.eq.s32.totalorder %v1794_v1, 1 }
  0x1d   : > { %1647 = vset.pattern.permute.xlu0 %v1713_v5  ;;  %v302_v6 = vld [vmem:[%s271_s21] sm:$0xf]  ;;  %vm387_vm12 = vcmp.eq.s32.totalorder %v1794_v1, 2  ;;  %vm414_vm0 = vcmp.eq.s32.totalorder %v1794_v1, 3  ;;  %s2425_s24 = sshll.u32 %s1694_s23, 7  ;;  %s2190_s23 = sld [smem:[#allocation3]] }
  0x1e   : > { %308 = vperm.xlu0 %1647, %v303_v4   ;;  %1648 = vlog2.f32 %v302_v6 }
  0x23   : > { %p1594_p8 = scmp.eq.s32.totalorder %s2190_s23, 0 }
  0x2b   : > { %v1649_v7 = vpop.eup %1648 }
  0x2c   : > { %v305_v8 = vmul.f32 0.6931472, %v1649_v7 }
  0x99   : > { %v1832_v9 = vpop.permute.xlu0 %308 }
  0x9a   : > { %v311_v10 = vadd.f32 %v1832_v9, %v305_v8 }
  0x9c   : > { %v313_v11 = vsel %vm312_vm1, %v311_v10, -inf }
  0x9d   : > { %314 = vmax.xlane.f32.xlu0 %v313_v11 }
 0x126   : > { %v1836_v12 = vpop.xlane.xlu0 %314 }
 0x127   : > { %vm316_vm2 = vcmp.eq.f32.partialorder %v311_v10, %v1836_v12 }
 0x128   : > { %v317_v13 = vsel %vm316_vm2, %v1794_v1, 1073741824 }
 0x129   : > { %v318_v14 = vsel %vm312_vm1, %v317_v13, 2147483647 }
 0x12a   : > { %v320_v15 = vshra.s32 %v318_v14, 16  ;;  %v319_v17 = vand.u32 65535, %v318_v14 }
 0x12c   : > { %v322_v16 = vcvt.s32.f32 %v320_v15  ;;  %v321_v19 = vcvt.s32.f32 %v319_v17 }
 0x12e   : > { %323 = vmin.xlane.f32.xlu1 %v322_v16 }
 0x1b7   : > { %v324_v18 = vpop.xlane.xlu1 %323 }
 0x1b8   : > { %vm325_vm3 = vcmp.eq.f32.partialorder %v322_v16, %v324_v18  ;;  %v330_v21 = vcvt.f32.s32 %v324_v18 }
 0x1b9   : > { %v326_v20 = vsel %vm325_vm3, %v321_v19, inf }
 0x1ba   : > { %327 = vmin.xlane.f32.xlu1 %v326_v20  ;;  %v331_v23 = vshll.u32 %v330_v21, 16 }
 0x243   : > { %v328_v22 = vpop.xlane.xlu1 %327 }
 0x244   : > { %v329_v24 = vcvt.f32.s32 %v328_v22 }
 0x246   : > { %v332_v25 = vadd.s32 %v331_v23, %v329_v24 }
 0x248   : > { %vm338_vm4 = vcmp.eq.s32.totalorder %v1794_v1, %v332_v25  ;;  %v337_v42 = vsel %vm333_vm7, %v332_v25, 0 }
 0x249   : > { %v339_v26 = vsel %vm338_vm4, -inf, %v311_v10 }
 0x24a   : > { %v340_v27 = vsel %vm312_vm1, %v339_v26, -inf }
 0x24b   : > { %341 = vmax.xlane.f32.xlu1 %v340_v27 }
 0x2d4   : > { %v1843_v28 = vpop.xlane.xlu1 %341 }
 0x2d5   : > { %vm343_vm5 = vcmp.eq.f32.partialorder %v339_v26, %v1843_v28 }
 0x2d6   : > { %v344_v29 = vsel %vm343_vm5, %v1794_v1, 1073741824  ;;  %vm441_vm5 = vcmp.eq.s32.totalorder %v1794_v1, 4 }
 0x2d7   : > { %v345_v30 = vsel %vm312_vm1, %v344_v29, 2147483647 }
 0x2d8   : > { %v347_v31 = vshra.s32 %v345_v30, 16  ;;  %v346_v33 = vand.u32 65535, %v345_v30 }
 0x2da   : > { %v349_v32 = vcvt.s32.f32 %v347_v31  ;;  %v348_v35 = vcvt.s32.f32 %v346_v33 }
 0x2dc   : > { %350 = vmin.xlane.f32.xlu1 %v349_v32 }
 0x365   : > { %v351_v34 = vpop.xlane.xlu1 %350 }
 0x366   : > { %vm352_vm6 = vcmp.eq.f32.partialorder %v349_v32, %v351_v34  ;;  %v357_v37 = vcvt.f32.s32 %v351_v34 }
 0x367   : > { %v353_v36 = vsel %vm352_vm6, %v348_v35, inf }
 0x368   : > { %354 = vmin.xlane.f32.xlu1 %v353_v36  ;;  %v358_v39 = vshll.u32 %v357_v37, 16 }
 0x3f1   : > { %v355_v38 = vpop.xlane.xlu1 %354 }
 0x3f2   : > { %v356_v40 = vcvt.f32.s32 %v355_v38 }
 0x3f4   : > { %v359_v41 = vadd.s32 %v358_v39, %v356_v40 }
 0x3f6   : > { %v364_v43 = vsel %vm360_vm8, %v359_v41, %v337_v42  ;;  %vm365_vm9 = vcmp.eq.s32.totalorder %v1794_v1, %v359_v41 }
 0x3f7   : > { %v366_v44 = vsel %vm365_vm9, -inf, %v339_v26 }
 0x3f8   : > { %v367_v45 = vsel %vm312_vm1, %v366_v44, -inf }
 0x3f9   : > { %368 = vmax.xlane.f32.xlu1 %v367_v45 }
 0x482   : > { %v1856_v46 = vpop.xlane.xlu1 %368 }
 0x483   : > { %vm370_vm10 = vcmp.eq.f32.partialorder %v366_v44, %v1856_v46 }
 0x484   : > { %v371_v47 = vsel %vm370_vm10, %v1794_v1, 1073741824 }
 0x485   : > { %v372_v48 = vsel %vm312_vm1, %v371_v47, 2147483647 }
 0x486   : > { %v374_v49 = vshra.s32 %v372_v48, 16  ;;  %v373_v51 = vand.u32 65535, %v372_v48 }
 0x488   : > { %v376_v50 = vcvt.s32.f32 %v374_v49  ;;  %v375_v53 = vcvt.s32.f32 %v373_v51 }
 0x48a   : > { %377 = vmin.xlane.f32.xlu1 %v376_v50 }
 0x513   : > { %v378_v52 = vpop.xlane.xlu1 %377 }
 0x514   : > { %vm379_vm11 = vcmp.eq.f32.partialorder %v376_v50, %v378_v52  ;;  %v384_v55 = vcvt.f32.s32 %v378_v52 }
 0x515   : > { %v380_v54 = vsel %vm379_vm11, %v375_v53, inf  ;;  %vm468_vm11 = vcmp.eq.s32.totalorder %v1794_v1, 5 }
 0x516   : > { %381 = vmin.xlane.f32.xlu1 %v380_v54  ;;  %v385_v57 = vshll.u32 %v384_v55, 16 }
 0x59f   : > { %v382_v56 = vpop.xlane.xlu1 %381 }
 0x5a0   : > { %v383_v58 = vcvt.f32.s32 %v382_v56 }
 0x5a2   : > { %v386_v59 = vadd.s32 %v385_v57, %v383_v58 }
 0x5a4   : > { %v391_v60 = vsel %vm387_vm12, %v386_v59, %v364_v43  ;;  %vm392_vm13 = vcmp.eq.s32.totalorder %v1794_v1, %v386_v59 }
 0x5a5   : > { %v393_v61 = vsel %vm392_vm13, -inf, %v366_v44 }
 0x5a6   : > { %v394_v62 = vsel %vm312_vm1, %v393_v61, -inf }
 0x5a7   : > { %395 = vmax.xlane.f32.xlu1 %v394_v62 }
 0x630   : > { %v1866_v63 = vpop.xlane.xlu1 %395 }
 0x631   : > { %vm397_vm14 = vcmp.eq.f32.partialorder %v393_v61, %v1866_v63 }
 0x632   : > { %v398_v0 = vsel %vm397_vm14, %v1794_v1, 1073741824 }
 0x633   : > { %v399_v3 = vsel %vm312_vm1, %v398_v0, 2147483647 }
 0x634   : > { %v401_v4 = vshra.s32 %v399_v3, 16  ;;  %v400_v6 = vand.u32 65535, %v399_v3 }
 0x636   : > { %v403_v5 = vcvt.s32.f32 %v401_v4  ;;  %v402_v8 = vcvt.s32.f32 %v400_v6 }
 0x638   : > { %404 = vmin.xlane.f32.xlu0 %v403_v5 }
 0x6c1   : > { %v405_v7 = vpop.xlane.xlu0 %404 }
 0x6c2   : > { %vm406_vm15 = vcmp.eq.f32.partialorder %v403_v5, %v405_v7  ;;  %v411_v11 = vcvt.f32.s32 %v405_v7 }
 0x6c3   : > { %v407_v10 = vsel %vm406_vm15, %v402_v8, inf }
 0x6c4   : > { %408 = vmin.xlane.f32.xlu1 %v407_v10  ;;  %v412_v14 = vshll.u32 %v411_v11, 16 }
 0x74d   : > { %v409_v13 = vpop.xlane.xlu1 %408 }
 0x74e   : > { %v410_v15 = vcvt.f32.s32 %v409_v13 }
 0x750   : > { %v413_v16 = vadd.s32 %v412_v14, %v410_v15  ;;  %v336_v14 = vsel %vm333_vm7, %v1836_v12, -inf  ;;  %vm531_vm7 = vcmask 60416  }
 0x751   : > { %v363_v15 = vsel %vm360_vm8, %v1843_v28, %v336_v14 }
 0x752   : > { %v418_v17 = vsel %vm414_vm0, %v413_v16, %v391_v60  ;;  %vm419_vm2 = vcmp.eq.s32.totalorder %v1794_v1, %v413_v16  ;;  %v390_v16 = vsel %vm387_vm12, %v1856_v46, %v363_v15 }
 0x753   : > { %v420_v18 = vsel %vm419_vm2, -inf, %v393_v61  ;;  %vm495_vm2 = vcmp.eq.s32.totalorder %v1794_v1, 6 }
 0x754   : > { %v421_v19 = vsel %vm312_vm1, %v420_v18, -inf }
 0x755   : > { %422 = vmax.xlane.f32.xlu0 %v421_v19 }
 0x7de   : > { %v1876_v20 = vpop.xlane.xlu0 %422 }
 0x7df   : > { %vm424_vm3 = vcmp.eq.f32.partialorder %v420_v18, %v1876_v20 }
 0x7e0   : > { %v425_v21 = vsel %vm424_vm3, %v1794_v1, 1073741824 }
 0x7e1   : > { %v426_v22 = vsel %vm312_vm1, %v425_v21, 2147483647 }
 0x7e2   : > { %v428_v23 = vshra.s32 %v426_v22, 16  ;;  %v427_v25 = vand.u32 65535, %v426_v22 }
 0x7e4   : > { %v430_v24 = vcvt.s32.f32 %v428_v23  ;;  %v429_v27 = vcvt.s32.f32 %v427_v25 }
 0x7e6   : > { %431 = vmin.xlane.f32.xlu1 %v430_v24 }
 0x86f   : > { %v432_v26 = vpop.xlane.xlu1 %431 }
 0x870   : > { %vm433_vm4 = vcmp.eq.f32.partialorder %v430_v24, %v432_v26  ;;  %v438_v30 = vcvt.f32.s32 %v432_v26 }
 0x871   : > { %v434_v29 = vsel %vm433_vm4, %v429_v27, inf  ;;  %vm522_vm4 = vcmp.eq.s32.totalorder %v1794_v1, 7  ;;  %v1925_v27 = vld [vmem:[%s1802_s10] sm:$0x1] }
 0x872   : > { %435 = vmin.xlane.f32.xlu0 %v434_v29  ;;  %v439_v32 = vshll.u32 %v438_v30, 16 }
 0x8fb   : > { %v436_v31 = vpop.xlane.xlu0 %435 }
 0x8fc   : > { %v437_v33 = vcvt.f32.s32 %v436_v31 }
 0x8fe   : > { %v440_v34 = vadd.s32 %v439_v32, %v437_v33 }
 0x900   : > { %v445_v35 = vsel %vm441_vm5, %v440_v34, %v418_v17  ;;  %vm446_vm6 = vcmp.eq.s32.totalorder %v1794_v1, %v440_v34  ;;  %v417_v17 = vsel %vm414_vm0, %v1866_v63, %v390_v16  ;;  %vm571_vm0 = vcmask 57344  }
 0x901   : > { %v447_v36 = vsel %vm446_vm6, -inf, %v420_v18  ;;  %v444_v18 = vsel %vm441_vm5, %v1876_v20, %v417_v17  ;;  %v572_v30 = vsel %vm571_vm0, %v1925_v27, inf }
 0x902   : > { %v448_v37 = vsel %vm312_vm1, %v447_v36, -inf }
 0x903   : > { %449 = vmax.xlane.f32.xlu1 %v448_v37 }
 0x98c   : > { %v450_v38 = vpop.xlane.xlu1 %449 }
 0x98d   : > { %vm451_vm9 = vcmp.eq.f32.partialorder %v447_v36, %v450_v38  ;;  %v471_v12 = vsel %vm468_vm11, %v450_v38, %v444_v18 }
 0x98e   : > { %v452_v39 = vsel %vm451_vm9, %v1794_v1, 1073741824 }
 0x98f   : > { %v453_v40 = vsel %vm312_vm1, %v452_v39, 2147483647 }
 0x990   : > { %v455_v41 = vshra.s32 %v453_v40, 16  ;;  %v454_v43 = vand.u32 65535, %v453_v40 }
 0x992   : > { %v457_v42 = vcvt.s32.f32 %v455_v41  ;;  %v456_v45 = vcvt.s32.f32 %v454_v43 }
 0x994   : > { %458 = vmin.xlane.f32.xlu0 %v457_v42 }
 0xa1d   : > { %v459_v44 = vpop.xlane.xlu0 %458 }
 0xa1e   : > { %vm460_vm10 = vcmp.eq.f32.partialorder %v457_v42, %v459_v44  ;;  %v465_v48 = vcvt.f32.s32 %v459_v44  ;;  %v528_v42 = vstv %s2425_s24  ;;  %v527_v44 = vmul.u32 500, %v1796_v2 }
 0xa1f   : > { %v461_v47 = vsel %vm460_vm10, %v456_v45, inf }
 0xa20   : > { %462 = vmin.xlane.f32.xlu1 %v461_v47  ;;  %v466_v50 = vshll.u32 %v465_v48, 16 }
 0xaa9   : > { %v463_v49 = vpop.xlane.xlu1 %462 }
 0xaaa   : > { %v464_v51 = vcvt.f32.s32 %v463_v49 }
 0xaac   : > { %v467_v52 = vadd.s32 %v466_v50, %v464_v51 }
 0xaae   : > { %v472_v53 = vsel %vm468_vm11, %v467_v52, %v445_v35  ;;  %vm473_vm13 = vcmp.eq.s32.totalorder %v1794_v1, %v467_v52 }
 0xaaf   : > { %v474_v54 = vsel %vm473_vm13, -inf, %v447_v36 }
 0xab0   : > { %v475_v55 = vsel %vm312_vm1, %v474_v54, -inf }
 0xab1   : > { %476 = vmax.xlane.f32.xlu0 %v475_v55 }
 0xb3a   : > { %v477_v56 = vpop.xlane.xlu0 %476 }
 0xb3b   : > { %vm478_vm14 = vcmp.eq.f32.partialorder %v474_v54, %v477_v56  ;;  %v498_v28 = vsel %vm495_vm2, %v477_v56, %v471_v12 }
 0xb3c   : > { %v479_v57 = vsel %vm478_vm14, %v1794_v1, 1073741824 }
 0xb3d   : > { %v480_v58 = vsel %vm312_vm1, %v479_v57, 2147483647 }
 0xb3e   : > { %v482_v59 = vshra.s32 %v480_v58, 16  ;;  %v481_v61 = vand.u32 65535, %v480_v58 }
 0xb40   : > { %v484_v60 = vcvt.s32.f32 %v482_v59  ;;  %v483_v0 = vcvt.s32.f32 %v481_v61 }
 0xb42   : > { %485 = vmin.xlane.f32.xlu1 %v484_v60 }
 0xbcb   : > { %v486_v62 = vpop.xlane.xlu1 %485 }
 0xbcc   : > { %vm487_vm15 = vcmp.eq.f32.partialorder %v484_v60, %v486_v62  ;;  %v492_v4 = vcvt.f32.s32 %v486_v62 }
 0xbcd   : > { %v488_v3 = vsel %vm487_vm15, %v483_v0, inf }
 0xbce   : > { %489 = vmin.xlane.f32.xlu0 %v488_v3  ;;  %v493_v6 = vshll.u32 %v492_v4, 16 }
 0xc57   : > { %v490_v5 = vpop.xlane.xlu0 %489 }
 0xc58   : > { %v491_v7 = vcvt.f32.s32 %v490_v5 }
 0xc5a   : > { %v494_v8 = vadd.s32 %v493_v6, %v491_v7 }
 0xc5c   : > { %v499_v10 = vsel %vm495_vm2, %v494_v8, %v472_v53  ;;  %vm500_vm3 = vcmp.eq.s32.totalorder %v1794_v1, %v494_v8 }
 0xc5d   : > { %v501_v11 = vsel %vm500_vm3, -inf, %v474_v54 }
 0xc5e   : > { %v502_v13 = vsel %vm312_vm1, %v501_v11, -inf }
 0xc5f   : > { %503 = vmax.xlane.f32.xlu1 %v502_v13 }
 0xce8   : > { %v504_v19 = vpop.xlane.xlu1 %503 }
 0xce9   : > { %vm505_vm8 = vcmp.eq.f32.partialorder %v501_v11, %v504_v19  ;;  %v1918_v46 = vsel %vm522_vm4, %v504_v19, %v498_v28 }
 0xcea   : > { %v506_v63 = vsel %vm505_vm8, %v1794_v1, 1073741824  ;;  %v532_v21 = vsel %vm531_vm7, %v1918_v46, -inf }
 0xceb   : > { %533 = vmax.xlane.f32.xlu1 %v532_v21  ;;  %v507_v20 = vsel %vm312_vm1, %v506_v63, 2147483647 }
 0xcec   : > { %v509_v22 = vshra.s32 %v507_v20, 16  ;;  %v508_v24 = vand.u32 65535, %v507_v20 }
 0xcee   : > { %v511_v23 = vcvt.s32.f32 %v509_v22  ;;  %v510_v26 = vcvt.s32.f32 %v508_v24  ;;  %v570_v24 = vld [vmem:[%s1810_s18] sm:$0x1] }
 0xcf0   : > { %512 = vmin.xlane.f32.xlu0 %v511_v23 }
 0xd74   : > { %v534_v31 = vpop.xlane.xlu1 %533 }
 0xd75   : > { %v535_v32 = vsel %vm312_vm1, %v534_v31, -inf }
 0xd76   : > { %v536_v33 = vrot.slane %v535_v32, 4 }
 0xd78   : > { %v537_v34 = vmax.f32 %v535_v32, %v536_v33 }
 0xd79   : > { %v513_v25 = vpop.xlane.xlu0 %512 }
 0xd7a   : > { %vm514_vm12 = vcmp.eq.f32.partialorder %v511_v23, %v513_v25  ;;  %v538_v35 = vrot.slane %v537_v34, 2  ;;  %v519_v37 = vcvt.f32.s32 %v513_v25 }
 0xd7b   : > { %v515_v29 = vsel %vm514_vm12, %v510_v26, inf }
 0xd7c   : > { %516 = vmin.xlane.f32.xlu0 %v515_v29  ;;  %v539_v36 = vmax.f32 %v537_v34, %v538_v35  ;;  %v520_v40 = vshll.u32 %v519_v37, 16 }
 0xd7e   : > { %v540_v39 = vrot.slane %v539_v36, 1 }
 0xd80   : > { %573 = vmin.xlane.f32.xlu0 %v572_v30  ;;  %v541_v47 = vmax.f32 %v539_v36, %v540_v39 }
 0xd82   : > { %vm542_vm6 = vcmp.eq.f32.partialorder %v1918_v46, %v541_v47 }
 0xe05   : > { %v517_v38 = vpop.xlane.xlu0 %516 }
 0xe06   : > { %v518_v41 = vcvt.f32.s32 %v517_v38 }
 0xe08   : > { %v521_v43 = vadd.s32 %v520_v40, %v518_v41 }
 0xe09   : > { %v574_v45 = vpop.xlane.xlu0 %573 }
 0xe0a   : > { %v526_v48 = vsel %vm522_vm4, %v521_v43, %v499_v10  ;;  %vm575_vm5 = vcmp.eq.f32.partialorder %v1925_v27, %v574_v45  ;;  %vm593_vm11 = vcmp.gt.f32.partialorder %v541_v47, %v574_v45 }
 0xe0b   : > { %v1936_v49 = vadd.s32 %v528_v42, %v526_v48  ;;  %v576_v50 = vsel %vm575_vm5, %v1794_v1, 1073741824 }
 0xe0c   : > { %v577_v51 = vsel %vm571_vm0, %v576_v50, 2147483647 }
 0xe0d   : > { %v1941_v52 = vadd.s32 %v1936_v49, %v527_v44  ;;  %v579_v53 = vshra.s32 %v577_v51, 16  ;;  %v578_v58 = vand.u32 65535, %v577_v51 }
 0xe0f   : > { %v581_v2 = vcvt.s32.f32 %v579_v53  ;;  %v543_v54 = vsel %vm542_vm6, %v1941_v52, 1073741824  ;;  %v580_v59 = vcvt.s32.f32 %v578_v58 }
 0xe10   : > { %v544_v55 = vsel %vm531_vm7, %v543_v54, 2147483647 }
 0xe11   : > { %582 = vmin.xlane.f32.xlu0 %v581_v2  ;;  %v546_v56 = vshra.s32 %v544_v55, 16  ;;  %v545_v61 = vand.u32 65535, %v544_v55 }
 0xe13   : > { %v548_v57 = vcvt.s32.f32 %v546_v56  ;;  %v547_v3 = vcvt.s32.f32 %v545_v61 }
 0xe15   : > { %549 = vmin.xlane.f32.xlu1 %v548_v57 }
 0xe9a   : > { %v583_v60 = vpop.xlane.xlu0 %582 }
 0xe9b   : > { %vm584_vm9 = vcmp.eq.f32.partialorder %v581_v2, %v583_v60  ;;  %v589_v5 = vcvt.f32.s32 %v583_v60 }
 0xe9c   : > { %v585_v62 = vsel %vm584_vm9, %v580_v59, inf }
 0xe9d   : > { %586 = vmin.xlane.f32.xlu0 %v585_v62  ;;  %v590_v6 = vshll.u32 %v589_v5, 16 }
 0xe9e   : > { %v550_v0 = vpop.xlane.xlu1 %549 }
 0xe9f   : > { %vm551_vm10 = vcmp.eq.f32.partialorder %v548_v57, %v550_v0  ;;  %v556_v8 = vcvt.f32.s32 %v550_v0 }
 0xea0   : > { %v552_v4 = vsel %vm551_vm10, %v547_v3, inf }
 0xea1   : > { %553 = vmin.xlane.f32.xlu1 %v552_v4  ;;  %v557_v14 = vshll.u32 %v556_v8, 16 }
 0xf26   : > { %v587_v7 = vpop.xlane.xlu0 %586 }
 0xf27   : > { %v588_v10 = vcvt.f32.s32 %v587_v7 }
 0xf29   : > { %v591_v11 = vadd.s32 %v590_v6, %v588_v10 }
 0xf2a   : > { %v554_v13 = vpop.xlane.xlu1 %553 }
 0xf2b   : > { %vm592_vm13 = vcmp.eq.s32.totalorder %v1794_v1, %v591_v11  ;;  %v555_v15 = vcvt.f32.s32 %v554_v13 }
 0xf2c   : > { %vm1949_vm14 = vmand %vm592_vm13, %vm593_vm11 }
 0xf2d   : > { %v597_v17 = vsel %vm1949_vm14, %v541_v47, %v1925_v27  ;;  %v558_v18 = vadd.s32 %v557_v14, %v555_v15 }
 0xf2e   : > { %598 = vst.msk [vmem:[%s1802_s10] sm:$0x1] %vm571_vm0, %v597_v17 }
 0xf2f   : > { %v559_v12 = vsel %vm312_vm1, %v558_v18, 2147483647 }
 0xf30   : > { %v560_v28 = vrot.slane %v559_v12, 4 }
 0xf32   : > { %vm561_vm15 = vcmp.lt.s32.totalorder %v559_v12, %v560_v28 }
 0xf33   : > { %v562_v19 = vsel %vm561_vm15, %v559_v12, %v560_v28 }
 0xf34   : > { %v563_v63 = vrot.slane %v562_v19, 2 }
 0xf35   : > { %v641_v21 = vld [vmem:[%s1802_s10] sm:$0x1] }
 0xf36   : > { %vm564_vm2 = vcmp.lt.s32.totalorder %v562_v19, %v563_v63  ;;  %v643_v20 = vsel %vm571_vm0, %v641_v21, inf }
 0xf37   : > { %644 = vmin.xlane.f32.xlu0 %v643_v20  ;;  %v565_v22 = vsel %vm564_vm2, %v562_v19, %v563_v63 }
 0xf38   : > { %v566_v23 = vrot.slane %v565_v22, 1 }
 0xf3a   : > { %vm567_vm3 = vcmp.lt.s32.totalorder %v565_v22, %v566_v23 }
 0xf3b   : > { %v568_v25 = vsel %vm567_vm3, %v565_v22, %v566_v23 }
 0xf3c   : > { %vm601_vm4 = vcmp.eq.s32.totalorder %v1941_v52, %v568_v25  ;;  %v599_v26 = vsel %vm1949_vm14, %v568_v25, %v570_v24 }
 0xf3d   : > { %vm602_vm8 = vmand %vm542_vm6, %vm601_vm4  ;;  %600 = vst.msk [vmem:[%s1810_s18] sm:$0x1] %vm571_vm0, %v599_v26 }
 0xf3e   : > { %v1970_v27 = vsel %vm602_vm8, -inf, %v1918_v46 }
 0xf3f   : > { %v604_v29 = vsel %vm531_vm7, %v1970_v27, -inf }
 0xf40   : > { %605 = vmax.xlane.f32.xlu1 %v604_v29 }
 0xf44   : > { %v642_v12 = vld [vmem:[%s1810_s18] sm:$0x1] }
 0xfc0   : > { %v645_v30 = vpop.xlane.xlu0 %644 }
 0xfc1   : > { %vm646_vm12 = vcmp.eq.f32.partialorder %v641_v21, %v645_v30 }
 0xfc2   : > { %v647_v31 = vsel %vm646_vm12, %v1794_v1, 1073741824 }
 0xfc3   : > { %v648_v32 = vsel %vm571_vm0, %v647_v31, 2147483647 }
 0xfc4   : > { %v650_v33 = vshra.s32 %v648_v32, 16  ;;  %v649_v48 = vand.u32 65535, %v648_v32 }
 0xfc6   : > { %v652_v34 = vcvt.s32.f32 %v650_v33  ;;  %v651_v51 = vcvt.s32.f32 %v649_v48 }
 0xfc8   : > { %653 = vmin.xlane.f32.xlu0 %v652_v34 }
 0xfc9   : > { %v606_v35 = vpop.xlane.xlu1 %605 }
 0xfca   : > { %v607_v36 = vsel %vm312_vm1, %v606_v35, -inf }
 0xfcb   : > { %v608_v37 = vrot.slane %v607_v36, 4 }
 0xfcd   : > { %v609_v38 = vmax.f32 %v607_v36, %v608_v37 }
 0xfcf   : > { %v610_v39 = vrot.slane %v609_v38, 2 }
 0xfd1   : > { %v611_v40 = vmax.f32 %v609_v38, %v610_v39 }
 0xfd3   : > { %v612_v41 = vrot.slane %v611_v40, 1 }
 0xfd5   : > { %v613_v42 = vmax.f32 %v611_v40, %v612_v41 }
 0xfd7   : > { %vm614_vm5 = vcmp.eq.f32.partialorder %v1970_v27, %v613_v42  ;;  %vm664_vm11 = vcmp.gt.f32.partialorder %v613_v42, %v645_v30 }
 0xfd8   : > { %v615_v43 = vsel %vm614_vm5, %v1941_v52, 1073741824 }
 0xfd9   : > { %v616_v44 = vsel %vm531_vm7, %v615_v43, 2147483647 }
 0xfda   : > { %v618_v45 = vshra.s32 %v616_v44, 16  ;;  %v617_v2 = vand.u32 65535, %v616_v44 }
 0xfdc   : > { %v620_v47 = vcvt.s32.f32 %v618_v45  ;;  %v619_v55 = vcvt.s32.f32 %v617_v2 }
 0xfde   : > { %621 = vmin.xlane.f32.xlu1 %v620_v47 }
0x1051   : > { %v654_v50 = vpop.xlane.xlu0 %653 }
0x1052   : > { %vm655_vm6 = vcmp.eq.f32.partialorder %v652_v34, %v654_v50  ;;  %v660_v57 = vcvt.f32.s32 %v654_v50 }
0x1053   : > { %v656_v53 = vsel %vm655_vm6, %v651_v51, inf }
0x1054   : > { %657 = vmin.xlane.f32.xlu0 %v656_v53  ;;  %v661_v59 = vshll.u32 %v660_v57, 16 }
0x1067   : > { %v622_v54 = vpop.xlane.xlu1 %621 }
0x1068   : > { %vm623_vm9 = vcmp.eq.f32.partialorder %v620_v47, %v622_v54  ;;  %v628_v5 = vcvt.f32.s32 %v622_v54 }
0x1069   : > { %v624_v56 = vsel %vm623_vm9, %v619_v55, inf }
0x106a   : > { %625 = vmin.xlane.f32.xlu1 %v624_v56  ;;  %v629_v7 = vshll.u32 %v628_v5, 16 }
0x10dd   : > { %v658_v58 = vpop.xlane.xlu0 %657 }
0x10de   : > { %v659_v60 = vcvt.f32.s32 %v658_v58 }
0x10e0   : > { %v662_v61 = vadd.s32 %v661_v59, %v659_v60 }
0x10e2   : > { %vm663_vm10 = vcmp.eq.s32.totalorder %v1794_v1, %v662_v61 }
0x10e3   : > { %vm1983_vm13 = vmand %vm663_vm10, %vm664_vm11 }
0x10e4   : > { %v668_v0 = vsel %vm1983_vm13, %v613_v42, %v641_v21 }
0x10e5   : > { %669 = vst.msk [vmem:[%s1802_s10] sm:$0x1] %vm571_vm0, %v668_v0 }
0x10ec   : > { %v1992_v3 = vld [vmem:[%s1802_s10] sm:$0x1] }
0x10ed   : > { %v714_v4 = vsel %vm571_vm0, %v1992_v3, inf }
0x10ee   : > { %715 = vmin.xlane.f32.xlu0 %v714_v4 }
0x10f3   : > { %v626_v6 = vpop.xlane.xlu1 %625 }
0x10f4   : > { %v627_v8 = vcvt.f32.s32 %v626_v6 }
0x10f6   : > { %v630_v10 = vadd.s32 %v629_v7, %v627_v8 }
0x10f8   : > { %v631_v11 = vsel %vm312_vm1, %v630_v10, 2147483647 }
0x10f9   : > { %v632_v13 = vrot.slane %v631_v11, 4 }
0x10fb   : > { %vm633_vm14 = vcmp.lt.s32.totalorder %v631_v11, %v632_v13 }
0x10fc   : > { %v634_v14 = vsel %vm633_vm14, %v631_v11, %v632_v13 }
0x10fd   : > { %v635_v15 = vrot.slane %v634_v14, 2 }
0x10ff   : > { %vm636_vm15 = vcmp.lt.s32.totalorder %v634_v14, %v635_v15 }
0x1100   : > { %v637_v16 = vsel %vm636_vm15, %v634_v14, %v635_v15 }
0x1101   : > { %v638_v17 = vrot.slane %v637_v16, 1 }
0x1103   : > { %vm639_vm2 = vcmp.lt.s32.totalorder %v637_v16, %v638_v17 }
0x1104   : > { %v640_v18 = vsel %vm639_vm2, %v637_v16, %v638_v17 }
0x1105   : > { %vm672_vm3 = vcmp.eq.s32.totalorder %v1941_v52, %v640_v18  ;;  %v670_v28 = vsel %vm1983_vm13, %v640_v18, %v642_v12 }
0x1106   : > { %vm673_vm4 = vmand %vm614_vm5, %vm672_vm3  ;;  %671 = vst.msk [vmem:[%s1810_s18] sm:$0x1] %vm571_vm0, %v670_v28 }
0x1107   : > { %v2006_v19 = vsel %vm673_vm4, -inf, %v1970_v27 }
0x1108   : > { %v675_v63 = vsel %vm531_vm7, %v2006_v19, -inf }
0x1109   : > { %676 = vmax.xlane.f32.xlu1 %v675_v63 }
0x110d   : > { %v713_v8 = vld [vmem:[%s1810_s18] sm:$0x1] }
0x1177   : > { %v716_v21 = vpop.xlane.xlu0 %715 }
0x1178   : > { %vm717_vm8 = vcmp.eq.f32.partialorder %v1992_v3, %v716_v21 }
0x1179   : > { %v718_v20 = vsel %vm717_vm8, %v1794_v1, 1073741824 }
0x117a   : > { %v719_v22 = vsel %vm571_vm0, %v718_v20, 2147483647 }
0x117b   : > { %v721_v23 = vshra.s32 %v719_v22, 16  ;;  %v720_v38 = vand.u32 65535, %v719_v22 }
0x117d   : > { %v723_v24 = vcvt.s32.f32 %v721_v23  ;;  %v722_v40 = vcvt.s32.f32 %v720_v38 }
0x117f   : > { %724 = vmin.xlane.f32.xlu0 %v723_v24 }
0x1192   : > { %v677_v25 = vpop.xlane.xlu1 %676 }
0x1193   : > { %v678_v26 = vsel %vm312_vm1, %v677_v25, -inf }
0x1194   : > { %v679_v29 = vrot.slane %v678_v26, 4 }
0x1196   : > { %v680_v27 = vmax.f32 %v678_v26, %v679_v29 }
0x1198   : > { %v681_v30 = vrot.slane %v680_v27, 2 }
0x119a   : > { %v682_v31 = vmax.f32 %v680_v27, %v681_v30 }
0x119c   : > { %v683_v32 = vrot.slane %v682_v31, 1 }
0x119e   : > { %v684_v33 = vmax.f32 %v682_v31, %v683_v32 }
0x11a0   : > { %vm685_vm12 = vcmp.eq.f32.partialorder %v2006_v19, %v684_v33  ;;  %vm735_vm10 = vcmp.gt.f32.partialorder %v684_v33, %v716_v21 }
0x11a1   : > { %v686_v34 = vsel %vm685_vm12, %v1941_v52, 1073741824 }
0x11a2   : > { %v687_v35 = vsel %vm531_vm7, %v686_v34, 2147483647 }
0x11a3   : > { %v689_v36 = vshra.s32 %v687_v35, 16  ;;  %v688_v42 = vand.u32 65535, %v687_v35 }
0x11a5   : > { %v691_v37 = vcvt.s32.f32 %v689_v36  ;;  %v690_v44 = vcvt.s32.f32 %v688_v42 }
0x11a7   : > { %692 = vmin.xlane.f32.xlu1 %v691_v37 }
0x1208   : > { %v725_v39 = vpop.xlane.xlu0 %724 }
0x1209   : > { %vm726_vm5 = vcmp.eq.f32.partialorder %v723_v24, %v725_v39  ;;  %v731_v47 = vcvt.f32.s32 %v725_v39 }
0x120a   : > { %v727_v41 = vsel %vm726_vm5, %v722_v40, inf }
0x120b   : > { %728 = vmin.xlane.f32.xlu0 %v727_v41  ;;  %v732_v50 = vshll.u32 %v731_v47, 16 }
0x1230   : > { %v693_v43 = vpop.xlane.xlu1 %692 }
0x1231   : > { %vm694_vm6 = vcmp.eq.f32.partialorder %v691_v37, %v693_v43  ;;  %v699_v57 = vcvt.f32.s32 %v693_v43 }
0x1232   : > { %v695_v45 = vsel %vm694_vm6, %v690_v44, inf }
0x1233   : > { %696 = vmin.xlane.f32.xlu1 %v695_v45  ;;  %v700_v59 = vshll.u32 %v699_v57, 16 }
0x1294   : > { %v729_v48 = vpop.xlane.xlu0 %728 }
0x1295   : > { %v730_v51 = vcvt.f32.s32 %v729_v48 }
0x1297   : > { %v733_v53 = vadd.s32 %v732_v50, %v730_v51 }
0x1299   : > { %vm734_vm9 = vcmp.eq.s32.totalorder %v1794_v1, %v733_v53 }
0x129a   : > { %vm2020_vm11 = vmand %vm734_vm9, %vm735_vm10 }
0x129b   : > { %v739_v54 = vsel %vm2020_vm11, %v684_v33, %v1992_v3 }
0x129c   : > { %740 = vst.msk [vmem:[%s1802_s10] sm:$0x1] %vm571_vm0, %v739_v54 }
0x12a3   : > { %v2030_v55 = vld [vmem:[%s1802_s10] sm:$0x1] }
0x12a4   : > { %v785_v56 = vsel %vm571_vm0, %v2030_v55, inf }
0x12a5   : > { %786 = vmin.xlane.f32.xlu0 %v785_v56 }
0x12bc   : > { %v697_v58 = vpop.xlane.xlu1 %696 }
0x12bd   : > { %v698_v60 = vcvt.f32.s32 %v697_v58 }
0x12bf   : > { %v701_v61 = vadd.s32 %v700_v59, %v698_v60 }
0x12c1   : > { %v702_v62 = vsel %vm312_vm1, %v701_v61, 2147483647 }
0x12c2   : > { %v703_v0 = vrot.slane %v702_v62, 4 }
0x12c4   : > { %vm704_vm13 = vcmp.lt.s32.totalorder %v702_v62, %v703_v0 }
0x12c5   : > { %v705_v3 = vsel %vm704_vm13, %v702_v62, %v703_v0 }
0x12c6   : > { %v706_v4 = vrot.slane %v705_v3, 2 }
0x12c8   : > { %vm707_vm14 = vcmp.lt.s32.totalorder %v705_v3, %v706_v4 }
0x12c9   : > { %v708_v5 = vsel %vm707_vm14, %v705_v3, %v706_v4 }
0x12ca   : > { %v709_v6 = vrot.slane %v708_v5, 1 }
0x12cc   : > { %vm710_vm15 = vcmp.lt.s32.totalorder %v708_v5, %v709_v6 }
0x12cd   : > { %v711_v7 = vsel %vm710_vm15, %v708_v5, %v709_v6 }
0x12ce   : > { %vm743_vm2 = vcmp.eq.s32.totalorder %v1941_v52, %v711_v7  ;;  %v741_v10 = vsel %vm2020_vm11, %v711_v7, %v713_v8 }
0x12cf   : > { %vm744_vm3 = vmand %vm685_vm12, %vm743_vm2  ;;  %742 = vst.msk [vmem:[%s1810_s18] sm:$0x1] %vm571_vm0, %v741_v10 }
0x12d0   : > { %v2044_v11 = vsel %vm744_vm3, -inf, %v2006_v19 }
0x12d1   : > { %v746_v13 = vsel %vm531_vm7, %v2044_v11, -inf }
0x12d2   : > { %747 = vmax.xlane.f32.xlu1 %v746_v13 }
0x12d6   : > { %v784_v58 = vld [vmem:[%s1810_s18] sm:$0x1] }
0x132e   : > { %v787_v14 = vpop.xlane.xlu0 %786 }
0x132f   : > { %vm788_vm4 = vcmp.eq.f32.partialorder %v2030_v55, %v787_v14 }
0x1330   : > { %v789_v15 = vsel %vm788_vm4, %v1794_v1, 1073741824 }
0x1331   : > { %v790_v16 = vsel %vm571_vm0, %v789_v15, 2147483647 }
0x1332   : > { %v792_v17 = vshra.s32 %v790_v16, 16  ;;  %v791_v33 = vand.u32 65535, %v790_v16 }
0x1334   : > { %v794_v18 = vcvt.s32.f32 %v792_v17  ;;  %v793_v35 = vcvt.s32.f32 %v791_v33 }
0x1336   : > { %795 = vmin.xlane.f32.xlu0 %v794_v18 }
0x135b   : > { %v748_v12 = vpop.xlane.xlu1 %747 }
0x135c   : > { %v749_v28 = vsel %vm312_vm1, %v748_v12, -inf }
0x135d   : > { %v750_v63 = vrot.slane %v749_v28, 4 }
0x135f   : > { %v751_v19 = vmax.f32 %v749_v28, %v750_v63 }
0x1361   : > { %v752_v21 = vrot.slane %v751_v19, 2 }
0x1363   : > { %v753_v20 = vmax.f32 %v751_v19, %v752_v21 }
0x1365   : > { %v754_v22 = vrot.slane %v753_v20, 1 }
0x1367   : > { %v755_v23 = vmax.f32 %v753_v20, %v754_v22 }
0x1369   : > { %vm756_vm8 = vcmp.eq.f32.partialorder %v2044_v11, %v755_v23  ;;  %vm806_vm9 = vcmp.gt.f32.partialorder %v755_v23, %v787_v14 }
0x136a   : > { %v757_v24 = vsel %vm756_vm8, %v1941_v52, 1073741824 }
0x136b   : > { %v758_v25 = vsel %vm531_vm7, %v757_v24, 2147483647 }
0x136c   : > { %v760_v26 = vshra.s32 %v758_v25, 16  ;;  %v759_v27 = vand.u32 65535, %v758_v25 }
0x136e   : > { %v762_v29 = vcvt.s32.f32 %v760_v26  ;;  %v761_v32 = vcvt.s32.f32 %v759_v27 }
0x1370   : > { %763 = vmin.xlane.f32.xlu1 %v762_v29 }
0x13bf   : > { %v796_v30 = vpop.xlane.xlu0 %795 }
0x13c0   : > { %vm797_vm5 = vcmp.eq.f32.partialorder %v794_v18, %v796_v30  ;;  %v802_v39 = vcvt.f32.s32 %v796_v30 }
0x13c1   : > { %v798_v36 = vsel %vm797_vm5, %v793_v35, inf }
0x13c2   : > { %v803_v44 = vshll.u32 %v802_v39, 16 }
0x13f9   : > { %v764_v31 = vpop.xlane.xlu1 %763 }
0x13fa   : > { %vm765_vm12 = vcmp.eq.f32.partialorder %v762_v29, %v764_v31  ;;  %v770_v37 = vcvt.f32.s32 %v764_v31 }
0x13fb   : > { %v766_v34 = vsel %vm765_vm12, %v761_v32, inf }
0x13fc   : > { %767 = vmin.xlane.f32.xlu1 %v766_v34  ;;  %v771_v40 = vshll.u32 %v770_v37, 16 }
0x1400   : > { %799 = vmin.xlane.f32.xlu1 %v798_v36 }
0x1485   : > { %v768_v38 = vpop.xlane.xlu1 %767 }
0x1486   : > { %v769_v41 = vcvt.f32.s32 %v768_v38 }
0x1488   : > { %v772_v42 = vadd.s32 %v771_v40, %v769_v41 }
0x1489   : > { %v800_v43 = vpop.xlane.xlu1 %799 }
0x148a   : > { %v773_v45 = vsel %vm312_vm1, %v772_v42, 2147483647  ;;  %v801_v47 = vcvt.f32.s32 %v800_v43 }
0x148b   : > { %v774_v48 = vrot.slane %v773_v45, 4 }
0x148c   : > { %v804_v50 = vadd.s32 %v803_v44, %v801_v47 }
0x148d   : > { %vm775_vm6 = vcmp.lt.s32.totalorder %v773_v45, %v774_v48 }
0x148e   : > { %v776_v51 = vsel %vm775_vm6, %v773_v45, %v774_v48  ;;  %vm805_vm10 = vcmp.eq.s32.totalorder %v1794_v1, %v804_v50 }
0x148f   : > { %v777_v53 = vrot.slane %v776_v51, 2  ;;  %vm809_vm11 = vmand %vm805_vm10, %vm806_vm9 }
0x1490   : > { %v810_v2 = vsel %vm809_vm11, %v755_v23, %v2030_v55 }
0x1491   : > { %vm778_vm13 = vcmp.lt.s32.totalorder %v776_v51, %v777_v53  ;;  %811 = vst.msk [vmem:[%s1802_s10] sm:$0x1] %vm571_vm0, %v810_v2 }
0x1492   : > { %v779_v54 = vsel %vm778_vm13, %v776_v51, %v777_v53 }
0x1493   : > { %v780_v56 = vrot.slane %v779_v54, 1 }
0x1495   : > { %vm781_vm14 = vcmp.lt.s32.totalorder %v779_v54, %v780_v56 }
0x1496   : > { %v782_v57 = vsel %vm781_vm14, %v779_v54, %v780_v56 }
0x1497   : > { %vm814_vm15 = vcmp.eq.s32.totalorder %v1941_v52, %v782_v57  ;;  %v812_v59 = vsel %vm809_vm11, %v782_v57, %v784_v58 }
0x1498   : > { %v854_v60 = vld [vmem:[%s1802_s10] sm:$0x1]  ;;  %vm815_vm2 = vmand %vm756_vm8, %vm814_vm15  ;;  %813 = vst.msk [vmem:[%s1810_s18] sm:$0x1] %vm571_vm0, %v812_v59 }
0x1499   : > { %v856_v61 = vsel %vm571_vm0, %v854_v60, inf  ;;  %v2071_v55 = vsel %vm815_vm2, -inf, %v2044_v11 }
0x149a   : > { %857 = vmin.xlane.f32.xlu1 %v856_v61  ;;  %v817_v62 = vsel %vm531_vm7, %v2071_v55, -inf }
0x149b   : > { %818 = vmax.xlane.f32.xlu0 %v817_v62 }
0x149f   : > { %v855_v50 = vld [vmem:[%s1810_s18] sm:$0x1] }
0x1523   : > { %v858_v0 = vpop.xlane.xlu1 %857 }
0x1524   : > { %vm859_vm3 = vcmp.eq.f32.partialorder %v854_v60, %v858_v0  ;;  %v819_v3 = vpop.xlane.xlu0 %818 }
0x1525   : > { %v860_v4 = vsel %vm859_vm3, %v1794_v1, 1073741824  ;;  %v820_v5 = vsel %vm312_vm1, %v819_v3, -inf }
0x1526   : > { %v821_v6 = vrot.slane %v820_v5, 4  ;;  %v861_v7 = vsel %vm571_vm0, %v860_v4, 2147483647 }
0x1527   : > { %v863_v8 = vshra.s32 %v861_v7, 16  ;;  %v862_v63 = vand.u32 65535, %v861_v7 }
0x1528   : > { %v822_v10 = vmax.f32 %v820_v5, %v821_v6 }
0x1529   : > { %v865_v13 = vcvt.s32.f32 %v863_v8  ;;  %v864_v21 = vcvt.s32.f32 %v862_v63 }
0x152a   : > { %v823_v11 = vrot.slane %v822_v10, 2 }
0x152b   : > { %866 = vmin.xlane.f32.xlu1 %v865_v13 }
0x152c   : > { %v824_v14 = vmax.f32 %v822_v10, %v823_v11 }
0x152e   : > { %v825_v15 = vrot.slane %v824_v14, 1 }
0x1530   : > { %v826_v16 = vmax.f32 %v824_v14, %v825_v15 }
0x1532   : > { %vm827_vm4 = vcmp.eq.f32.partialorder %v2071_v55, %v826_v16  ;;  %vm877_vm5 = vcmp.gt.f32.partialorder %v826_v16, %v858_v0 }
0x1533   : > { %v828_v17 = vsel %vm827_vm4, %v1941_v52, 1073741824 }
0x1534   : > { %v829_v18 = vsel %vm531_vm7, %v828_v17, 2147483647 }
0x1535   : > { %v831_v12 = vshra.s32 %v829_v18, 16  ;;  %v830_v22 = vand.u32 65535, %v829_v18 }
0x1537   : > { %v833_v28 = vcvt.s32.f32 %v831_v12  ;;  %v832_v24 = vcvt.s32.f32 %v830_v22 }
0x1539   : > { %834 = vmin.xlane.f32.xlu0 %v833_v28 }
0x15b4   : > { %v867_v19 = vpop.xlane.xlu1 %866 }
0x15b5   : > { %vm868_vm8 = vcmp.eq.f32.partialorder %v865_v13, %v867_v19  ;;  %v873_v26 = vcvt.f32.s32 %v867_v19 }
0x15b6   : > { %v869_v20 = vsel %vm868_vm8, %v864_v21, inf }
0x15b7   : > { %870 = vmin.xlane.f32.xlu1 %v869_v20  ;;  %v874_v27 = vshll.u32 %v873_v26, 16 }
0x15c2   : > { %v835_v23 = vpop.xlane.xlu0 %834 }
0x15c3   : > { %vm836_vm12 = vcmp.eq.f32.partialorder %v833_v28, %v835_v23  ;;  %v841_v34 = vcvt.f32.s32 %v835_v23 }
0x15c4   : > { %v837_v25 = vsel %vm836_vm12, %v832_v24, inf }
0x15c5   : > { %838 = vmin.xlane.f32.xlu0 %v837_v25  ;;  %v842_v36 = vshll.u32 %v841_v34, 16 }
0x1640   : > { %v871_v29 = vpop.xlane.xlu1 %870 }
0x1641   : > { %v872_v30 = vcvt.f32.s32 %v871_v29 }
0x1643   : > { %v875_v31 = vadd.s32 %v874_v27, %v872_v30 }
0x1645   : > { %vm876_vm6 = vcmp.eq.s32.totalorder %v1794_v1, %v875_v31 }
0x1646   : > { %vm2084_vm9 = vmand %vm876_vm6, %vm877_vm5 }
0x1647   : > { %v881_v33 = vsel %vm2084_vm9, %v826_v16, %v854_v60 }
0x1648   : > { %882 = vst.msk [vmem:[%s1802_s10] sm:$0x1] %vm571_vm0, %v881_v33 }
0x164e   : > { %v839_v35 = vpop.xlane.xlu0 %838 }
0x164f   : > { %v840_v37 = vcvt.f32.s32 %v839_v35  ;;  %v2093_v38 = vld [vmem:[%s1802_s10] sm:$0x1] }
0x1650   : > { %v927_v39 = vsel %vm571_vm0, %v2093_v38, inf }
0x1651   : > { %v843_v40 = vadd.s32 %v842_v36, %v840_v37  ;;  %928 = vmin.xlane.f32.xlu1 %v927_v39 }
0x1653   : > { %v844_v41 = vsel %vm312_vm1, %v843_v40, 2147483647 }
0x1654   : > { %v845_v42 = vrot.slane %v844_v41, 4 }
0x1656   : > { %vm846_vm10 = vcmp.lt.s32.totalorder %v844_v41, %v845_v42 }
0x1657   : > { %v847_v43 = vsel %vm846_vm10, %v844_v41, %v845_v42 }
0x1658   : > { %v848_v44 = vrot.slane %v847_v43, 2 }
0x165a   : > { %vm849_vm11 = vcmp.lt.s32.totalorder %v847_v43, %v848_v44 }
0x165b   : > { %v850_v45 = vsel %vm849_vm11, %v847_v43, %v848_v44 }
0x165c   : > { %v851_v47 = vrot.slane %v850_v45, 1 }
0x165e   : > { %vm852_vm13 = vcmp.lt.s32.totalorder %v850_v45, %v851_v47 }
0x165f   : > { %v853_v48 = vsel %vm852_vm13, %v850_v45, %v851_v47 }
0x1660   : > { %vm885_vm14 = vcmp.eq.s32.totalorder %v1941_v52, %v853_v48  ;;  %v883_v51 = vsel %vm2084_vm9, %v853_v48, %v855_v50 }
0x1661   : > { %vm886_vm15 = vmand %vm827_vm4, %vm885_vm14  ;;  %884 = vst.msk [vmem:[%s1810_s18] sm:$0x1] %vm571_vm0, %v883_v51 }
0x1662   : > { %v2107_v53 = vsel %vm886_vm15, -inf, %v2071_v55 }
0x1663   : > { %v888_v2 = vsel %vm531_vm7, %v2107_v53, -inf }
0x1664   : > { %889 = vmax.xlane.f32.xlu0 %v888_v2 }
0x1668   : > { %v926_v39 = vld [vmem:[%s1810_s18] sm:$0x1] }
0x16da   : > { %v929_v54 = vpop.xlane.xlu1 %928 }
0x16db   : > { %vm930_vm2 = vcmp.eq.f32.partialorder %v2093_v38, %v929_v54 }
0x16dc   : > { %v931_v56 = vsel %vm930_vm2, %v1794_v1, 1073741824 }
0x16dd   : > { %v932_v57 = vsel %vm571_vm0, %v931_v56, 2147483647 }
0x16de   : > { %v934_v58 = vshra.s32 %v932_v57, 16  ;;  %v933_v13 = vand.u32 65535, %v932_v57 }
0x16e0   : > { %v936_v59 = vcvt.s32.f32 %v934_v58  ;;  %v935_v14 = vcvt.s32.f32 %v933_v13 }
0x16e2   : > { %937 = vmin.xlane.f32.xlu1 %v936_v59 }
0x16ed   : > { %v890_v60 = vpop.xlane.xlu0 %889 }
0x16ee   : > { %v891_v61 = vsel %vm312_vm1, %v890_v60, -inf }
0x16ef   : > { %v892_v62 = vrot.slane %v891_v61, 4 }
0x16f1   : > { %v893_v55 = vmax.f32 %v891_v61, %v892_v62 }
0x16f3   : > { %v894_v0 = vrot.slane %v893_v55, 2 }
0x16f5   : > { %v895_v3 = vmax.f32 %v893_v55, %v894_v0 }
0x16f7   : > { %v896_v4 = vrot.slane %v895_v3, 1 }
0x16f9   : > { %v897_v5 = vmax.f32 %v895_v3, %v896_v4 }
0x16fb   : > { %vm898_vm3 = vcmp.eq.f32.partialorder %v2107_v53, %v897_v5  ;;  %vm948_vm12 = vcmp.gt.f32.partialorder %v897_v5, %v929_v54 }
0x16fc   : > { %v899_v6 = vsel %vm898_vm3, %v1941_v52, 1073741824 }
0x16fd   : > { %v900_v7 = vsel %vm531_vm7, %v899_v6, 2147483647 }
0x16fe   : > { %v902_v8 = vshra.s32 %v900_v7, 16  ;;  %v901_v16 = vand.u32 65535, %v900_v7 }
0x1700   : > { %v904_v10 = vcvt.s32.f32 %v902_v8  ;;  %v903_v18 = vcvt.s32.f32 %v901_v16 }
0x1702   : > { %905 = vmin.xlane.f32.xlu0 %v904_v10 }
0x176b   : > { %v938_v11 = vpop.xlane.xlu1 %937 }
0x176c   : > { %vm939_vm4 = vcmp.eq.f32.partialorder %v936_v59, %v938_v11  ;;  %v944_v28 = vcvt.f32.s32 %v938_v11 }
0x176d   : > { %v940_v15 = vsel %vm939_vm4, %v935_v14, inf }
0x176e   : > { %941 = vmin.xlane.f32.xlu1 %v940_v15  ;;  %v945_v19 = vshll.u32 %v944_v28, 16 }
0x178b   : > { %v906_v17 = vpop.xlane.xlu0 %905 }
0x178c   : > { %vm907_vm8 = vcmp.eq.f32.partialorder %v904_v10, %v906_v17  ;;  %v912_v26 = vcvt.f32.s32 %v906_v17 }
0x178d   : > { %v908_v12 = vsel %vm907_vm8, %v903_v18, inf }
0x178e   : > { %909 = vmin.xlane.f32.xlu0 %v908_v12  ;;  %v913_v27 = vshll.u32 %v912_v26, 16 }
0x17f7   : > { %v942_v63 = vpop.xlane.xlu1 %941 }
0x17f8   : > { %v943_v21 = vcvt.f32.s32 %v942_v63 }
0x17fa   : > { %v946_v20 = vadd.s32 %v945_v19, %v943_v21 }
0x17fc   : > { %vm947_vm5 = vcmp.eq.s32.totalorder %v1794_v1, %v946_v20 }
0x17fd   : > { %vm2121_vm6 = vmand %vm947_vm5, %vm948_vm12 }
0x17fe   : > { %v952_v23 = vsel %vm2121_vm6, %v897_v5, %v2093_v38 }
0x17ff   : > { %953 = vst.msk [vmem:[%s1802_s10] sm:$0x1] %vm571_vm0, %v952_v23 }
0x1806   : > { %v2131_v24 = vld [vmem:[%s1802_s10] sm:$0x1] }
0x1807   : > { %v998_v25 = vsel %vm571_vm0, %v2131_v24, inf }
0x1808   : > { %999 = vmin.xlane.f32.xlu1 %v998_v25 }
0x1817   : > { %v910_v29 = vpop.xlane.xlu0 %909 }
0x1818   : > { %v911_v30 = vcvt.f32.s32 %v910_v29 }
0x181a   : > { %v914_v31 = vadd.s32 %v913_v27, %v911_v30 }
0x181c   : > { %v915_v32 = vsel %vm312_vm1, %v914_v31, 2147483647 }
0x181d   : > { %v916_v33 = vrot.slane %v915_v32, 4 }
0x181f   : > { %vm917_vm9 = vcmp.lt.s32.totalorder %v915_v32, %v916_v33 }
0x1820   : > { %v918_v34 = vsel %vm917_vm9, %v915_v32, %v916_v33 }
0x1821   : > { %v919_v35 = vrot.slane %v918_v34, 2 }
0x1823   : > { %vm920_vm10 = vcmp.lt.s32.totalorder %v918_v34, %v919_v35 }
0x1824   : > { %v921_v36 = vsel %vm920_vm10, %v918_v34, %v919_v35 }
0x1825   : > { %v922_v37 = vrot.slane %v921_v36, 1 }
0x1827   : > { %vm923_vm11 = vcmp.lt.s32.totalorder %v921_v36, %v922_v37 }
0x1828   : > { %v924_v38 = vsel %vm923_vm11, %v921_v36, %v922_v37 }
0x1829   : > { %vm956_vm13 = vcmp.eq.s32.totalorder %v1941_v52, %v924_v38  ;;  %v954_v40 = vsel %vm2121_vm6, %v924_v38, %v926_v39 }
0x182a   : > { %vm957_vm14 = vmand %vm898_vm3, %vm956_vm13  ;;  %955 = vst.msk [vmem:[%s1810_s18] sm:$0x1] %vm571_vm0, %v954_v40 }
0x182b   : > { %v2145_v41 = vsel %vm957_vm14, -inf, %v2107_v53 }
0x182c   : > { %v959_v42 = vsel %vm531_vm7, %v2145_v41, -inf }
0x182d   : > { %960 = vmax.xlane.f32.xlu0 %v959_v42 }
0x1831   : > { %v997_v30 = vld [vmem:[%s1810_s18] sm:$0x1] }
0x1891   : > { %v1000_v43 = vpop.xlane.xlu1 %999 }
0x1892   : > { %vm1001_vm15 = vcmp.eq.f32.partialorder %v2131_v24, %v1000_v43 }
0x1893   : > { %v1002_v44 = vsel %vm1001_vm15, %v1794_v1, 1073741824 }
0x1894   : > { %v1003_v45 = vsel %vm571_vm0, %v1002_v44, 2147483647 }
0x1895   : > { %v1005_v47 = vshra.s32 %v1003_v45, 16  ;;  %v1004_v55 = vand.u32 65535, %v1003_v45 }
0x1897   : > { %v1007_v48 = vcvt.s32.f32 %v1005_v47  ;;  %v1006_v3 = vcvt.s32.f32 %v1004_v55 }
0x1899   : > { %1008 = vmin.xlane.f32.xlu1 %v1007_v48 }
0x18b6   : > { %v961_v50 = vpop.xlane.xlu0 %960 }
0x18b7   : > { %v962_v51 = vsel %vm312_vm1, %v961_v50, -inf }
0x18b8   : > { %v963_v2 = vrot.slane %v962_v51, 4 }
0x18ba   : > { %v964_v53 = vmax.f32 %v962_v51, %v963_v2 }
0x18bc   : > { %v965_v54 = vrot.slane %v964_v53, 2 }
0x18be   : > { %v966_v56 = vmax.f32 %v964_v53, %v965_v54 }
0x18c0   : > { %v967_v57 = vrot.slane %v966_v56, 1 }
0x18c2   : > { %v968_v58 = vmax.f32 %v966_v56, %v967_v57 }
0x18c4   : > { %vm969_vm2 = vcmp.eq.f32.partialorder %v2145_v41, %v968_v58  ;;  %vm1019_vm8 = vcmp.gt.f32.partialorder %v968_v58, %v1000_v43 }
0x18c5   : > { %v970_v59 = vsel %vm969_vm2, %v1941_v52, 1073741824 }
0x18c6   : > { %v971_v60 = vsel %vm531_vm7, %v970_v59, 2147483647 }
0x18c7   : > { %v973_v61 = vshra.s32 %v971_v60, 16  ;;  %v972_v5 = vand.u32 65535, %v971_v60 }
0x18c9   : > { %v975_v62 = vcvt.s32.f32 %v973_v61  ;;  %v974_v7 = vcvt.s32.f32 %v972_v5 }
0x18cb   : > { %976 = vmin.xlane.f32.xlu0 %v975_v62 }
0x1922   : > { %v1009_v0 = vpop.xlane.xlu1 %1008 }
0x1923   : > { %vm1010_vm3 = vcmp.eq.f32.partialorder %v1007_v48, %v1009_v0  ;;  %v1015_v10 = vcvt.f32.s32 %v1009_v0 }
0x1924   : > { %v1011_v4 = vsel %vm1010_vm3, %v1006_v3, inf }
0x1925   : > { %1012 = vmin.xlane.f32.xlu1 %v1011_v4  ;;  %v1016_v11 = vshll.u32 %v1015_v10, 16 }
0x1954   : > { %v977_v6 = vpop.xlane.xlu0 %976 }
0x1955   : > { %vm978_vm4 = vcmp.eq.f32.partialorder %v975_v62, %v977_v6  ;;  %v983_v28 = vcvt.f32.s32 %v977_v6 }
0x1956   : > { %v979_v8 = vsel %vm978_vm4, %v974_v7, inf }
0x1957   : > { %980 = vmin.xlane.f32.xlu0 %v979_v8  ;;  %v984_v19 = vshll.u32 %v983_v28, 16 }
0x19ae   : > { %v1013_v13 = vpop.xlane.xlu1 %1012 }
0x19af   : > { %v1014_v14 = vcvt.f32.s32 %v1013_v13 }
0x19b1   : > { %v1017_v15 = vadd.s32 %v1016_v11, %v1014_v14 }
0x19b3   : > { %vm1018_vm12 = vcmp.eq.s32.totalorder %v1794_v1, %v1017_v15 }
0x19b4   : > { %vm2159_vm5 = vmand %vm1018_vm12, %vm1019_vm8 }
0x19b5   : > { %v1023_v17 = vsel %vm2159_vm5, %v968_v58, %v2131_v24 }
0x19b6   : > { %1024 = vst.msk [vmem:[%s1802_s10] sm:$0x1] %vm571_vm0, %v1023_v17 }
0x19bd   : > { %v2169_v18 = vld [vmem:[%s1802_s10] sm:$0x1] }
0x19be   : > { %v1069_v12 = vsel %vm571_vm0, %v2169_v18, inf }
0x19bf   : > { %1070 = vmin.xlane.f32.xlu1 %v1069_v12 }
0x19e0   : > { %v981_v63 = vpop.xlane.xlu0 %980 }
0x19e1   : > { %v982_v21 = vcvt.f32.s32 %v981_v63 }
0x19e3   : > { %v985_v20 = vadd.s32 %v984_v19, %v982_v21 }
0x19e5   : > { %v986_v22 = vsel %vm312_vm1, %v985_v20, 2147483647 }
0x19e6   : > { %v987_v23 = vrot.slane %v986_v22, 4 }
0x19e8   : > { %vm988_vm6 = vcmp.lt.s32.totalorder %v986_v22, %v987_v23 }
0x19e9   : > { %v989_v24 = vsel %vm988_vm6, %v986_v22, %v987_v23 }
0x19ea   : > { %v990_v25 = vrot.slane %v989_v24, 2 }
0x19ec   : > { %vm991_vm9 = vcmp.lt.s32.totalorder %v989_v24, %v990_v25 }
0x19ed   : > { %v992_v26 = vsel %vm991_vm9, %v989_v24, %v990_v25 }
0x19ee   : > { %v993_v29 = vrot.slane %v992_v26, 1 }
0x19f0   : > { %vm994_vm10 = vcmp.lt.s32.totalorder %v992_v26, %v993_v29 }
0x19f1   : > { %v995_v27 = vsel %vm994_vm10, %v992_v26, %v993_v29 }
0x19f2   : > { %vm1027_vm11 = vcmp.eq.s32.totalorder %v1941_v52, %v995_v27  ;;  %v1025_v31 = vsel %vm2159_vm5, %v995_v27, %v997_v30 }
0x19f3   : > { %vm1028_vm13 = vmand %vm969_vm2, %vm1027_vm11  ;;  %1026 = vst.msk [vmem:[%s1810_s18] sm:$0x1] %vm571_vm0, %v1025_v31 }
0x19f4   : > { %v1029_v32 = vsel %vm1028_vm13, -inf, %v2145_v41 }
0x19f5   : > { %v1030_v33 = vsel %vm531_vm7, %v1029_v32, -inf }
0x19f6   : > { %1031 = vmax.xlane.f32.xlu0 %v1030_v33 }
0x19fa   : > { %v1068_v28 = vld [vmem:[%s1810_s18] sm:$0x1] }
0x1a48   : > { %v1071_v34 = vpop.xlane.xlu1 %1070 }
0x1a49   : > { %vm1072_vm14 = vcmp.eq.f32.partialorder %v2169_v18, %v1071_v34 }
0x1a4a   : > { %v1073_v35 = vsel %vm1072_vm14, %v1794_v1, 1073741824 }
0x1a4b   : > { %v1074_v36 = vsel %vm571_vm0, %v1073_v35, 2147483647 }
0x1a4c   : > { %v1076_v37 = vshra.s32 %v1074_v36, 16  ;;  %v1075_v53 = vand.u32 65535, %v1074_v36 }
0x1a4e   : > { %v1078_v38 = vcvt.s32.f32 %v1076_v37  ;;  %v1077_v56 = vcvt.s32.f32 %v1075_v53 }
0x1a50   : > { %1079 = vmin.xlane.f32.xlu1 %v1078_v38 }
0x1a7f   : > { %v1032_v39 = vpop.xlane.xlu0 %1031 }
0x1a80   : > { %v1033_v40 = vsel %vm312_vm1, %v1032_v39, -inf }
0x1a81   : > { %v1034_v42 = vrot.slane %v1033_v40, 4 }
0x1a83   : > { %v1035_v43 = vmax.f32 %v1033_v40, %v1034_v42 }
0x1a85   : > { %v1036_v44 = vrot.slane %v1035_v43, 2 }
0x1a87   : > { %v1037_v41 = vmax.f32 %v1035_v43, %v1036_v44 }
0x1a89   : > { %v1038_v45 = vrot.slane %v1037_v41, 1 }
0x1a8b   : > { %v1039_v47 = vmax.f32 %v1037_v41, %v1038_v45 }
0x1a8d   : > { %vm1040_vm15 = vcmp.eq.f32.partialorder %v1029_v32, %v1039_v47 }
0x1a8e   : > { %v1041_v48 = vsel %vm1040_vm15, %v1941_v52, 1073741824 }
0x1a8f   : > { %v1042_v50 = vsel %vm531_vm7, %v1041_v48, 2147483647  ;;  %vm1090_vm7 = vcmp.gt.f32.partialorder %v1039_v47, %v1071_v34 }
0x1a90   : > { %v1044_v51 = vshra.s32 %v1042_v50, 16  ;;  %v1043_v58 = vand.u32 65535, %v1042_v50 }
0x1a92   : > { %v1046_v2 = vcvt.s32.f32 %v1044_v51  ;;  %v1045_v60 = vcvt.s32.f32 %v1043_v58 }
0x1a94   : > { %1047 = vmin.xlane.f32.xlu0 %v1046_v2 }
0x1ad9   : > { %v1080_v54 = vpop.xlane.xlu1 %1079 }
0x1ada   : > { %vm1081_vm2 = vcmp.eq.f32.partialorder %v1078_v38, %v1080_v54  ;;  %v1086_v52 = vcvt.f32.s32 %v1080_v54 }
0x1adb   : > { %v1082_v57 = vsel %vm1081_vm2, %v1077_v56, inf }
0x1adc   : > { %1083 = vmin.xlane.f32.xlu1 %v1082_v57  ;;  %v1087_v55 = vshll.u32 %v1086_v52, 16 }
0x1b1d   : > { %v1048_v59 = vpop.xlane.xlu0 %1047 }
0x1b1e   : > { %vm1049_vm3 = vcmp.eq.f32.partialorder %v1046_v2, %v1048_v59  ;;  %v1054_v6 = vcvt.f32.s32 %v1048_v59 }
0x1b1f   : > { %v1050_v61 = vsel %vm1049_vm3, %v1045_v60, inf }
0x1b20   : > { %1051 = vmin.xlane.f32.xlu0 %v1050_v61  ;;  %v1055_v8 = vshll.u32 %v1054_v6, 16 }
0x1b65   : > { %v1084_v62 = vpop.xlane.xlu1 %1083 }
0x1b66   : > { %v1085_v0 = vcvt.f32.s32 %v1084_v62 }
0x1b68   : > { %v1088_v3 = vadd.s32 %v1087_v55, %v1085_v0 }
0x1b6a   : > { %vm1089_vm4 = vcmp.eq.s32.totalorder %v1794_v1, %v1088_v3 }
0x1b6b   : > { %vm2193_vm8 = vmand %vm1089_vm4, %vm1090_vm7 }
0x1b6c   : > { %v1094_v5 = vsel %vm2193_vm8, %v1039_v47, %v2169_v18 }
0x1b6d   : > { %1095 = vst.msk [vmem:[%s1802_s10] sm:$0x1] %vm571_vm0, %v1094_v5 }
0x1ba9   : > { %v1052_v7 = vpop.xlane.xlu0 %1051 }
0x1baa   : > { %v1053_v10 = vcvt.f32.s32 %v1052_v7 }
0x1bac   : > { %v1056_v13 = vadd.s32 %v1055_v8, %v1053_v10 }
0x1bae   : > { %v1057_v11 = vsel %vm312_vm1, %v1056_v13, 2147483647 }
0x1baf   : > { %v1058_v14 = vrot.slane %v1057_v11, 4 }
0x1bb1   : > { %vm1059_vm12 = vcmp.lt.s32.totalorder %v1057_v11, %v1058_v14 }
0x1bb2   : > { %v1060_v15 = vsel %vm1059_vm12, %v1057_v11, %v1058_v14 }
0x1bb3   : > { %v1061_v16 = vrot.slane %v1060_v15, 2 }
0x1bb5   : > { %vm1062_vm5 = vcmp.lt.s32.totalorder %v1060_v15, %v1061_v16 }
0x1bb6   : > { %v1063_v17 = vsel %vm1062_vm5, %v1060_v15, %v1061_v16 }
0x1bb7   : > { %v1064_v12 = vrot.slane %v1063_v17, 1 }
0x1bb8   : > { %1102 = sbr.rel (%p1594_p8) target bundleno = 10619 (0x297b), region = 36 }
0x1bb9   : > { %vm1065_vm6 = vcmp.lt.s32.totalorder %v1063_v17, %v1064_v12 }
0x1bba   : > { %v1066_v18 = vsel %vm1065_vm6, %v1063_v17, %v1064_v12 }
0x1bbb   : > { %v1096_v63 = vsel %vm2193_vm8, %v1066_v18, %v1068_v28 }
0x1bbc   : > { %1097 = vst.msk [vmem:[%s1810_s18] sm:$0x1] %vm571_vm0, %v1096_v63 }
0x1bbd   : > { %v1104_v19 = vld [vmem:[%s1818_s8] sm:$0x1]  ;;  %v1714_v20 = vmov 0   ;;  %v2217_v29 = vsub.f32 %v1918_v46, %v1832_v9  ;;  %v1715_v44 = vmov 1   ;;  %v1716_v13 = vmov 2  }
0x1bbe   : > { %v1106_v21 = vsel %vm571_vm0, %v1104_v19, inf  ;;  %1650 = vset.pattern.permute.xlu1 %v1714_v20  ;;  %1651 = vset.pattern.permute.xlu0 %v1714_v20 }
0x1bbf   : > { %1107 = vmin.xlane.f32.xlu0 %v1106_v21 }
0x1c48   : > { %v1108_v22 = vpop.xlane.xlu0 %1107 }
0x1c49   : > { %vm1109_vm1 = vcmp.eq.f32.partialorder %v1104_v19, %v1108_v22  ;;  %vm1127_vm10 = vcmp.gt.f32.partialorder %v2217_v29, %v1108_v22 }
0x1c4a   : > { %v1110_v23 = vsel %vm1109_vm1, %v1794_v1, 1073741824  ;;  %v1128_v33 = vsel %vm1127_vm10, 1, %v1714_v20 }
0x1c4b   : > { %v1111_v24 = vsel %vm571_vm0, %v1110_v23, 2147483647 }
0x1c4c   : > { %v1113_v25 = vshra.s32 %v1111_v24, 16  ;;  %v1112_v27 = vand.u32 65535, %v1111_v24 }
0x1c4e   : > { %v1115_v26 = vcvt.s32.f32 %v1113_v25  ;;  %v1114_v31 = vcvt.s32.f32 %v1112_v27 }
0x1c50   : > { %1116 = vmin.xlane.f32.xlu0 %v1115_v26 }
0x1c66   : > { %1136 = vperm.xlu0 %1651, %v2217_v29  }
0x1c6a   : > { %1653 = vset.pattern.permute.xlu0 %v1716_v13 }
0x1cd9   : > { %v1117_v30 = vpop.xlane.xlu0 %1116 }
0x1cda   : > { %vm1118_vm9 = vcmp.eq.f32.partialorder %v1115_v26, %v1117_v30  ;;  %v1123_v34 = vcvt.f32.s32 %v1117_v30 }
0x1cdb   : > { %v1119_v32 = vsel %vm1118_vm9, %v1114_v31, inf }
0x1cdc   : > { %1120 = vmin.xlane.f32.xlu1 %v1119_v32  ;;  %v1124_v36 = vshll.u32 %v1123_v34, 16  ;;  %v1717_v34 = vmov 3  }
0x1ce1   : > { %v1137_v38 = vpop.permute.xlu0 %1136 }
0x1ced   : > { %1130 = vperm.xlu1 %1650, %v1128_v33  }
0x1cf1   : > { %1652 = vset.pattern.permute.xlu1 %v1715_v44 }
0x1d65   : > { %v1121_v35 = vpop.xlane.xlu1 %1120 }
0x1d66   : > { %v1122_v9 = vcvt.f32.s32 %v1121_v35 }
0x1d68   : > { %v1125_v46 = vadd.s32 %v1124_v36, %v1122_v9 }
0x1d69   : > { %v1131_v37 = vpop.permute.xlu1 %1130 }
0x1d6a   : > { %vm1126_vm11 = vcmp.eq.s32.totalorder %v1794_v1, %v1125_v46  ;;  %vm1132_vm13 = vcmp.eq.s32.totalorder %v1131_v37, 1 }
0x1d6b   : > { %vm2223_vm14 = vmand %vm1126_vm11, %vm1132_vm13 }
0x1d6c   : > { %v1139_v40 = vsel %vm2223_vm14, %v1137_v38, %v1104_v19 }
0x1d6d   : > { %1140 = vst.msk [vmem:[%s1818_s8] sm:$0x1] %vm571_vm0, %v1139_v40 }
0x1d74   : > { %v1146_v42 = vld [vmem:[%s1818_s8] sm:$0x1] }
0x1d75   : > { %v1148_v43 = vsel %vm571_vm0, %v1146_v42, inf }
0x1d76   : > { %1149 = vmin.xlane.f32.xlu1 %v1148_v43 }
0x1dff   : > { %v1150_v41 = vpop.xlane.xlu1 %1149 }
0x1e00   : > { %vm1151_vm15 = vcmp.eq.f32.partialorder %v1146_v42, %v1150_v41  ;;  %vm1169_vm2 = vcmp.gt.f32.partialorder %v2217_v29, %v1150_v41 }
0x1e01   : > { %v1152_v45 = vsel %vm1151_vm15, %v1794_v1, 1073741824  ;;  %v1170_v47 = vsel %vm1169_vm2, 1, %v1714_v20 }
0x1e02   : > { %v1153_v48 = vsel %vm571_vm0, %v1152_v45, 2147483647  ;;  %1172 = vperm.xlu1 %1652, %v1170_v47  }
0x1e03   : > { %v1155_v50 = vshra.s32 %v1153_v48, 16  ;;  %v1154_v2 = vand.u32 65535, %v1153_v48 }
0x1e05   : > { %v1157_v51 = vcvt.s32.f32 %v1155_v50  ;;  %v1156_v54 = vcvt.s32.f32 %v1154_v2 }
0x1e07   : > { %1158 = vmin.xlane.f32.xlu0 %v1157_v51 }
0x1e7d   : > { %v1173_v57 = vpop.permute.xlu1 %1172 }
0x1e7e   : > { %vm1174_vm7 = vcmp.eq.s32.totalorder %v1173_v57, 1 }
0x1e90   : > { %v1159_v53 = vpop.xlane.xlu0 %1158 }
0x1e91   : > { %vm1160_vm3 = vcmp.eq.f32.partialorder %v1157_v51, %v1159_v53  ;;  %v1165_v58 = vcvt.f32.s32 %v1159_v53 }
0x1e92   : > { %v1161_v56 = vsel %vm1160_vm3, %v1156_v54, inf }
0x1e93   : > { %1162 = vmin.xlane.f32.xlu1 %v1161_v56  ;;  %v1166_v60 = vshll.u32 %v1165_v58, 16 }
0x1ea4   : > { %1177 = vperm.xlu1 %1652, %v2217_v29  }
0x1ea8   : > { %1654 = vset.pattern.permute.xlu1 %v1716_v13 }
0x1f1c   : > { %v1163_v59 = vpop.xlane.xlu1 %1162 }
0x1f1d   : > { %v1164_v61 = vcvt.f32.s32 %v1163_v59  ;;  %v1718_v59 = vmov 4  }
0x1f1f   : > { %v1167_v52 = vadd.s32 %v1166_v60, %v1164_v61 }
0x1f20   : > { %v1178_v55 = vpop.permute.xlu1 %1177 }
0x1f21   : > { %vm1168_vm4 = vcmp.eq.s32.totalorder %v1794_v1, %v1167_v52 }
0x1f22   : > { %vm2240_vm8 = vmand %vm1168_vm4, %vm1174_vm7 }
0x1f23   : > { %v1180_v0 = vsel %vm2240_vm8, %v1178_v55, %v1146_v42 }
0x1f24   : > { %1181 = vst.msk [vmem:[%s1818_s8] sm:$0x1] %vm571_vm0, %v1180_v0 }
0x1f2b   : > { %v1187_v3 = vld [vmem:[%s1818_s8] sm:$0x1] }
0x1f2c   : > { %v1189_v4 = vsel %vm571_vm0, %v1187_v3, inf }
0x1f2d   : > { %1190 = vmin.xlane.f32.xlu1 %v1189_v4 }
0x1f3e   : > { %1218 = vperm.xlu1 %1654, %v2217_v29  }
0x1f42   : > { %1656 = vset.pattern.permute.xlu1 %v1717_v34 }
0x1fb6   : > { %v1191_v5 = vpop.xlane.xlu1 %1190 }
0x1fb7   : > { %vm1192_vm12 = vcmp.eq.f32.partialorder %v1187_v3, %v1191_v5  ;;  %vm1210_vm6 = vcmp.gt.f32.partialorder %v2217_v29, %v1191_v5 }
0x1fb8   : > { %v1193_v6 = vsel %vm1192_vm12, %v1794_v1, 1073741824  ;;  %v1211_v17 = vsel %vm1210_vm6, 1, %v1714_v20 }
0x1fb9   : > { %v1194_v7 = vsel %vm571_vm0, %v1193_v6, 2147483647 }
0x1fba   : > { %v1196_v8 = vshra.s32 %v1194_v7, 16  ;;  %v1195_v11 = vand.u32 65535, %v1194_v7  ;;  %v1219_v22 = vpop.permute.xlu1 %1218 }
0x1fbc   : > { %v1198_v10 = vcvt.s32.f32 %v1196_v8  ;;  %v1197_v15 = vcvt.s32.f32 %v1195_v11 }
0x1fbe   : > { %1199 = vmin.xlane.f32.xlu0 %v1198_v10 }
0x2047   : > { %v1200_v14 = vpop.xlane.xlu0 %1199 }
0x2048   : > { %vm1201_vm5 = vcmp.eq.f32.partialorder %v1198_v10, %v1200_v14  ;;  %v1206_v12 = vcvt.f32.s32 %v1200_v14 }
0x2049   : > { %v1202_v16 = vsel %vm1201_vm5, %v1197_v15, inf }
0x204a   : > { %1203 = vmin.xlane.f32.xlu0 %v1202_v16  ;;  %v1207_v63 = vshll.u32 %v1206_v12, 16 }
0x2060   : > { %1213 = vperm.xlu0 %1653, %v1211_v17   ;;  %v1719_v17 = vmov 5  }
0x2064   : > { %1655 = vset.pattern.permute.xlu0 %v1717_v34 }
0x20d3   : > { %v1204_v18 = vpop.xlane.xlu0 %1203 }
0x20d4   : > { %v1205_v28 = vcvt.f32.s32 %v1204_v18 }
0x20d6   : > { %v1208_v19 = vadd.s32 %v1207_v63, %v1205_v28 }
0x20d8   : > { %vm1209_vm1 = vcmp.eq.s32.totalorder %v1794_v1, %v1208_v19 }
0x20db   : > { %v1214_v21 = vpop.permute.xlu0 %1213 }
0x20dc   : > { %vm1215_vm9 = vcmp.eq.s32.totalorder %v1214_v21, 1 }
0x20dd   : > { %vm2258_vm10 = vmand %vm1209_vm1, %vm1215_vm9 }
0x20de   : > { %v1221_v24 = vsel %vm2258_vm10, %v1219_v22, %v1187_v3 }
0x20df   : > { %1222 = vst.msk [vmem:[%s1818_s8] sm:$0x1] %vm571_vm0, %v1221_v24 }
0x20e6   : > { %v1228_v25 = vld [vmem:[%s1818_s8] sm:$0x1] }
0x20e7   : > { %v1230_v26 = vsel %vm571_vm0, %v1228_v25, inf }
0x20e8   : > { %1231 = vmin.xlane.f32.xlu0 %v1230_v26 }
0x2171   : > { %v1232_v27 = vpop.xlane.xlu0 %1231 }
0x2172   : > { %vm1233_vm11 = vcmp.eq.f32.partialorder %v1228_v25, %v1232_v27  ;;  %vm1251_vm15 = vcmp.gt.f32.partialorder %v2217_v29, %v1232_v27 }
0x2173   : > { %v1234_v30 = vsel %vm1233_vm11, %v1794_v1, 1073741824  ;;  %v1252_v37 = vsel %vm1251_vm15, 1, %v1714_v20 }
0x2174   : > { %v1235_v31 = vsel %vm571_vm0, %v1234_v30, 2147483647 }
0x2175   : > { %v1237_v32 = vshra.s32 %v1235_v31, 16  ;;  %v1236_v35 = vand.u32 65535, %v1235_v31 }
0x2177   : > { %v1239_v33 = vcvt.s32.f32 %v1237_v32  ;;  %v1238_v9 = vcvt.s32.f32 %v1236_v35 }
0x2179   : > { %1240 = vmin.xlane.f32.xlu1 %v1239_v33 }
0x218a   : > { %1259 = vperm.xlu1 %1656, %v2217_v29  }
0x218e   : > { %1657 = vset.pattern.permute.xlu1 %v1718_v59 }
0x2202   : > { %v1241_v36 = vpop.xlane.xlu1 %1240 }
0x2203   : > { %vm1242_vm13 = vcmp.eq.f32.partialorder %v1239_v33, %v1241_v36  ;;  %v1247_v38 = vcvt.f32.s32 %v1241_v36 }
0x2204   : > { %v1243_v46 = vsel %vm1242_vm13, %v1238_v9, inf }
0x2205   : > { %1244 = vmin.xlane.f32.xlu0 %v1243_v46  ;;  %v1248_v43 = vshll.u32 %v1247_v38, 16 }
0x2206   : > { %v1260_v47 = vpop.permute.xlu1 %1259 }
0x221b   : > { %1254 = vperm.xlu0 %1655, %v1252_v37  }
0x221f   : > { %1658 = vset.pattern.permute.xlu0 %v1718_v59 }
0x228e   : > { %v1245_v40 = vpop.xlane.xlu0 %1244 }
0x228f   : > { %v1246_v42 = vcvt.f32.s32 %v1245_v40 }
0x2291   : > { %v1249_v41 = vadd.s32 %v1248_v43, %v1246_v42 }
0x2293   : > { %vm1250_vm2 = vcmp.eq.s32.totalorder %v1794_v1, %v1249_v41 }
0x2296   : > { %v1255_v45 = vpop.permute.xlu0 %1254 }
0x2297   : > { %vm1256_vm3 = vcmp.eq.s32.totalorder %v1255_v45, 1 }
0x2298   : > { %vm2276_vm7 = vmand %vm1250_vm2, %vm1256_vm3 }
0x2299   : > { %v1262_v50 = vsel %vm2276_vm7, %v1260_v47, %v1228_v25  ;;  %v1720_v47 = vmov 6  }
0x229a   : > { %1263 = vst.msk [vmem:[%s1818_s8] sm:$0x1] %vm571_vm0, %v1262_v50 }
0x22a1   : > { %v1269_v51 = vld [vmem:[%s1818_s8] sm:$0x1] }
0x22a2   : > { %v1271_v2 = vsel %vm571_vm0, %v1269_v51, inf }
0x22a3   : > { %1272 = vmin.xlane.f32.xlu1 %v1271_v2 }
0x232c   : > { %v1273_v53 = vpop.xlane.xlu1 %1272 }
0x232d   : > { %vm1274_vm4 = vcmp.eq.f32.partialorder %v1269_v51, %v1273_v53  ;;  %vm1292_vm5 = vcmp.gt.f32.partialorder %v2217_v29, %v1273_v53 }
0x232e   : > { %v1275_v54 = vsel %vm1274_vm4, %v1794_v1, 1073741824  ;;  %v1293_v0 = vsel %vm1292_vm5, 1, %v1714_v20 }
0x232f   : > { %v1276_v56 = vsel %vm571_vm0, %v1275_v54, 2147483647 }
0x2330   : > { %v1278_v57 = vshra.s32 %v1276_v56, 16  ;;  %v1277_v60 = vand.u32 65535, %v1276_v56 }
0x2332   : > { %v1280_v58 = vcvt.s32.f32 %v1278_v57  ;;  %v1279_v52 = vcvt.s32.f32 %v1277_v60 }
0x2334   : > { %1281 = vmin.xlane.f32.xlu0 %v1280_v58 }
0x234a   : > { %1300 = vperm.xlu0 %1658, %v2217_v29  }
0x234e   : > { %1659 = vset.pattern.permute.xlu0 %v1719_v17 }
0x23bd   : > { %v1282_v61 = vpop.xlane.xlu0 %1281 }
0x23be   : > { %vm1283_vm12 = vcmp.eq.f32.partialorder %v1280_v58, %v1282_v61  ;;  %v1288_v3 = vcvt.f32.s32 %v1282_v61 }
0x23bf   : > { %v1284_v55 = vsel %vm1283_vm12, %v1279_v52, inf }
0x23c0   : > { %1285 = vmin.xlane.f32.xlu1 %v1284_v55  ;;  %v1289_v5 = vshll.u32 %v1288_v3, 16 }
0x23c5   : > { %v1301_v10 = vpop.permute.xlu0 %1300 }
0x23d1   : > { %1295 = vperm.xlu1 %1657, %v1293_v0  }
0x23d5   : > { %1660 = vset.pattern.permute.xlu1 %v1719_v17 }
0x2449   : > { %v1286_v4 = vpop.xlane.xlu1 %1285 }
0x244a   : > { %v1287_v6 = vcvt.f32.s32 %v1286_v4 }
0x244c   : > { %v1290_v7 = vadd.s32 %v1289_v5, %v1287_v6  ;;  %v1721_v5 = vmov 7  }
0x244d   : > { %v1296_v8 = vpop.permute.xlu1 %1295 }
0x244e   : > { %vm1291_vm6 = vcmp.eq.s32.totalorder %v1794_v1, %v1290_v7  ;;  %vm1297_vm1 = vcmp.eq.s32.totalorder %v1296_v8, 1  ;;  %v1105_v7 = vld [vmem:[%s1823_s12] sm:$0x1] }
0x244f   : > { %vm2294_vm9 = vmand %vm1291_vm6, %vm1297_vm1 }
0x2450   : > { %v1303_v14 = vsel %vm2294_vm9, %v1301_v10, %v1269_v51 }
0x2451   : > { %1304 = vst.msk [vmem:[%s1818_s8] sm:$0x1] %vm571_vm0, %v1303_v14 }
0x2458   : > { %v1310_v15 = vld [vmem:[%s1818_s8] sm:$0x1] }
0x2459   : > { %v1312_v16 = vsel %vm571_vm0, %v1310_v15, inf }
0x245a   : > { %1313 = vmin.xlane.f32.xlu1 %v1312_v16 }
0x24e3   : > { %v1314_v12 = vpop.xlane.xlu1 %1313 }
0x24e4   : > { %vm1315_vm11 = vcmp.eq.f32.partialorder %v1310_v15, %v1314_v12  ;;  %vm1333_vm13 = vcmp.gt.f32.partialorder %v2217_v29, %v1314_v12 }
0x24e5   : > { %v1316_v18 = vsel %vm1315_vm11, %v1794_v1, 1073741824  ;;  %v1334_v28 = vsel %vm1333_vm13, 1, %v1714_v20 }
0x24e6   : > { %v1317_v63 = vsel %vm571_vm0, %v1316_v18, 2147483647  ;;  %1336 = vperm.xlu0 %1659, %v1334_v28  }
0x24e7   : > { %v1319_v19 = vshra.s32 %v1317_v63, 16  ;;  %v1318_v22 = vand.u32 65535, %v1317_v63 }
0x24e9   : > { %v1321_v21 = vcvt.s32.f32 %v1319_v19  ;;  %v1320_v25 = vcvt.s32.f32 %v1318_v22 }
0x24ea   : > { %1661 = vset.pattern.permute.xlu0 %v1720_v47 }
0x24eb   : > { %1322 = vmin.xlane.f32.xlu1 %v1321_v21 }
0x2561   : > { %v1337_v33 = vpop.permute.xlu0 %1336 }
0x2562   : > { %vm1338_vm2 = vcmp.eq.s32.totalorder %v1337_v33, 1 }
0x2574   : > { %v1323_v24 = vpop.xlane.xlu1 %1322 }
0x2575   : > { %vm1324_vm15 = vcmp.eq.f32.partialorder %v1321_v21, %v1323_v24  ;;  %v1329_v27 = vcvt.f32.s32 %v1323_v24 }
0x2576   : > { %v1325_v26 = vsel %vm1324_vm15, %v1320_v25, inf }
0x2577   : > { %1326 = vmin.xlane.f32.xlu1 %v1325_v26  ;;  %v1330_v31 = vshll.u32 %v1329_v27, 16 }
0x2588   : > { %1341 = vperm.xlu1 %1660, %v2217_v29  }
0x258c   : > { %1662 = vset.pattern.permute.xlu1 %v1720_v47 }
0x2600   : > { %v1327_v30 = vpop.xlane.xlu1 %1326 }
0x2601   : > { %v1328_v32 = vcvt.f32.s32 %v1327_v30 }
0x2603   : > { %v1331_v35 = vadd.s32 %v1330_v31, %v1328_v32 }
0x2604   : > { %v1342_v36 = vpop.permute.xlu1 %1341 }
0x2605   : > { %vm1332_vm3 = vcmp.eq.s32.totalorder %v1794_v1, %v1331_v35 }
0x2606   : > { %vm2312_vm4 = vmand %vm1332_vm3, %vm1338_vm2 }
0x2607   : > { %v1344_v46 = vsel %vm2312_vm4, %v1342_v36, %v1310_v15 }
0x2608   : > { %1345 = vst.msk [vmem:[%s1818_s8] sm:$0x1] %vm571_vm0, %v1344_v46 }
0x260f   : > { %v1351_v37 = vld [vmem:[%s1818_s8] sm:$0x1] }
0x2610   : > { %v1353_v38 = vsel %vm571_vm0, %v1351_v37, inf }
0x2611   : > { %1354 = vmin.xlane.f32.xlu0 %v1353_v38 }
0x269a   : > { %v1355_v40 = vpop.xlane.xlu0 %1354 }
0x269b   : > { %vm1356_vm12 = vcmp.eq.f32.partialorder %v1351_v37, %v1355_v40  ;;  %vm1374_vm6 = vcmp.gt.f32.partialorder %v2217_v29, %v1355_v40 }
0x269c   : > { %v1357_v42 = vsel %vm1356_vm12, %v1794_v1, 1073741824  ;;  %v1375_v54 = vsel %vm1374_vm6, 1, %v1714_v20 }
0x269d   : > { %v1358_v43 = vsel %vm571_vm0, %v1357_v42, 2147483647 }
0x269e   : > { %v1360_v41 = vshra.s32 %v1358_v43, 16  ;;  %v1359_v50 = vand.u32 65535, %v1358_v43 }
0x26a0   : > { %v1362_v45 = vcvt.s32.f32 %v1360_v41  ;;  %v1361_v2 = vcvt.s32.f32 %v1359_v50 }
0x26a2   : > { %1363 = vmin.xlane.f32.xlu1 %v1362_v45 }
0x26b3   : > { %1382 = vperm.xlu1 %1662, %v2217_v29  }
0x26b7   : > { %1663 = vset.pattern.permute.xlu1 %v1714_v20 }
0x272b   : > { %v1364_v51 = vpop.xlane.xlu1 %1363 }
0x272c   : > { %vm1365_vm5 = vcmp.eq.f32.partialorder %v1362_v45, %v1364_v51  ;;  %v1370_v56 = vcvt.f32.s32 %v1364_v51 }
0x272d   : > { %v1366_v53 = vsel %vm1365_vm5, %v1361_v2, inf }
0x272e   : > { %1367 = vmin.xlane.f32.xlu0 %v1366_v53  ;;  %v1371_v60 = vshll.u32 %v1370_v56, 16 }
0x272f   : > { %v1383_v55 = vpop.permute.xlu1 %1382 }
0x2744   : > { %1377 = vperm.xlu0 %1661, %v1375_v54  }
0x2748   : > { %1664 = vset.pattern.permute.xlu0 %v1715_v44 }
0x27b7   : > { %v1368_v57 = vpop.xlane.xlu0 %1367 }
0x27b8   : > { %v1369_v58 = vcvt.f32.s32 %v1368_v57 }
0x27ba   : > { %v1372_v61 = vadd.s32 %v1371_v60, %v1369_v58 }
0x27bc   : > { %vm1373_vm1 = vcmp.eq.s32.totalorder %v1794_v1, %v1372_v61 }
0x27bf   : > { %v1378_v52 = vpop.permute.xlu0 %1377 }
0x27c0   : > { %vm1379_vm11 = vcmp.eq.s32.totalorder %v1378_v52, 1 }
0x27c1   : > { %vm2330_vm13 = vmand %vm1373_vm1, %vm1379_vm11 }
0x27c2   : > { %v1385_v3 = vsel %vm2330_vm13, %v1383_v55, %v1351_v37 }
0x27c3   : > { %1386 = vst.msk [vmem:[%s1818_s8] sm:$0x1] %vm571_vm0, %v1385_v3 }
0x27ca   : > { %v2339_v44 = vld [vmem:[%s1818_s8] sm:$0x1] }
0x27cb   : > { %v1394_v4 = vsel %vm571_vm0, %v2339_v44, inf }
0x27cc   : > { %1395 = vmin.xlane.f32.xlu1 %v1394_v4 }
0x27dd   : > { %1142 = vperm.xlu1 %1663, %v1936_v49  }
0x27e1   : > { %1665 = vset.pattern.permute.xlu1 %v1716_v13 }
0x27e2   : > { %1224 = vperm.xlu1 %1665, %v1936_v49  }
0x27e6   : > { %1666 = vset.pattern.permute.xlu1 %v1717_v34 }
0x27e7   : > { %1265 = vperm.xlu1 %1666, %v1936_v49  }
0x27eb   : > { %1667 = vset.pattern.permute.xlu1 %v1718_v59 }
0x27ec   : > { %1306 = vperm.xlu1 %1667, %v1936_v49  }
0x27f0   : > { %1668 = vset.pattern.permute.xlu1 %v1719_v17 }
0x27f1   : > { %1347 = vperm.xlu1 %1668, %v1936_v49  }
0x27f5   : > { %1671 = vset.pattern.permute.xlu1 %v1721_v5 }
0x2855   : > { %v1396_v6 = vpop.xlane.xlu1 %1395 }
0x2856   : > { %vm1397_vm15 = vcmp.eq.f32.partialorder %v2339_v44, %v1396_v6  ;;  %vm1415_vm2 = vcmp.gt.f32.partialorder %v2217_v29, %v1396_v6 }
0x2857   : > { %v1398_v13 = vsel %vm1397_vm15, %v1794_v1, 1073741824  ;;  %v1416_v15 = vsel %vm1415_vm2, 1, %v1714_v20 }
0x2858   : > { %v1399_v34 = vsel %vm571_vm0, %v1398_v13, 2147483647 }
0x2859   : > { %v1143_v8 = vpop.permute.xlu1 %1142  ;;  %v1401_v10 = vshra.s32 %v1399_v34, 16  ;;  %v1400_v39 = vand.u32 65535, %v1399_v34 }
0x285a   : > { %v1144_v59 = vsel %vm2223_vm14, %v1143_v8, %v1105_v7 }
0x285b   : > { %1145 = vst.msk [vmem:[%s1823_s12] sm:$0x1] %vm571_vm0, %v1144_v59  ;;  %v1403_v14 = vcvt.s32.f32 %v1401_v10  ;;  %v1402_v17 = vcvt.s32.f32 %v1400_v39 }
0x285d   : > { %1404 = vmin.xlane.f32.xlu0 %v1403_v14  ;;  %v1225_v20 = vpop.permute.xlu1 %1224 }
0x2862   : > { %v1147_v28 = vld [vmem:[%s1823_s12] sm:$0x1]  ;;  %v1266_v21 = vpop.permute.xlu1 %1265 }
0x2867   : > { %v1307_v24 = vpop.permute.xlu1 %1306 }
0x286c   : > { %v1348_v23 = vpop.permute.xlu1 %1347 }
0x2873   : > { %1183 = vperm.xlu0 %1664, %v1936_v49  }
0x2877   : > { %1669 = vset.pattern.permute.xlu0 %v1720_v47 }
0x2878   : > { %1388 = vperm.xlu0 %1669, %v1936_v49  }
0x287c   : > { %1670 = vset.pattern.permute.xlu0 %v1721_v5 }
0x287d   : > { %1418 = vperm.xlu0 %1670, %v1416_v15  }
0x2881   : > { %1429 = vperm.xlu0 %1670, %v1936_v49  }
0x28e6   : > { %v1405_v16 = vpop.xlane.xlu0 %1404 }
0x28e7   : > { %vm1406_vm14 = vcmp.eq.f32.partialorder %v1403_v14, %v1405_v16  ;;  %v1411_v11 = vcvt.f32.s32 %v1405_v16 }
0x28e8   : > { %v1407_v12 = vsel %vm1406_vm14, %v1402_v17, inf }
0x28e9   : > { %1408 = vmin.xlane.f32.xlu1 %v1407_v12  ;;  %v1412_v33 = vshll.u32 %v1411_v11, 16 }
0x28ee   : > { %v1184_v18 = vpop.permute.xlu0 %1183 }
0x28ef   : > { %v1185_v63 = vsel %vm2240_vm8, %v1184_v18, %v1147_v28 }
0x28f0   : > { %1186 = vst.msk [vmem:[%s1823_s12] sm:$0x1] %vm571_vm0, %v1185_v63 }
0x28f3   : > { %v1389_v30 = vpop.permute.xlu0 %1388 }
0x28f7   : > { %v1188_v49 = vld [vmem:[%s1823_s12] sm:$0x1] }
0x28f8   : > { %v1226_v19 = vsel %vm2258_vm10, %v1225_v20, %v1188_v49  ;;  %v1419_v36 = vpop.permute.xlu0 %1418 }
0x28f9   : > { %1227 = vst.msk [vmem:[%s1823_s12] sm:$0x1] %vm571_vm0, %v1226_v19  ;;  %vm1420_vm8 = vcmp.eq.s32.totalorder %v1419_v36, 1 }
0x28fa   : > { %1423 = vperm.xlu1 %1671, %v2217_v29  }
0x28fc   : > { %v1430_v37 = vpop.permute.xlu0 %1429 }
0x2900   : > { %v1229_v22 = vld [vmem:[%s1823_s12] sm:$0x1] }
0x2901   : > { %v1267_v62 = vsel %vm2276_vm7, %v1266_v21, %v1229_v22 }
0x2902   : > { %1268 = vst.msk [vmem:[%s1823_s12] sm:$0x1] %vm571_vm0, %v1267_v62 }
0x2909   : > { %v1270_v25 = vld [vmem:[%s1823_s12] sm:$0x1] }
0x290a   : > { %v1308_v26 = vsel %vm2294_vm9, %v1307_v24, %v1270_v25 }
0x290b   : > { %1309 = vst.msk [vmem:[%s1823_s12] sm:$0x1] %vm571_vm0, %v1308_v26 }
0x2912   : > { %v1311_v27 = vld [vmem:[%s1823_s12] sm:$0x1] }
0x2913   : > { %v1349_v29 = vsel %vm2312_vm4, %v1348_v23, %v1311_v27 }
0x2914   : > { %1350 = vst.msk [vmem:[%s1823_s12] sm:$0x1] %vm571_vm0, %v1349_v29 }
0x291b   : > { %v1352_v48 = vld [vmem:[%s1823_s12] sm:$0x1] }
0x291c   : > { %v1390_v31 = vsel %vm2330_vm13, %v1389_v30, %v1352_v48 }
0x291d   : > { %1391 = vst.msk [vmem:[%s1823_s12] sm:$0x1] %vm571_vm0, %v1390_v31 }
0x2924   : > { %v1393_v38 = vld [vmem:[%s1823_s12] sm:$0x1] }
0x2972   : > { %v1409_v32 = vpop.xlane.xlu1 %1408 }
0x2973   : > { %v1410_v35 = vcvt.f32.s32 %v1409_v32 }
0x2975   : > { %v1413_v46 = vadd.s32 %v1412_v33, %v1410_v35 }
0x2976   : > { %v1424_v9 = vpop.permute.xlu1 %1423 }
0x2977   : > { %vm1414_vm10 = vcmp.eq.s32.totalorder %v1794_v1, %v1413_v46 }
0x2978   : > { %vm1421_vm7 = vmand %vm1414_vm10, %vm1420_vm8 }
0x2979   : > { %v1431_v40 = vsel %vm1421_vm7, %v1430_v37, %v1393_v38  ;;  %v1426_v42 = vsel %vm1421_vm7, %v1424_v9, %v2339_v44 }
0x297a   : > { %1432 = vst.msk [vmem:[%s1823_s12] sm:$0x1] %vm571_vm0, %v1431_v40  ;;  %1427 = vst.msk [vmem:[%s1818_s8] sm:$0x1] %vm571_vm0, %v1426_v42 }
0x297b PF: > { %s18_s27 = sadd.s32 1, %s1710_s27   ;;  %s2454_s23 = smov %s1702_s25 }
0x297c   : > { %p15_p9 = scmp.ge.s32.totalorder %s18_s27, 10   ;;  %s2455_s24 = smov %s1706_s26 }
0x297d   : > { %s2456_s25 = smov %s2459_s0  ;;  %s2457_s26 = smov %s2463_s28 }
0x297e   :  { %17 = sbr.rel (!%p15_p9) target bundleno = 3 (0x3), region = 105 }

</bundles_post_ra>
